<compile_context>
chip_gen: v7x
topology: tpu7x:2x2x1
jax: 0.10.0
libtpu: 0.0.40
codegen_flags: <defaults>
</compile_context>

<pallas_src>
import jax
import jax.numpy as jnp
import numpy as np
from jax.experimental import pallas as pl
from jax.experimental.pallas import tpu as pltpu

# ----------------------------- configuration --------------------------------
DIM = 32          # model dim (LayerNorm dim)
HEADS = 4         # heads
DIM_HEAD = 16     # per-head dim
ANCHOR = 3        # STA conv kernel size along the sequence axis
B = 2             # batch
N = 8             # sequence length
INNER = HEADS * DIM_HEAD
SCALE = DIM_HEAD ** (-0.5)
PAD = (ANCHOR - 1) // 2
EPS = 1e-5        # nn.LayerNorm default eps
HN = HEADS * N    # 32


# --------------------------- fused PreNorm+Attention kernel ------------------
def _prenorm_attn_kernel(x_ref, g_ref, bta_ref, wq_ref, wk_ref, wv_ref,
                         wsta_ref, wout_ref, bout_ref, o_ref):
    # ---- LayerNorm over the feature dim (one batch element per grid step) ----
    x = x_ref[0]                                             # (N, DIM) f32
    mu = jnp.mean(x, axis=-1, keepdims=True)
    xc = x - mu
    var = jnp.mean(xc * xc, axis=-1, keepdims=True)
    xn = xc * jax.lax.rsqrt(var + EPS) * g_ref[...] + bta_ref[...]

    # ---- per-head attention: small standard-form MXU matmuls, no lane slicing ----
    outs = []
    for h in range(HEADS):                                   # unrolled (HEADS=4)
        q = jnp.dot(xn, wq_ref[h], preferred_element_type=jnp.float32)  # (N, Dh); SCALE pre-folded
        k = jnp.dot(xn, wk_ref[h], preferred_element_type=jnp.float32)  # (N, Dh)
        v = jnp.dot(xn, wv_ref[h], preferred_element_type=jnp.float32)  # (N, Dh)
        dots = jax.lax.dot_general(q, k, (((1,), (1,)), ((), ())),
                                   preferred_element_type=jnp.float32)  # (N, N)
        m = jnp.max(dots, axis=-1, keepdims=True)
        e = jnp.exp(dots - m)
        attn = e / jnp.sum(e, axis=-1, keepdims=True)        # exact softmax
        outs.append(jnp.dot(attn, v, preferred_element_type=jnp.float32))

    # sublane-aligned head stack: rows ordered (h, n), 8-row blocks
    out_stack = jnp.concatenate(outs, axis=0)                # (HEADS*N, Dh)

    # ---- STA conv: one banded (H*N, H*N) matmul; shift/zero-pad/head-mix baked in ----
    conv = jnp.dot(wsta_ref[...], out_stack,
                   preferred_element_type=jnp.float32)       # (HEADS*N, Dh), rows (o, n)

    # ---- head merge + to_out: per-head sublane slices, accumulate (N, DIM) ----
    y = jnp.zeros((N, DIM), jnp.float32)
    for h in range(HEADS):                                   # unrolled
        y = y + jnp.dot(conv[h * N:(h + 1) * N, :], wout_ref[h],
                        preferred_element_type=jnp.float32)
    o_ref[0] = (y + bout_ref[...]).astype(o_ref.dtype)       # conv bias already folded in


# --------------------- wrapper-side parameter preprocessing ------------------
def _build_sta_matrix(w_conv_eff):
    """(H, H, ANCHOR) effective conv weight -> (H*N, H*N) matrix implementing
    Conv2d(H, H, (ANCHOR,1), padding=(PAD,0)) along the sequence axis for ONE
    batch element, with zero padding and head mixing baked in.
    Rows: (o, n).  Cols: (h, n') — matching the kernel's sublane head stack."""
    o_i = jnp.arange(HEADS).reshape(HEADS, 1, 1, 1)
    n_i = jnp.arange(N).reshape(1, N, 1, 1)
    h_i = jnp.arange(HEADS).reshape(1, 1, HEADS, 1)
    n_j = jnp.arange(N).reshape(1, 1, 1, N)
    a = n_j - n_i + PAD
    valid = (a >= 0) & (a < ANCHOR)
    w = w_conv_eff[o_i, h_i, jnp.clip(a, 0, ANCHOR - 1)]
    W = jnp.where(valid, w, 0.0)
    return W.reshape(HN, HN).astype(jnp.float32)


@jax.jit
def prenorm_attention_forward(x, params):
    gamma = params["gamma"].reshape(1, DIM)
    beta = params["beta"].reshape(1, DIM)

    # Per-head q/k/v weight stacks (HEADS, DIM, DIM_HEAD); SCALE folded into q.
    wq, wk, wv = (params["w_qkv"][:, i * INNER:(i + 1) * INNER]
                  .reshape(DIM, HEADS, DIM_HEAD)
                  .transpose(1, 0, 2)
                  for i in range(3))
    wq = wq * SCALE

    w_sta = _build_sta_matrix(params["w_conv"])              # (H*N, H*N)
    w_out_h = params["w_out"].reshape(HEADS, DIM_HEAD, DIM)  # per-head to_out
    # Fold the conv bias (constant over (n, d)) exactly into the to_out bias.
    b_out_eff = (params["b_out"]
                 + jnp.repeat(params["b_conv"], DIM_HEAD) @ params["w_out"]
                 ).reshape(1, DIM)

    def resident(shape):
        zeros = (0,) * len(shape)
        return pl.BlockSpec(shape, lambda b: zeros)          # constant block -> DMA'd once

    y = pl.pallas_call(
        _prenorm_attn_kernel,
        out_shape=jax.ShapeDtypeStruct((B, N, DIM), jnp.float32),
        grid_spec=pltpu.PrefetchScalarGridSpec(
            num_scalar_prefetch=0,
            grid=(B,),                                       # parallel over batch
            in_specs=[
                pl.BlockSpec((1, N, DIM), lambda b: (b, 0, 0)),   # x tile per step
                resident((1, DIM)),                               # gamma
                resident((1, DIM)),                               # beta
                resident((HEADS, DIM, DIM_HEAD)),                 # wq (scaled)
                resident((HEADS, DIM, DIM_HEAD)),                 # wk
                resident((HEADS, DIM, DIM_HEAD)),                 # wv
                resident((HN, HN)),                               # STA conv matrix
                resident((HEADS, DIM_HEAD, DIM)),                 # w_out per head
                resident((1, DIM)),                               # effective output bias
            ],
            out_specs=pl.BlockSpec((1, N, DIM), lambda b: (b, 0, 0)),
        ),
        compiler_params=pltpu.CompilerParams(
            dimension_semantics=("parallel",)),
    )(x, gamma, beta, wq, wk, wv, w_sta, w_out_h, b_out_eff)
    return y


# ----------------------------- pure-JAX reference ----------------------------
def prenorm_attention_reference(x, params):
    mu = jnp.mean(x, axis=-1, keepdims=True)
    var = jnp.mean((x - mu) ** 2, axis=-1, keepdims=True)
    xn = (x - mu) / jnp.sqrt(var + EPS) * params["gamma"] + params["beta"]
    qkv = xn @ params["w_qkv"]
    q, k, v = jnp.split(qkv, 3, axis=-1)
    to_heads = lambda t: t.reshape(B, N, HEADS, DIM_HEAD).transpose(0, 2, 1, 3)
    q, k, v = map(to_heads, (q, k, v))
    dots = jnp.einsum('bhqd,bhkd->bhqk', q, k) * SCALE
    attn = jax.nn.softmax(dots, axis=-1)
    out = jnp.einsum('bhqk,bhkd->bhqd', attn, v)              # (B, H, N, D)
    out = jax.lax.conv_general_dilated(
        out, params["w_conv"].reshape(HEADS, HEADS, ANCHOR, 1),
        window_strides=(1, 1), padding=((PAD, PAD), (0, 0)),
        dimension_numbers=('NCHW', 'OIHW', 'NCHW'),
    ) + params["b_conv"].reshape(1, HEADS, 1, 1)
    out = out.transpose(0, 2, 1, 3).reshape(B, N, INNER)
    return out @ params["w_out"] + params["b_out"]


# ---------------------------------- main -------------------------------------
if __name__ == "__main__":
    # Keep kernel and reference matmuls at full f32 precision for a tight check.
    jax.config.update("jax_default_matmul_precision", "highest")

    key = jax.random.PRNGKey(0)
    kx, k1, k2, k3, k4, k5, k6, k7, k8 = jax.random.split(key, 9)

    x = jax.random.normal(kx, (B, N, DIM), jnp.float32)

    # PreNorm's LayerNorm affine params
    gamma = 1.0 + 0.1 * jax.random.normal(k7, (DIM,), jnp.float32)
    beta = 0.1 * jax.random.normal(k8, (DIM,), jnp.float32)

    # to_qkv: Linear(DIM, 3*INNER, bias=False), stored transposed (DIM, 3*INNER)
    w_qkv = jax.random.normal(k1, (DIM, 3 * INNER), jnp.float32) * 0.1

    # STA conv with weight_norm: w = g * v / ||v||_{dims 1,2,3}
    v_conv = jax.random.normal(k2, (HEADS, HEADS, ANCHOR, 1), jnp.float32) * 0.2
    g_conv = jax.random.normal(k3, (HEADS, 1, 1, 1), jnp.float32) * 0.5 + 1.0
    v_norm = jnp.sqrt(jnp.sum(v_conv ** 2, axis=(1, 2, 3), keepdims=True))
    w_conv_eff = (g_conv * v_conv / v_norm).reshape(HEADS, HEADS, ANCHOR)
    b_conv = jax.random.normal(k4, (HEADS,), jnp.float32) * 0.1

    # to_out: Linear(INNER, DIM) with bias, stored transposed (INNER, DIM)
    w_out = jax.random.normal(k5, (INNER, DIM), jnp.float32) * 0.1
    b_out = jax.random.normal(k6, (DIM,), jnp.float32) * 0.1

    params = dict(gamma=gamma, beta=beta, w_qkv=w_qkv, w_conv=w_conv_eff,
                  b_conv=b_conv, w_out=w_out, b_out=b_out)

    y = prenorm_attention_forward(x, params)
    y = jax.block_until_ready(y)

    y_ref = prenorm_attention_reference(x, params)
    np.testing.assert_allclose(np.asarray(y), np.asarray(y_ref),
                               rtol=2e-3, atol=2e-3)
    print("KERNEL_OK")
</pallas_src>

<mosaic_0001>
module attributes {stable_mosaic.version = 11 : i64} {
  func.func @_prenorm_attn_kernel(%arg0: i32, %arg1: memref<1x8x32xf32, #tpu.memory_space<vmem>>, %arg2: memref<1x32xf32, #tpu.memory_space<vmem>>, %arg3: memref<1x32xf32, #tpu.memory_space<vmem>>, %arg4: memref<4x32x16xf32, #tpu.memory_space<vmem>>, %arg5: memref<4x32x16xf32, #tpu.memory_space<vmem>>, %arg6: memref<4x32x16xf32, #tpu.memory_space<vmem>>, %arg7: memref<32x32xf32, #tpu.memory_space<vmem>>, %arg8: memref<4x16x32xf32, #tpu.memory_space<vmem>>, %arg9: memref<1x32xf32, #tpu.memory_space<vmem>>, %arg10: memref<1x8x32xf32, #tpu.memory_space<vmem>>) attributes {dimension_semantics = [#tpu.dimension_semantics<parallel>], iteration_bounds = array<i64: 2>, scalar_prefetch = 0 : i64, scratch_operands = 0 : i64, tpu.core_type = #tpu.core_type<tc>, window_params = [{transform_indices = @transform_0, window_bounds = array<i64: 1, 8, 32>}, {pipeline_mode = #tpu.pipeline_mode<synchronous>, transform_indices = @transform_1, window_bounds = array<i64: 1, 32>}, {pipeline_mode = #tpu.pipeline_mode<synchronous>, transform_indices = @transform_2, window_bounds = array<i64: 1, 32>}, {pipeline_mode = #tpu.pipeline_mode<synchronous>, transform_indices = @transform_3, window_bounds = array<i64: 4, 32, 16>}, {pipeline_mode = #tpu.pipeline_mode<synchronous>, transform_indices = @transform_4, window_bounds = array<i64: 4, 32, 16>}, {pipeline_mode = #tpu.pipeline_mode<synchronous>, transform_indices = @transform_5, window_bounds = array<i64: 4, 32, 16>}, {pipeline_mode = #tpu.pipeline_mode<synchronous>, transform_indices = @transform_6, window_bounds = array<i64: 32, 32>}, {pipeline_mode = #tpu.pipeline_mode<synchronous>, transform_indices = @transform_7, window_bounds = array<i64: 4, 16, 32>}, {pipeline_mode = #tpu.pipeline_mode<synchronous>, transform_indices = @transform_8, window_bounds = array<i64: 1, 32>}, {transform_indices = @transform_9, window_bounds = array<i64: 1, 8, 32>}]} {
    %c0 = arith.constant 0 : index
    %c0_0 = arith.constant 0 : index
    %c0_1 = arith.constant 0 : index
    %0 = vector.load %arg1[%c0, %c0_0, %c0_1] : memref<1x8x32xf32, #tpu.memory_space<vmem>>, vector<1x8x32xf32>
    %1 = vector.shape_cast %0 : vector<1x8x32xf32> to vector<8x32xf32>
    %cst = arith.constant dense<0.000000e+00> : vector<8xf32>
    %2 = vector.multi_reduction <add>, %1, %cst [1] : vector<8x32xf32> to vector<8xf32>
    %3 = vector.shape_cast %2 : vector<8xf32> to vector<8x1xf32>
    %cst_2 = arith.constant 3.200000e+01 : f32
    %4 = vector.broadcast %cst_2 : f32 to vector<8x1xf32>
    %5 = arith.divf %3, %4 : vector<8x1xf32>
    %6 = vector.broadcast %5 : vector<8x1xf32> to vector<8x32xf32>
    %7 = arith.subf %1, %6 : vector<8x32xf32>
    %8 = arith.mulf %7, %7 : vector<8x32xf32>
    %cst_3 = arith.constant dense<0.000000e+00> : vector<8xf32>
    %9 = vector.multi_reduction <add>, %8, %cst_3 [1] : vector<8x32xf32> to vector<8xf32>
    %10 = vector.shape_cast %9 : vector<8xf32> to vector<8x1xf32>
    %cst_4 = arith.constant 3.200000e+01 : f32
    %11 = vector.broadcast %cst_4 : f32 to vector<8x1xf32>
    %12 = arith.divf %10, %11 : vector<8x1xf32>
    %cst_5 = arith.constant 9.99999974E-6 : f32
    %13 = vector.broadcast %cst_5 : f32 to vector<8x1xf32>
    %14 = arith.addf %12, %13 : vector<8x1xf32>
    %15 = math.rsqrt %14 : vector<8x1xf32>
    %16 = vector.broadcast %15 : vector<8x1xf32> to vector<8x32xf32>
    %17 = arith.mulf %7, %16 : vector<8x32xf32>
    %c0_6 = arith.constant 0 : index
    %c0_7 = arith.constant 0 : index
    %18 = vector.load %arg2[%c0_6, %c0_7] : memref<1x32xf32, #tpu.memory_space<vmem>>, vector<1x32xf32>
    %19 = vector.broadcast %18 : vector<1x32xf32> to vector<8x32xf32>
    %20 = arith.mulf %17, %19 : vector<8x32xf32>
    %c0_8 = arith.constant 0 : index
    %c0_9 = arith.constant 0 : index
    %21 = vector.load %arg3[%c0_8, %c0_9] : memref<1x32xf32, #tpu.memory_space<vmem>>, vector<1x32xf32>
    %22 = vector.broadcast %21 : vector<1x32xf32> to vector<8x32xf32>
    %23 = arith.addf %20, %22 : vector<8x32xf32>
    %c0_10 = arith.constant 0 : index
    %c0_11 = arith.constant 0 : index
    %c0_12 = arith.constant 0 : index
    %24 = vector.load %arg4[%c0_10, %c0_11, %c0_12] : memref<4x32x16xf32, #tpu.memory_space<vmem>>, vector<1x32x16xf32>
    %25 = vector.shape_cast %24 : vector<1x32x16xf32> to vector<32x16xf32>
    %cst_13 = arith.constant dense<0.000000e+00> : vector<8x16xf32>
    %26 = tpu.matmul %23, %25, %cst_13 {dimension_numbers = #tpu.dot_dimension_numbers<[1], [0], [0], [1], [0, 0, 1, 1], [], []>, precision = #tpu.contract_precision<fp32>} : vector<8x32xf32>, vector<32x16xf32>, vector<8x16xf32> -> vector<8x16xf32>
    %c0_14 = arith.constant 0 : index
    %c0_15 = arith.constant 0 : index
    %c0_16 = arith.constant 0 : index
    %27 = vector.load %arg5[%c0_14, %c0_15, %c0_16] : memref<4x32x16xf32, #tpu.memory_space<vmem>>, vector<1x32x16xf32>
    %28 = vector.shape_cast %27 : vector<1x32x16xf32> to vector<32x16xf32>
    %cst_17 = arith.constant dense<0.000000e+00> : vector<8x16xf32>
    %29 = tpu.matmul %23, %28, %cst_17 {dimension_numbers = #tpu.dot_dimension_numbers<[1], [0], [0], [1], [0, 0, 1, 1], [], []>, precision = #tpu.contract_precision<fp32>} : vector<8x32xf32>, vector<32x16xf32>, vector<8x16xf32> -> vector<8x16xf32>
    %c0_18 = arith.constant 0 : index
    %c0_19 = arith.constant 0 : index
    %c0_20 = arith.constant 0 : index
    %30 = vector.load %arg6[%c0_18, %c0_19, %c0_20] : memref<4x32x16xf32, #tpu.memory_space<vmem>>, vector<1x32x16xf32>
    %31 = vector.shape_cast %30 : vector<1x32x16xf32> to vector<32x16xf32>
    %cst_21 = arith.constant dense<0.000000e+00> : vector<8x16xf32>
    %32 = tpu.matmul %23, %31, %cst_21 {dimension_numbers = #tpu.dot_dimension_numbers<[1], [0], [0], [1], [0, 0, 1, 1], [], []>, precision = #tpu.contract_precision<fp32>} : vector<8x32xf32>, vector<32x16xf32>, vector<8x16xf32> -> vector<8x16xf32>
    %cst_22 = arith.constant dense<0.000000e+00> : vector<8x8xf32>
    %33 = tpu.matmul %26, %29, %cst_22 {dimension_numbers = #tpu.dot_dimension_numbers<[1], [1], [0], [0], [0, 0, 1, 0], [], []>, precision = #tpu.contract_precision<fp32>} : vector<8x16xf32>, vector<8x16xf32>, vector<8x8xf32> -> vector<8x8xf32>
    %cst_23 = arith.constant dense<0xFF800000> : vector<8xf32>
    %34 = vector.multi_reduction <maximumf>, %33, %cst_23 [1] : vector<8x8xf32> to vector<8xf32>
    %35 = vector.shape_cast %34 : vector<8xf32> to vector<8x1xf32>
    %36 = vector.broadcast %35 : vector<8x1xf32> to vector<8x8xf32>
    %37 = arith.subf %33, %36 : vector<8x8xf32>
    %38 = math.exp %37 : vector<8x8xf32>
    %cst_24 = arith.constant dense<0.000000e+00> : vector<8xf32>
    %39 = vector.multi_reduction <add>, %38, %cst_24 [1] : vector<8x8xf32> to vector<8xf32>
    %40 = vector.shape_cast %39 : vector<8xf32> to vector<8x1xf32>
    %41 = vector.broadcast %40 : vector<8x1xf32> to vector<8x8xf32>
    %42 = arith.divf %38, %41 : vector<8x8xf32>
    %cst_25 = arith.constant dense<0.000000e+00> : vector<8x16xf32>
    %43 = tpu.matmul %42, %32, %cst_25 {dimension_numbers = #tpu.dot_dimension_numbers<[1], [0], [0], [1], [0, 0, 1, 1], [], []>, precision = #tpu.contract_precision<fp32>} : vector<8x8xf32>, vector<8x16xf32>, vector<8x16xf32> -> vector<8x16xf32>
    %c1 = arith.constant 1 : index
    %c0_26 = arith.constant 0 : index
    %c0_27 = arith.constant 0 : index
    %44 = vector.load %arg4[%c1, %c0_26, %c0_27] : memref<4x32x16xf32, #tpu.memory_space<vmem>>, vector<1x32x16xf32>
    %45 = vector.shape_cast %44 : vector<1x32x16xf32> to vector<32x16xf32>
    %cst_28 = arith.constant dense<0.000000e+00> : vector<8x16xf32>
    %46 = tpu.matmul %23, %45, %cst_28 {dimension_numbers = #tpu.dot_dimension_numbers<[1], [0], [0], [1], [0, 0, 1, 1], [], []>, precision = #tpu.contract_precision<fp32>} : vector<8x32xf32>, vector<32x16xf32>, vector<8x16xf32> -> vector<8x16xf32>
    %c1_29 = arith.constant 1 : index
    %c0_30 = arith.constant 0 : index
    %c0_31 = arith.constant 0 : index
    %47 = vector.load %arg5[%c1_29, %c0_30, %c0_31] : memref<4x32x16xf32, #tpu.memory_space<vmem>>, vector<1x32x16xf32>
    %48 = vector.shape_cast %47 : vector<1x32x16xf32> to vector<32x16xf32>
    %cst_32 = arith.constant dense<0.000000e+00> : vector<8x16xf32>
    %49 = tpu.matmul %23, %48, %cst_32 {dimension_numbers = #tpu.dot_dimension_numbers<[1], [0], [0], [1], [0, 0, 1, 1], [], []>, precision = #tpu.contract_precision<fp32>} : vector<8x32xf32>, vector<32x16xf32>, vector<8x16xf32> -> vector<8x16xf32>
    %c1_33 = arith.constant 1 : index
    %c0_34 = arith.constant 0 : index
    %c0_35 = arith.constant 0 : index
    %50 = vector.load %arg6[%c1_33, %c0_34, %c0_35] : memref<4x32x16xf32, #tpu.memory_space<vmem>>, vector<1x32x16xf32>
    %51 = vector.shape_cast %50 : vector<1x32x16xf32> to vector<32x16xf32>
    %cst_36 = arith.constant dense<0.000000e+00> : vector<8x16xf32>
    %52 = tpu.matmul %23, %51, %cst_36 {dimension_numbers = #tpu.dot_dimension_numbers<[1], [0], [0], [1], [0, 0, 1, 1], [], []>, precision = #tpu.contract_precision<fp32>} : vector<8x32xf32>, vector<32x16xf32>, vector<8x16xf32> -> vector<8x16xf32>
    %cst_37 = arith.constant dense<0.000000e+00> : vector<8x8xf32>
    %53 = tpu.matmul %46, %49, %cst_37 {dimension_numbers = #tpu.dot_dimension_numbers<[1], [1], [0], [0], [0, 0, 1, 0], [], []>, precision = #tpu.contract_precision<fp32>} : vector<8x16xf32>, vector<8x16xf32>, vector<8x8xf32> -> vector<8x8xf32>
    %cst_38 = arith.constant dense<0xFF800000> : vector<8xf32>
    %54 = vector.multi_reduction <maximumf>, %53, %cst_38 [1] : vector<8x8xf32> to vector<8xf32>
    %55 = vector.shape_cast %54 : vector<8xf32> to vector<8x1xf32>
    %56 = vector.broadcast %55 : vector<8x1xf32> to vector<8x8xf32>
    %57 = arith.subf %53, %56 : vector<8x8xf32>
    %58 = math.exp %57 : vector<8x8xf32>
    %cst_39 = arith.constant dense<0.000000e+00> : vector<8xf32>
    %59 = vector.multi_reduction <add>, %58, %cst_39 [1] : vector<8x8xf32> to vector<8xf32>
    %60 = vector.shape_cast %59 : vector<8xf32> to vector<8x1xf32>
    %61 = vector.broadcast %60 : vector<8x1xf32> to vector<8x8xf32>
    %62 = arith.divf %58, %61 : vector<8x8xf32>
    %cst_40 = arith.constant dense<0.000000e+00> : vector<8x16xf32>
    %63 = tpu.matmul %62, %52, %cst_40 {dimension_numbers = #tpu.dot_dimension_numbers<[1], [0], [0], [1], [0, 0, 1, 1], [], []>, precision = #tpu.contract_precision<fp32>} : vector<8x8xf32>, vector<8x16xf32>, vector<8x16xf32> -> vector<8x16xf32>
    %c2 = arith.constant 2 : index
    %c0_41 = arith.constant 0 : index
    %c0_42 = arith.constant 0 : index
    %64 = vector.load %arg4[%c2, %c0_41, %c0_42] : memref<4x32x16xf32, #tpu.memory_space<vmem>>, vector<1x32x16xf32>
    %65 = vector.shape_cast %64 : vector<1x32x16xf32> to vector<32x16xf32>
    %cst_43 = arith.constant dense<0.000000e+00> : vector<8x16xf32>
    %66 = tpu.matmul %23, %65, %cst_43 {dimension_numbers = #tpu.dot_dimension_numbers<[1], [0], [0], [1], [0, 0, 1, 1], [], []>, precision = #tpu.contract_precision<fp32>} : vector<8x32xf32>, vector<32x16xf32>, vector<8x16xf32> -> vector<8x16xf32>
    %c2_44 = arith.constant 2 : index
    %c0_45 = arith.constant 0 : index
    %c0_46 = arith.constant 0 : index
    %67 = vector.load %arg5[%c2_44, %c0_45, %c0_46] : memref<4x32x16xf32, #tpu.memory_space<vmem>>, vector<1x32x16xf32>
    %68 = vector.shape_cast %67 : vector<1x32x16xf32> to vector<32x16xf32>
    %cst_47 = arith.constant dense<0.000000e+00> : vector<8x16xf32>
    %69 = tpu.matmul %23, %68, %cst_47 {dimension_numbers = #tpu.dot_dimension_numbers<[1], [0], [0], [1], [0, 0, 1, 1], [], []>, precision = #tpu.contract_precision<fp32>} : vector<8x32xf32>, vector<32x16xf32>, vector<8x16xf32> -> vector<8x16xf32>
    %c2_48 = arith.constant 2 : index
    %c0_49 = arith.constant 0 : index
    %c0_50 = arith.constant 0 : index
    %70 = vector.load %arg6[%c2_48, %c0_49, %c0_50] : memref<4x32x16xf32, #tpu.memory_space<vmem>>, vector<1x32x16xf32>
    %71 = vector.shape_cast %70 : vector<1x32x16xf32> to vector<32x16xf32>
    %cst_51 = arith.constant dense<0.000000e+00> : vector<8x16xf32>
    %72 = tpu.matmul %23, %71, %cst_51 {dimension_numbers = #tpu.dot_dimension_numbers<[1], [0], [0], [1], [0, 0, 1, 1], [], []>, precision = #tpu.contract_precision<fp32>} : vector<8x32xf32>, vector<32x16xf32>, vector<8x16xf32> -> vector<8x16xf32>
    %cst_52 = arith.constant dense<0.000000e+00> : vector<8x8xf32>
    %73 = tpu.matmul %66, %69, %cst_52 {dimension_numbers = #tpu.dot_dimension_numbers<[1], [1], [0], [0], [0, 0, 1, 0], [], []>, precision = #tpu.contract_precision<fp32>} : vector<8x16xf32>, vector<8x16xf32>, vector<8x8xf32> -> vector<8x8xf32>
    %cst_53 = arith.constant dense<0xFF800000> : vector<8xf32>
    %74 = vector.multi_reduction <maximumf>, %73, %cst_53 [1] : vector<8x8xf32> to vector<8xf32>
    %75 = vector.shape_cast %74 : vector<8xf32> to vector<8x1xf32>
    %76 = vector.broadcast %75 : vector<8x1xf32> to vector<8x8xf32>
    %77 = arith.subf %73, %76 : vector<8x8xf32>
    %78 = math.exp %77 : vector<8x8xf32>
    %cst_54 = arith.constant dense<0.000000e+00> : vector<8xf32>
    %79 = vector.multi_reduction <add>, %78, %cst_54 [1] : vector<8x8xf32> to vector<8xf32>
    %80 = vector.shape_cast %79 : vector<8xf32> to vector<8x1xf32>
    %81 = vector.broadcast %80 : vector<8x1xf32> to vector<8x8xf32>
    %82 = arith.divf %78, %81 : vector<8x8xf32>
    %cst_55 = arith.constant dense<0.000000e+00> : vector<8x16xf32>
    %83 = tpu.matmul %82, %72, %cst_55 {dimension_numbers = #tpu.dot_dimension_numbers<[1], [0], [0], [1], [0, 0, 1, 1], [], []>, precision = #tpu.contract_precision<fp32>} : vector<8x8xf32>, vector<8x16xf32>, vector<8x16xf32> -> vector<8x16xf32>
    %c3 = arith.constant 3 : index
    %c0_56 = arith.constant 0 : index
    %c0_57 = arith.constant 0 : index
    %84 = vector.load %arg4[%c3, %c0_56, %c0_57] : memref<4x32x16xf32, #tpu.memory_space<vmem>>, vector<1x32x16xf32>
    %85 = vector.shape_cast %84 : vector<1x32x16xf32> to vector<32x16xf32>
    %cst_58 = arith.constant dense<0.000000e+00> : vector<8x16xf32>
    %86 = tpu.matmul %23, %85, %cst_58 {dimension_numbers = #tpu.dot_dimension_numbers<[1], [0], [0], [1], [0, 0, 1, 1], [], []>, precision = #tpu.contract_precision<fp32>} : vector<8x32xf32>, vector<32x16xf32>, vector<8x16xf32> -> vector<8x16xf32>
    %c3_59 = arith.constant 3 : index
    %c0_60 = arith.constant 0 : index
    %c0_61 = arith.constant 0 : index
    %87 = vector.load %arg5[%c3_59, %c0_60, %c0_61] : memref<4x32x16xf32, #tpu.memory_space<vmem>>, vector<1x32x16xf32>
    %88 = vector.shape_cast %87 : vector<1x32x16xf32> to vector<32x16xf32>
    %cst_62 = arith.constant dense<0.000000e+00> : vector<8x16xf32>
    %89 = tpu.matmul %23, %88, %cst_62 {dimension_numbers = #tpu.dot_dimension_numbers<[1], [0], [0], [1], [0, 0, 1, 1], [], []>, precision = #tpu.contract_precision<fp32>} : vector<8x32xf32>, vector<32x16xf32>, vector<8x16xf32> -> vector<8x16xf32>
    %c3_63 = arith.constant 3 : index
    %c0_64 = arith.constant 0 : index
    %c0_65 = arith.constant 0 : index
    %90 = vector.load %arg6[%c3_63, %c0_64, %c0_65] : memref<4x32x16xf32, #tpu.memory_space<vmem>>, vector<1x32x16xf32>
    %91 = vector.shape_cast %90 : vector<1x32x16xf32> to vector<32x16xf32>
    %cst_66 = arith.constant dense<0.000000e+00> : vector<8x16xf32>
    %92 = tpu.matmul %23, %91, %cst_66 {dimension_numbers = #tpu.dot_dimension_numbers<[1], [0], [0], [1], [0, 0, 1, 1], [], []>, precision = #tpu.contract_precision<fp32>} : vector<8x32xf32>, vector<32x16xf32>, vector<8x16xf32> -> vector<8x16xf32>
    %cst_67 = arith.constant dense<0.000000e+00> : vector<8x8xf32>
    %93 = tpu.matmul %86, %89, %cst_67 {dimension_numbers = #tpu.dot_dimension_numbers<[1], [1], [0], [0], [0, 0, 1, 0], [], []>, precision = #tpu.contract_precision<fp32>} : vector<8x16xf32>, vector<8x16xf32>, vector<8x8xf32> -> vector<8x8xf32>
    %cst_68 = arith.constant dense<0xFF800000> : vector<8xf32>
    %94 = vector.multi_reduction <maximumf>, %93, %cst_68 [1] : vector<8x8xf32> to vector<8xf32>
    %95 = vector.shape_cast %94 : vector<8xf32> to vector<8x1xf32>
    %96 = vector.broadcast %95 : vector<8x1xf32> to vector<8x8xf32>
    %97 = arith.subf %93, %96 : vector<8x8xf32>
    %98 = math.exp %97 : vector<8x8xf32>
    %cst_69 = arith.constant dense<0.000000e+00> : vector<8xf32>
    %99 = vector.multi_reduction <add>, %98, %cst_69 [1] : vector<8x8xf32> to vector<8xf32>
    %100 = vector.shape_cast %99 : vector<8xf32> to vector<8x1xf32>
    %101 = vector.broadcast %100 : vector<8x1xf32> to vector<8x8xf32>
    %102 = arith.divf %98, %101 : vector<8x8xf32>
    %cst_70 = arith.constant dense<0.000000e+00> : vector<8x16xf32>
    %103 = tpu.matmul %102, %92, %cst_70 {dimension_numbers = #tpu.dot_dimension_numbers<[1], [0], [0], [1], [0, 0, 1, 1], [], []>, precision = #tpu.contract_precision<fp32>} : vector<8x8xf32>, vector<8x16xf32>, vector<8x16xf32> -> vector<8x16xf32>
    %104 = tpu.concatenate %43, %63, %83, %103 in 0 : vector<8x16xf32>, vector<8x16xf32>, vector<8x16xf32>, vector<8x16xf32> -> vector<32x16xf32>
    %c0_71 = arith.constant 0 : index
    %c0_72 = arith.constant 0 : index
    %105 = vector.load %arg7[%c0_71, %c0_72] : memref<32x32xf32, #tpu.memory_space<vmem>>, vector<32x32xf32>
    %cst_73 = arith.constant dense<0.000000e+00> : vector<32x16xf32>
    %106 = tpu.matmul %105, %104, %cst_73 {dimension_numbers = #tpu.dot_dimension_numbers<[1], [0], [0], [1], [0, 0, 1, 1], [], []>, precision = #tpu.contract_precision<fp32>} : vector<32x32xf32>, vector<32x16xf32>, vector<32x16xf32> -> vector<32x16xf32>
    %cst_74 = arith.constant 0.000000e+00 : f32
    %107 = vector.broadcast %cst_74 : f32 to vector<8x32xf32>
    %108 = vector.extract_strided_slice %106 {offsets = [0, 0], sizes = [8, 16], strides = [1, 1]} : vector<32x16xf32> to vector<8x16xf32>
    %c0_75 = arith.constant 0 : index
    %c0_76 = arith.constant 0 : index
    %c0_77 = arith.constant 0 : index
    %109 = vector.load %arg8[%c0_75, %c0_76, %c0_77] : memref<4x16x32xf32, #tpu.memory_space<vmem>>, vector<1x16x32xf32>
    %110 = vector.shape_cast %109 : vector<1x16x32xf32> to vector<16x32xf32>
    %cst_78 = arith.constant dense<0.000000e+00> : vector<8x32xf32>
    %111 = tpu.matmul %108, %110, %cst_78 {dimension_numbers = #tpu.dot_dimension_numbers<[1], [0], [0], [1], [0, 0, 1, 1], [], []>, precision = #tpu.contract_precision<fp32>} : vector<8x16xf32>, vector<16x32xf32>, vector<8x32xf32> -> vector<8x32xf32>
    %112 = arith.addf %107, %111 : vector<8x32xf32>
    %113 = vector.extract_strided_slice %106 {offsets = [8, 0], sizes = [8, 16], strides = [1, 1]} : vector<32x16xf32> to vector<8x16xf32>
    %c1_79 = arith.constant 1 : index
    %c0_80 = arith.constant 0 : index
    %c0_81 = arith.constant 0 : index
    %114 = vector.load %arg8[%c1_79, %c0_80, %c0_81] : memref<4x16x32xf32, #tpu.memory_space<vmem>>, vector<1x16x32xf32>
    %115 = vector.shape_cast %114 : vector<1x16x32xf32> to vector<16x32xf32>
    %cst_82 = arith.constant dense<0.000000e+00> : vector<8x32xf32>
    %116 = tpu.matmul %113, %115, %cst_82 {dimension_numbers = #tpu.dot_dimension_numbers<[1], [0], [0], [1], [0, 0, 1, 1], [], []>, precision = #tpu.contract_precision<fp32>} : vector<8x16xf32>, vector<16x32xf32>, vector<8x32xf32> -> vector<8x32xf32>
    %117 = arith.addf %112, %116 : vector<8x32xf32>
    %118 = vector.extract_strided_slice %106 {offsets = [16, 0], sizes = [8, 16], strides = [1, 1]} : vector<32x16xf32> to vector<8x16xf32>
    %c2_83 = arith.constant 2 : index
    %c0_84 = arith.constant 0 : index
    %c0_85 = arith.constant 0 : index
    %119 = vector.load %arg8[%c2_83, %c0_84, %c0_85] : memref<4x16x32xf32, #tpu.memory_space<vmem>>, vector<1x16x32xf32>
    %120 = vector.shape_cast %119 : vector<1x16x32xf32> to vector<16x32xf32>
    %cst_86 = arith.constant dense<0.000000e+00> : vector<8x32xf32>
    %121 = tpu.matmul %118, %120, %cst_86 {dimension_numbers = #tpu.dot_dimension_numbers<[1], [0], [0], [1], [0, 0, 1, 1], [], []>, precision = #tpu.contract_precision<fp32>} : vector<8x16xf32>, vector<16x32xf32>, vector<8x32xf32> -> vector<8x32xf32>
    %122 = arith.addf %117, %121 : vector<8x32xf32>
    %123 = vector.extract_strided_slice %106 {offsets = [24, 0], sizes = [8, 16], strides = [1, 1]} : vector<32x16xf32> to vector<8x16xf32>
    %c3_87 = arith.constant 3 : index
    %c0_88 = arith.constant 0 : index
    %c0_89 = arith.constant 0 : index
    %124 = vector.load %arg8[%c3_87, %c0_88, %c0_89] : memref<4x16x32xf32, #tpu.memory_space<vmem>>, vector<1x16x32xf32>
    %125 = vector.shape_cast %124 : vector<1x16x32xf32> to vector<16x32xf32>
    %cst_90 = arith.constant dense<0.000000e+00> : vector<8x32xf32>
    %126 = tpu.matmul %123, %125, %cst_90 {dimension_numbers = #tpu.dot_dimension_numbers<[1], [0], [0], [1], [0, 0, 1, 1], [], []>, precision = #tpu.contract_precision<fp32>} : vector<8x16xf32>, vector<16x32xf32>, vector<8x32xf32> -> vector<8x32xf32>
    %127 = arith.addf %122, %126 : vector<8x32xf32>
    %c0_91 = arith.constant 0 : index
    %c0_92 = arith.constant 0 : index
    %128 = vector.load %arg9[%c0_91, %c0_92] : memref<1x32xf32, #tpu.memory_space<vmem>>, vector<1x32xf32>
    %129 = vector.broadcast %128 : vector<1x32xf32> to vector<8x32xf32>
    %130 = arith.addf %127, %129 : vector<8x32xf32>
    %c0_93 = arith.constant 0 : index
    %c0_94 = arith.constant 0 : index
    %c0_95 = arith.constant 0 : index
    %131 = vector.load %arg10[%c0_93, %c0_94, %c0_95] : memref<1x8x32xf32, #tpu.memory_space<vmem>>, vector<1x8x32xf32>
    %132 = vector.shape_cast %131 : vector<1x8x32xf32> to vector<8x32xf32>
    %133 = vector.shape_cast %130 : vector<8x32xf32> to vector<1x8x32xf32>
    tpu.vector_store %arg10[%c0_93, %c0_94, %c0_95], %133 {strides = array<i32>} : memref<1x8x32xf32, #tpu.memory_space<vmem>>, vector<1x8x32xf32>,
    return
  }
  func.func @transform_0(%arg0: i32) -> (i32, i32, i32) {
    %c0_i32 = arith.constant 0 : i32
    %c0_i32_0 = arith.constant 0 : i32
    %c0_i32_1 = arith.constant 0 : i32
    return %arg0, %c0_i32, %c0_i32_0 : i32, i32, i32
  }
  func.func @transform_1(%arg0: i32) -> (i32, i32) {
    %c0_i32 = arith.constant 0 : i32
    %c0_i32_0 = arith.constant 0 : i32
    %c0_i32_1 = arith.constant 0 : i32
    return %c0_i32, %c0_i32_0 : i32, i32
  }
  func.func @transform_2(%arg0: i32) -> (i32, i32) {
    %c0_i32 = arith.constant 0 : i32
    %c0_i32_0 = arith.constant 0 : i32
    %c0_i32_1 = arith.constant 0 : i32
    return %c0_i32, %c0_i32_0 : i32, i32
  }
  func.func @transform_3(%arg0: i32) -> (i32, i32, i32) {
    %c0_i32 = arith.constant 0 : i32
    %c0_i32_0 = arith.constant 0 : i32
    %c0_i32_1 = arith.constant 0 : i32
    %c0_i32_2 = arith.constant 0 : i32
    return %c0_i32, %c0_i32_0, %c0_i32_1 : i32, i32, i32
  }
  func.func @transform_4(%arg0: i32) -> (i32, i32, i32) {
    %c0_i32 = arith.constant 0 : i32
    %c0_i32_0 = arith.constant 0 : i32
    %c0_i32_1 = arith.constant 0 : i32
    %c0_i32_2 = arith.constant 0 : i32
    return %c0_i32, %c0_i32_0, %c0_i32_1 : i32, i32, i32
  }
  func.func @transform_5(%arg0: i32) -> (i32, i32, i32) {
    %c0_i32 = arith.constant 0 : i32
    %c0_i32_0 = arith.constant 0 : i32
    %c0_i32_1 = arith.constant 0 : i32
    %c0_i32_2 = arith.constant 0 : i32
    return %c0_i32, %c0_i32_0, %c0_i32_1 : i32, i32, i32
  }
  func.func @transform_6(%arg0: i32) -> (i32, i32) {
    %c0_i32 = arith.constant 0 : i32
    %c0_i32_0 = arith.constant 0 : i32
    %c0_i32_1 = arith.constant 0 : i32
    return %c0_i32, %c0_i32_0 : i32, i32
  }
  func.func @transform_7(%arg0: i32) -> (i32, i32, i32) {
    %c0_i32 = arith.constant 0 : i32
    %c0_i32_0 = arith.constant 0 : i32
    %c0_i32_1 = arith.constant 0 : i32
    %c0_i32_2 = arith.constant 0 : i32
    return %c0_i32, %c0_i32_0, %c0_i32_1 : i32, i32, i32
  }
  func.func @transform_8(%arg0: i32) -> (i32, i32) {
    %c0_i32 = arith.constant 0 : i32
    %c0_i32_0 = arith.constant 0 : i32
    %c0_i32_1 = arith.constant 0 : i32
    return %c0_i32, %c0_i32_0 : i32, i32
  }
  func.func @transform_9(%arg0: i32) -> (i32, i32, i32) {
    %c0_i32 = arith.constant 0 : i32
    %c0_i32_0 = arith.constant 0 : i32
    %c0_i32_1 = arith.constant 0 : i32
    return %arg0, %c0_i32, %c0_i32_0 : i32, i32, i32
  }
}

</mosaic_0001>

<bundles_post_ra>
// kernel: prenorm_attention_forward.1
= control target key start
LH: loop header
LB: loop body
LE: loop exit
PB: predicated region body
PF: predicated region fallthrough
CT: control target
= control target key end

     0   :  { %14 = vsyncpa [#allocation3], 0  ;;  %s16624_s0 = inlined_call_operand.vmem [shape: f32[2,8,32], index: 0, kind: input, shape index: {}]   ;;  %s16625_s1 = inlined_call_operand.vmem [shape: f32[1,32], index: 1, kind: input, shape index: {}]   ;;  %s16626_s2 = inlined_call_operand.vmem [shape: f32[1,32], index: 2, kind: input, shape index: {}]   ;;  %s16627_s3 = inlined_call_operand.vmem [shape: f32[4,32,16], index: 3, kind: input, shape index: {}]   ;;  %s16628_s4 = inlined_call_operand.vmem [shape: f32[4,32,16], index: 4, kind: input, shape index: {}]   ;;  %s16629_s5 = inlined_call_operand.vmem [shape: f32[4,32,16], index: 5, kind: input, shape index: {}]   ;;  %s16630_s6 = inlined_call_operand.vmem [shape: f32[32,32], index: 6, kind: input, shape index: {}]   ;;  %s16631_s7 = inlined_call_operand.vmem [shape: f32[4,16,32], index: 7, kind: input, shape index: {}]   ;;  %s16632_s8 = inlined_call_operand.vmem [shape: f32[1,32], index: 8, kind: input, shape index: {}]   ;;  %s16633_s9 = inlined_call_operand.hbm [shape: f32[2,8,32], index: 9, kind: output, shape index: {}]  }
   0x1   :  { %16 = vsyncpa [#allocation3 + $0x1], 0  ;;  %s15328_s30 = smov 0   ;;  %s15330_s10 = smov 0  }
   0x2   :  { %s15332_s11 = smov 0   ;;  %s15334_s12 = smov 0  }
   0x3 LB: > { %s15349_s13 = sadd.s32 4294967295, %s15272_s12   ;;  %s12463_s14 = sadd.s32 4294967294, %s15272_s12   ;;  %s15272_s12 = sphi %s15334_s12, %s16639_s12   ;;  %s15268_s11 = sphi %s15332_s11, %s16638_s11   ;;  %s15264_s10 = sphi %s15330_s10, %s16637_s10   ;;  %s15260_s30 = sphi %s15328_s30, %s16636_s30  }
   0x4   : > { %s15353_s15 = sadd.s32 1, %s15272_s12   ;;  %s223_s16 = sadd.s32 1, %s15268_s11 }
   0x5   : > { %s220_s17 = ssub.s32 %s15272_s12, %s15353_s15  ;;  %p233_p0 = scmp.ne.s32.totalorder %s15268_s11, %s15264_s10 }
   0x6   : > { %p221_p1 = scmp.eq.s32.totalorder %s220_s17, 0  ;;  %p234_p2 = scmp.eq.s32.totalorder %s15349_s13, 1 }
   0x7   : > { %p239_p3 = scmp.ne.s32.totalorder %s15264_s10, %s15260_s30  ;;  %p240_p4 = scmp.eq.s32.totalorder %s12463_s14, 1 }
   0x8   : > { %s15364_s18 = scalar_select %p221_p1, %s15268_s11, %s223_s16  }
   0x9   : > { %p15366_p5 = por %p234_p2, %p233_p0  ;;  %p15370_p6 = por %p240_p4, %p239_p3 }
   0xa   : > { %p12466_p7 = scmp.ge.s32.totalorder %s15272_s12, 1  ;;  %p289_p8 = scmp.lt.s32.totalorder %s15272_s12, 3 }
   0xc   : > { %p290_p9 = pnand %p12466_p7, %p289_p8 }
   0xd   : > { %p324_p10 = scmp.lt.s32.totalorder (!%p290_p9), %s15349_s13, 1  ;;  %vm329_vm0 = vcmask (!%p290_p9), 261120   ;;  %v360_v7 = vld [vmem:[%s16627_s3] sm:$0xff] (!%p290_p9)  ;;  %v361_v8 = vld [vmem:[%s16627_s3 + $0x8] sm:$0xff] (!%p290_p9)  ;;  %v15274_v18 = vmov (!%p290_p9), 0.0|0.0   ;;  %v362_v22 = vld [vmem:[%s16627_s3 + $0x10] sm:$0xff] (!%p290_p9) }
   0xe   : > { %293 = sbr.rel (%p290_p9) target bundleno = 4664 (0x1238), region = 56  ;;  %v368_v9 = vand.u32 (!%p290_p9), 4294901760, %v360_v7  ;;  %v371_v10 = vand.u32 (!%p290_p9), 4294901760, %v361_v8  ;;  %v852_v11 = vld [vmem:[%s16628_s4] sm:$0xff] (!%p290_p9)  ;;  %v853_v12 = vld [vmem:[%s16628_s4 + $0x8] sm:$0xff] (!%p290_p9)  ;;  %14378 = vmatprep.subr.bf16.mxu0 (!%p290_p9), %v15274_v18  ;;  %14414 = vmatprep.subr.bf16.mxu1 (!%p290_p9), %v15274_v18  ;;  %v363_v23 = vld [vmem:[%s16627_s3 + $0x18] sm:$0xff] (!%p290_p9) }
   0xf   : > { %v857_v13 = vand.u32 (!%p290_p9), 4294901760, %v852_v11  ;;  %v860_v14 = vand.u32 (!%p290_p9), 4294901760, %v853_v12  ;;  %v374_v24 = vand.u32 (!%p290_p9), 4294901760, %v362_v22  ;;  %v377_v25 = vand.u32 (!%p290_p9), 4294901760, %v363_v23  ;;  %v854_v26 = vld [vmem:[%s16628_s4 + $0x10] sm:$0xff] (!%p290_p9)  ;;  %v855_v27 = vld [vmem:[%s16628_s4 + $0x18] sm:$0xff] (!%p290_p9) }
  0x10   : > { %v15399_v15 = vpack.c.bf16 (!%p290_p9), %v371_v10, %v368_v9  ;;  %v15401_v16 = vsub.f32 (!%p290_p9), %v360_v7, %v368_v9  ;;  %v15403_v17 = vsub.f32 (!%p290_p9), %v361_v8, %v371_v10  ;;  %v863_v30 = vand.u32 (!%p290_p9), 4294901760, %v854_v26  ;;  %s321_s14 = sand.u32 (!%p290_p9), 1, %s15264_s10  }
  0x11   : > { %v15407_v19 = vpack.c.bf16 (!%p290_p9), %v860_v14, %v857_v13  ;;  %v15409_v20 = vsub.f32 (!%p290_p9), %v852_v11, %v857_v13  ;;  %v15411_v21 = vsub.f32 (!%p290_p9), %v853_v12, %v860_v14  ;;  %v866_v31 = vand.u32 (!%p290_p9), 4294901760, %v855_v27  ;;  %v12469_v14 = vld [vmem:[%s16625_s1] ss:$0 sm:$0xff] (!%p290_p9)  ;;  %s12467_s16 = sshll.u32 (!%p290_p9), %s321_s14, 3  ;;  %s12391_s28 = scalar_lea.sflag (!%p290_p9), [#allocation3], %s321_s14 }
  0x12   : > { %14380 = vmatpush3.bf16.msra.mxu0 (!%p290_p9), %v15399_v15  ;;  %v449_v28 = vand.u32 (!%p290_p9), 4294901760, %v15401_v16  ;;  %v456_v29 = vand.u32 (!%p290_p9), 4294901760, %v15403_v17  ;;  %v15430_v32 = vpack.c.bf16 (!%p290_p9), %v377_v25, %v374_v24  ;;  %v15432_v33 = vsub.f32 (!%p290_p9), %v362_v22, %v374_v24  ;;  %s323_s23 = scalar_lea.vmem (!%p290_p9), [#allocation2], %s12467_s16 }
  0x13   : > { %14416 = vmatpush3.bf16.msra.mxu1 (!%p290_p9), %v15407_v19  ;;  %14381 = vmatprep.subr.bf16.mxu0 (!%p290_p9), %v15274_v18  ;;  %v15434_v34 = vsub.f32 (!%p290_p9), %v363_v23, %v377_v25  ;;  %v15437_v35 = vpack.c.bf16 (!%p290_p9), %v866_v31, %v863_v30  ;;  %v15439_v36 = vsub.f32 (!%p290_p9), %v854_v26, %v863_v30  ;;  %vm15275_vm1 = vmmov (!%p290_p9), 0   ;;  %s12404_s24 = sshll.u32 (!%p290_p9), %s323_s23, 4  ;;  %s16583_s24 = int_to_ptr.vmem [resolvable:$true] %s12404_s24 }
  0x14   : > { %14417 = vmatprep.subr.bf16.mxu1 (!%p290_p9), %v15274_v18  ;;  %v15441_v37 = vsub.f32 (!%p290_p9), %v855_v27, %v866_v31  ;;  %v15276_v38 = vmov (!%p290_p9), 0.0   ;;  %v450_v39 = vsub.f32 (!%p290_p9), %v15401_v16, %v449_v28  ;;  %v457_v40 = vsub.f32 (!%p290_p9), %v15403_v17, %v456_v29  ;;  %v1341_v27 = vld [vmem:[%s16629_s5] sm:$0xff] (!%p290_p9)  ;;  %v1343_v31 = vld [vmem:[%s16629_s5 + $0x10] sm:$0xff] (!%p290_p9)  ;;  %s15210_s29 = scalar_lea.vmem (!%p290_p9), %s16583_s24, 128 }
  0x15   : > { %s325_s21 = scalar_select %p324_p10, %s15349_s13, 1  ;;  %13102 = vmatprep.mubr.msk.f32.mxu0 %vm15275_vm1, %v15276_v38  ;;  %v938_v41 = vand.u32 4294901760, %v15409_v20  ;;  %v945_v42 = vand.u32 4294901760, %v15411_v21  ;;  %v463_v43 = vand.u32 4294901760, %v15432_v33  ;;  %v470_v44 = vand.u32 4294901760, %v15434_v34  ;;  %13168 = vmatprep.mubr.msk.f32.mxu1 %vm15275_vm1, %v15276_v38 }
  0x16   : > { %14383 = vmatpush3.bf16.msra.mxu0 %v15430_v32  ;;  %v451_v45 = vand.u32 4294901760, %v450_v39  ;;  %v458_v46 = vand.u32 4294901760, %v457_v40  ;;  %v952_v51 = vand.u32 4294901760, %v15439_v36  ;;  %v959_v52 = vand.u32 4294901760, %v15441_v37  ;;  %p15211_p11 = scmp.ne.s32.totalorder %s16583_s24, %s15210_s29 }
  0x17   : > { %s12468_s22 = sshll.u32 %s325_s21, 3  ;;  %14419 = vmatpush3.bf16.msra.mxu1 %v15437_v35  ;;  %14384 = vmatprep.subr.bf16.mxu0 %v15274_v18  ;;  %v939_v47 = vsub.f32 %v15409_v20, %v938_v41  ;;  %v946_v48 = vsub.f32 %v15411_v21, %v945_v42  ;;  %v464_v49 = vsub.f32 %v15432_v33, %v463_v43  ;;  %vm1830_vm2 = vcmask 130048  }
  0x18   : > { %s327_s25 = scalar_lea.vmem %s16624_s0, %s12468_s22  ;;  %14420 = vmatprep.subr.bf16.mxu1 %v15274_v18  ;;  %v471_v50 = vsub.f32 %v15434_v34, %v470_v44  ;;  %v14385_v53 = vpack.c.bf16 %v458_v46, %v451_v45  ;;  %v953_v58 = vsub.f32 %v15439_v36, %v952_v51  ;;  %v960_v59 = vsub.f32 %v15441_v37, %v959_v52  ;;  %s12515_s22 = sshll.u32 %s15349_s13, 7 }
  0x19   : > { %v328_v0 = vld [vmem:[%s327_s25] sm:$0xff]  ;;  %v940_v54 = vand.u32 4294901760, %v939_v47  ;;  %v947_v55 = vand.u32 4294901760, %v946_v48  ;;  %v465_v56 = vand.u32 4294901760, %v464_v49  ;;  %v14439_v7 = vpack.c.bf16 %v945_v42, %v938_v41  ;;  %s16581_s27 = scalar_lea.hbm %s16633_s9, %s12515_s22  ;;  %p15212_p12 = pnand %p15211_p11, %p15366_p5 }
  0x1a   : > { %v330_v1 = vsel %vm329_vm0, %v328_v0, 0.0  ;;  %v472_v57 = vand.u32 4294901760, %v471_v50  ;;  %v954_v62 = vand.u32 4294901760, %v953_v58  ;;  %v961_v63 = vand.u32 4294901760, %v960_v59  ;;  %v12472_v58 = vld [vmem:[%s16627_s3 + $0x28] sm:$0xff]  ;;  %s15277_s13 = smov [#allocation2]  }
  0x1b   : > { %331 = vadd.xlane.f32.xlu0 %v330_v1  ;;  %v14421_v60 = vpack.c.bf16 %v947_v55, %v940_v54  ;;  %v14391_v1 = vpack.c.bf16 %v15403_v17, %v15401_v16  ;;  %v15473_v8 = vpack.c.bf16 %v470_v44, %v463_v43  ;;  %v15475_v9 = vpack.c.bf16 %v959_v52, %v952_v51  ;;  %v12470_v17 = vld [vmem:[%s16626_s2] ss:$0 sm:$0xff]  ;;  %p15213_p13 = pneg %p15212_p12  ;;  %s15214_s16 = sshll.u32 %s15277_s13, 4  ;;  %s15215_s16 = int_to_ptr.vmem [resolvable:$false] %s15214_s16 }
  0x1c   : > { %v14388_v61 = vpack.c.bf16 %v472_v57, %v465_v56  ;;  %v12471_v57 = vld [vmem:[%s16627_s3 + $0x20] sm:$0xff]  ;;  %vm2283_vm3 = vcmask 64512   ;;  %s15216_s17 = scalar_lea.vmem %s15215_s16, 256  ;;  %p15217_p0 = scmp.lt.s32.totalorder %s16583_s24, %s15215_s16 }
  0x1d   : > { %p15218_p1 = scmp.lt.s32.totalorder %s15216_s17, %s15210_s29 }
  0x1f   : > { %p15219_p2 = por %p15218_p1, %p15217_p0 }
  0x21   : > { %p15220_p3 = pnand %p15219_p2, %p15213_p13 }
  0xa8   : > { %v332_v2 = vpop.xlane.xlu0 %331 }
  0xa9   : > { %v334_v3 = vmul.f32 0.03125, %v332_v2  ;;  %v14427_v2 = vpack.c.bf16 %v15411_v21, %v15409_v20 }
  0xab   : > { %v15382_v4 = vsub.f32 %v328_v0, %v334_v3  ;;  %v14424_v0 = vpack.c.bf16 %v961_v63, %v954_v62  ;;  %v14394_v3 = vpack.c.bf16 %v15434_v34, %v15432_v33  ;;  %v1344_v33 = vld [vmem:[%s16629_s5 + $0x18] sm:$0xff]  ;;  %v12473_v62 = vld [vmem:[%s16627_s3 + $0x30] sm:$0xff] }
  0xac   : > { %v1355_v39 = vand.u32 4294901760, %v1344_v33  ;;  %v12474_v63 = vld [vmem:[%s16627_s3 + $0x38] sm:$0xff] }
  0xad   : > { %v336_v5 = vmul.f32 %v15382_v4, %v15382_v4 }
  0xae   : > { %v1447_v41 = vsub.f32 %v1344_v33, %v1355_v39  ;;  %v12479_v33 = vld [vmem:[%s16629_s5 + $0x20] sm:$0xff] }
  0xaf   : > { %v337_v6 = vsel %vm329_vm0, %v336_v5, 0.0  ;;  %v14430_v5 = vpack.c.bf16 %v15441_v37, %v15439_v36  ;;  %v1352_v37 = vand.u32 4294901760, %v1343_v31 }
  0xb0   : > { %338 = vadd.xlane.f32.xlu0 %v337_v6  ;;  %v14403_v6 = vpack.c.bf16 %v456_v29, %v449_v28  ;;  %v1342_v28 = vld [vmem:[%s16629_s5 + $0x8] sm:$0xff]  ;;  %v1346_v29 = vand.u32 4294901760, %v1341_v27  ;;  %v1448_v46 = vand.u32 4294901760, %v1447_v41 }
  0xb1   : > { %v1349_v30 = vand.u32 4294901760, %v1342_v28  ;;  %v1440_v40 = vsub.f32 %v1343_v31, %v1352_v37  ;;  %v14454_v47 = vpack.c.bf16 %v1355_v39, %v1352_v37  ;;  %v3730_v37 = vand.u32 4294901760, %v12479_v33 }
  0xb2   : > { %v15553_v34 = vsub.f32 %v1341_v27, %v1346_v29  ;;  %v1449_v49 = vsub.f32 %v1447_v41, %v1448_v46 }
  0xb3   : > { %v15555_v36 = vsub.f32 %v1342_v28, %v1349_v30  ;;  %v15571_v44 = vpack.c.bf16 %v1349_v30, %v1346_v29  ;;  %v1441_v45 = vand.u32 4294901760, %v1440_v40  ;;  %v14466_v55 = vpack.c.bf16 %v1447_v41, %v1440_v40  ;;  %v12482_v41 = vld [vmem:[%s16629_s5 + $0x38] sm:$0xff] }
  0xb4   : > { %v1427_v42 = vand.u32 4294901760, %v15553_v34  ;;  %v1450_v52 = vand.u32 4294901760, %v1449_v49 }
  0xb5   : > { %v1434_v43 = vand.u32 4294901760, %v15555_v36  ;;  %v1442_v48 = vsub.f32 %v1440_v40, %v1441_v45  ;;  %v14463_v54 = vpack.c.bf16 %v15555_v36, %v15553_v34  ;;  %v14478_v59 = vpack.c.bf16 %v1448_v46, %v1441_v45  ;;  %v12481_v40 = vld [vmem:[%s16629_s5 + $0x30] sm:$0xff] }
  0xb7   : > { %v1443_v51 = vand.u32 4294901760, %v1442_v48  ;;  %v14475_v56 = vpack.c.bf16 %v1434_v43, %v1427_v42 }
 0x13d   : > { %v339_v10 = vpop.xlane.xlu0 %338 }
 0x13e   : > { %v340_v11 = vmul.f32 0.03125, %v339_v10 }
 0x140   : > { %v341_v12 = vadd.f32 1e-05, %v340_v11 }
 0x142   : > { %15192 = vrsqrt.f32 %v341_v12 }
 0x14c   : > { %v15193_v13 = vpop.eup %15192 }
 0x14d   : > { %v343_v16 = vmul.f32 %v15193_v13, %v15382_v4 }
 0x14f   : > { %v351_v20 = vmul.f32 %v12469_v14, %v343_v16 }
 0x151   : > { %v359_v21 = vadd.f32 %v12470_v17, %v351_v20 }
 0x153   : > { %v365_v22 = vsel %vm329_vm0, %v359_v21, 0 }
 0x154   : > { %v15485_v23 = vand.u32 4294901760, %v365_v22 }
 0x156   : > { %v15488_v24 = vsub.f32 %v365_v22, %v15485_v23 }
 0x158   : > { %v15491_v25 = vand.u32 4294901760, %v15488_v24 }
 0x15a   : > { %v439_v26 = vsub.f32 %v15488_v24, %v15491_v25 }
 0x15c   : > { %v15495_v4 = vand.u32 4294901760, %v439_v26 }
 0x15e   : > { %13103 = vmatmul.mubr.f32.vlgmr.msra.gmra.mrb[0].mxu0 %v15495_v4  ;;  %13169 = vmatmul.mubr.f32.vlgmr.msra.gmra.mrb[0].mxu1 %v15495_v4 }
 0x15f   : > { %14386 = vmatpush3.bf16.msra.mxu0 %v14385_v53  ;;  %14422 = vmatpush3.bf16.msra.mxu1 %v14421_v60  ;;  %v14460_v53 = vpack.c.bf16 %v1450_v52, %v1443_v51  ;;  %v2750_v60 = vand.u32 4294901760, %v12471_v57 }
 0x160   : > { %14387 = vmatprep.subr.bf16.mxu0 %v15274_v18  ;;  %14423 = vmatprep.subr.bf16.mxu1 %v15274_v18 }
 0x161   : > { %13113 = vmatprep.mubr.msk.f32.mxu0 %vm15275_vm1, %v15276_v38  ;;  %13179 = vmatprep.mubr.msk.f32.mxu1 %vm15275_vm1, %v15276_v38 }
 0x163   : > { %14389 = vmatpush3.bf16.msra.mxu0 %v14388_v61  ;;  %14425 = vmatpush3.bf16.msra.mxu1 %v14424_v0  ;;  %v2753_v61 = vand.u32 4294901760, %v12472_v58  ;;  %v2830_v0 = vsub.f32 %v12471_v57, %v2750_v60 }
 0x164   : > { %14390 = vmatprep.subr.bf16.mxu0 %v15274_v18  ;;  %14426 = vmatprep.subr.bf16.mxu1 %v15274_v18 }
 0x166   : > { %13114 = vmatmul.mubr.f32.vlgmr.msra.gmra.mrb[0].mxu0 %v15485_v23  ;;  %13180 = vmatmul.mubr.f32.vlgmr.msra.gmra.mrb[0].mxu1 %v15485_v23 }
 0x167   : > { %14392 = vmatpush3.bf16.msra.mxu0 %v14391_v1  ;;  %14428 = vmatpush3.bf16.msra.mxu1 %v14427_v2  ;;  %v2837_v1 = vsub.f32 %v12472_v58, %v2753_v61  ;;  %v2756_v2 = vand.u32 4294901760, %v12473_v62 }
 0x168   : > { %14393 = vmatprep.subr.bf16.mxu0 %v15274_v18  ;;  %14429 = vmatprep.subr.bf16.mxu1 %v15274_v18 }
 0x169   : > { %13124 = vmatprep.mubr.msk.f32.mxu0 %vm15275_vm1, %v15276_v38  ;;  %13190 = vmatprep.mubr.msk.f32.mxu1 %vm15275_vm1, %v15276_v38  ;;  %v14499_v29 = vpack.c.bf16 %v2837_v1, %v2830_v0 }
 0x16b   : > { %14395 = vmatpush3.bf16.msra.mxu0 %v14394_v3  ;;  %14431 = vmatpush3.bf16.msra.mxu1 %v14430_v5  ;;  %v2759_v3 = vand.u32 4294901760, %v12474_v63  ;;  %v2844_v5 = vsub.f32 %v12473_v62, %v2756_v2 }
 0x16c   : > { %14396 = vmatprep.subr.bf16.mxu0 %v15274_v18  ;;  %14432 = vmatprep.subr.bf16.mxu1 %v15274_v18 }
 0x16d   : > { %v2845_v12 = vand.u32 4294901760, %v2844_v5  ;;  %v14490_v14 = vpack.c.bf16 %v2759_v3, %v2756_v2 }
 0x16e   : > { %13125 = vmatmul.mubr.f32.vlgmr.msra.gmra.mrb[0].mxu0 %v15488_v24  ;;  %13191 = vmatmul.mubr.f32.vlgmr.msra.gmra.mrb[0].mxu1 %v15488_v24 }
 0x16f   : > { %14398 = vmatpush3.bf16.msra.mxu0 %v15399_v15  ;;  %14434 = vmatpush3.bf16.msra.mxu1 %v15407_v19  ;;  %v2846_v20 = vsub.f32 %v2844_v5, %v2845_v12 }
 0x170   : > { %14399 = vmatprep.subr.bf16.mxu0 %v15274_v18  ;;  %14435 = vmatprep.subr.bf16.mxu1 %v15274_v18 }
 0x171   : > { %13135 = vmatprep.mubr.msk.f32.mxu0 %vm15275_vm1, %v15276_v38  ;;  %13201 = vmatprep.mubr.msk.f32.mxu1 %vm15275_vm1, %v15276_v38  ;;  %v2847_v26 = vand.u32 4294901760, %v2846_v20 }
 0x173   : > { %14401 = vmatpush3.bf16.msra.mxu0 %v15430_v32  ;;  %14437 = vmatpush3.bf16.msra.mxu1 %v15437_v35 }
 0x174   : > { %14402 = vmatprep.subr.bf16.mxu0 %v15274_v18  ;;  %14438 = vmatprep.subr.bf16.mxu1 %v15274_v18 }
 0x176   : > { %13136 = vmatmul.mubr.f32.vlgmr.msra.gmra.mrb[0].mxu0 %v15491_v25  ;;  %13202 = vmatmul.mubr.f32.vlgmr.msra.gmra.mrb[0].mxu1 %v15491_v25 }
 0x177   : > { %14404 = vmatpush3.bf16.msra.mxu0 %v14403_v6  ;;  %14440 = vmatpush3.bf16.msra.mxu1 %v14439_v7  ;;  %v2851_v6 = vsub.f32 %v12474_v63, %v2759_v3  ;;  %v2831_v7 = vand.u32 4294901760, %v2830_v0  ;;  %v12483_v63 = vld [vmem:[%s16627_s3 + $0x40] sm:$0xff] }
 0x178   : > { %14405 = vmatprep.subr.bf16.mxu0 %v15274_v18  ;;  %14441 = vmatprep.subr.bf16.mxu1 %v15274_v18  ;;  %v5132_v2 = vand.u32 4294901760, %v12483_v63 }
 0x179   : > { %13146 = vmatprep.mubr.msk.f32.mxu0 %vm15275_vm1, %v15276_v38  ;;  %13212 = vmatprep.mubr.msk.f32.mxu1 %vm15275_vm1, %v15276_v38  ;;  %v2832_v10 = vsub.f32 %v2830_v0, %v2831_v7  ;;  %v2852_v13 = vand.u32 4294901760, %v2851_v6  ;;  %v14502_v30 = vpack.c.bf16 %v2851_v6, %v2844_v5  ;;  %v12484_v0 = vld [vmem:[%s16627_s3 + $0x48] sm:$0xff]  ;;  %v12485_v5 = vld [vmem:[%s16627_s3 + $0x50] sm:$0xff] }
 0x17a   : > { %v5135_v3 = vand.u32 4294901760, %v12484_v0 }
 0x17b   : > { %14407 = vmatpush3.bf16.msra.mxu0 %v15473_v8  ;;  %14443 = vmatpush3.bf16.msra.mxu1 %v15475_v9  ;;  %v2838_v8 = vand.u32 4294901760, %v2837_v1  ;;  %v14487_v9 = vpack.c.bf16 %v2753_v61, %v2750_v60  ;;  %v2833_v16 = vand.u32 4294901760, %v2832_v10  ;;  %v2853_v21 = vsub.f32 %v2851_v6, %v2852_v13  ;;  %v12486_v6 = vld [vmem:[%s16627_s3 + $0x58] sm:$0xff] }
 0x17c   : > { %14408 = vmatprep.subr.bf16.mxu0 %v15274_v18  ;;  %14444 = vmatprep.subr.bf16.mxu1 %v15274_v18  ;;  %v5141_v10 = vand.u32 4294901760, %v12486_v6 }
 0x17d   : > { %v2839_v11 = vsub.f32 %v2837_v1, %v2838_v8  ;;  %v2854_v27 = vand.u32 4294901760, %v2853_v21  ;;  %v14511_v31 = vpack.c.bf16 %v2838_v8, %v2831_v7  ;;  %v5212_v7 = vsub.f32 %v12483_v63, %v5132_v2 }
 0x17e   : > { %13147 = vmatmul.mubr.f32.vlgmr.msra.gmra.mrb[0].mxu0 %v15485_v23  ;;  %13213 = vmatmul.mubr.f32.vlgmr.msra.gmra.mrb[0].mxu1 %v15485_v23  ;;  %v5219_v8 = vsub.f32 %v12484_v0, %v5135_v3 }
 0x17f   : > { %14410 = vmatpush3.bf16.msra.mxu0 %v15399_v15  ;;  %14446 = vmatpush3.bf16.msra.mxu1 %v15407_v19  ;;  %v1428_v15 = vsub.f32 %v15553_v34, %v1427_v42  ;;  %v1435_v19 = vsub.f32 %v15555_v36, %v1434_v43  ;;  %v2840_v17 = vand.u32 4294901760, %v2839_v11  ;;  %v14496_v28 = vpack.c.bf16 %v2854_v27, %v2847_v26  ;;  %v12480_v34 = vld [vmem:[%s16629_s5 + $0x28] sm:$0xff] }
 0x180   : > { %14411 = vmatprep.subr.bf16.mxu0 %v15274_v18  ;;  %14447 = vmatprep.subr.bf16.mxu1 %v15274_v18  ;;  %v14514_v36 = vpack.c.bf16 %v2852_v13, %v2845_v12  ;;  %v3733_v39 = vand.u32 4294901760, %v12480_v34  ;;  %v3810_v42 = vsub.f32 %v12479_v33, %v3730_v37  ;;  %v5233_v12 = vsub.f32 %v12486_v6, %v5141_v10 }
 0x181   : > { %13157 = vmatprep.mubr.msk.f32.mxu0 %vm15275_vm1, %v15276_v38  ;;  %13223 = vmatprep.mubr.msk.f32.mxu1 %vm15275_vm1, %v15276_v38  ;;  %v14493_v22 = vpack.c.bf16 %v2840_v17, %v2833_v16  ;;  %v5213_v13 = vand.u32 4294901760, %v5212_v7  ;;  %v14595_v16 = vpack.c.bf16 %v5135_v3, %v5132_v2 }
 0x182   : > { %v3817_v43 = vsub.f32 %v12480_v34, %v3733_v39  ;;  %v3811_v46 = vand.u32 4294901760, %v3810_v42 }
 0x183   : > { %14413 = vmatpush3.bf16.msra.mxu0 %v15430_v32  ;;  %14449 = vmatpush3.bf16.msra.mxu1 %v15437_v35  ;;  %v1429_v32 = vand.u32 4294901760, %v1428_v15  ;;  %v1436_v35 = vand.u32 4294901760, %v1435_v19  ;;  %v3739_v15 = vand.u32 4294901760, %v12482_v41  ;;  %v5214_v17 = vsub.f32 %v5212_v7, %v5213_v13 }
 0x184   : > { %14450 = vmatprep.subr.bf16.mxu0 %v15274_v18  ;;  %13292 = vmatprep.subr.mxu1 %v15276_v38  ;;  %v14571_v60 = vpack.c.bf16 %v3817_v43, %v3810_v42 }
 0x185   : > { %v14457_v50 = vpack.c.bf16 %v1436_v35, %v1429_v32  ;;  %v3831_v45 = vsub.f32 %v12482_v41, %v3739_v15  ;;  %v14559_v32 = vpack.c.bf16 %v3733_v39, %v3730_v37  ;;  %v3812_v35 = vsub.f32 %v3810_v42, %v3811_v46  ;;  %v12491_v41 = vld [vmem:[%s16629_s5 + $0x40] sm:$0xff]  ;;  %v12492_v42 = vld [vmem:[%s16629_s5 + $0x48] sm:$0xff] }
 0x186   : > { %13158 = vmatmul.mubr.f32.vlgmr.msra.gmra.mrb[0].mxu0 %v15485_v23  ;;  %13224 = vmatmul.mubr.f32.vlgmr.msra.gmra.mrb[0].mxu1 %v15485_v23  ;;  %v5215_v27 = vand.u32 4294901760, %v5214_v17  ;;  %v14607_v37 = vpack.c.bf16 %v5219_v8, %v5212_v7 }
 0x187   : > { %14452 = vmatpush3.bf16.msra.mxu0 %v15571_v44  ;;  %13234 = vmatprep.mubr.msk.f32.mxu0 %vm15275_vm1, %v15276_v38  ;;  %v3813_v52 = vand.u32 4294901760, %v3812_v35 }
 0x188   : > { %14453 = vmatprep.subr.bf16.mxu0 %v15274_v18  ;;  %13294 = vmatprep.mubr.msk.f32.mxu1 %vm15275_vm1, %v15276_v38 }
 0x18b   : > { %14455 = vmatpush3.bf16.msra.mxu0 %v14454_v47 }
 0x18c   : > { %14456 = vmatprep.subr.bf16.mxu0 %v15274_v18 }
 0x18e   : > { %13235 = vmatmul.mubr.f32.vlgmr.msra.gmra.mrb[2].mxu0 %v15495_v4 }
 0x18f   : > { %14458 = vmatpush3.bf16.msra.mxu0 %v14457_v50  ;;  %13245 = vmatprep.mubr.msk.f32.mxu0 %vm15275_vm1, %v15276_v38  ;;  %v3832_v50 = vand.u32 4294901760, %v3831_v45 }
 0x190   : > { %14459 = vmatprep.subr.bf16.mxu0 %v15274_v18 }
 0x193   : > { %14461 = vmatpush3.bf16.msra.mxu0 %v14460_v53 }
 0x194   : > { %14462 = vmatprep.subr.bf16.mxu0 %v15274_v18 }
 0x196   : > { %13246 = vmatmul.mubr.f32.vlgmr.msra.gmra.mrb[2].mxu0 %v15485_v23 }
 0x197   : > { %14464 = vmatpush3.bf16.msra.mxu0 %v14463_v54  ;;  %13256 = vmatprep.mubr.msk.f32.mxu0 %vm15275_vm1, %v15276_v38 }
 0x198   : > { %14465 = vmatprep.subr.bf16.mxu0 %v15274_v18 }
 0x19b   : > { %14467 = vmatpush3.bf16.msra.mxu0 %v14466_v55  ;;  %v3833_v55 = vsub.f32 %v3831_v45, %v3832_v50 }
 0x19c   : > { %14468 = vmatprep.subr.bf16.mxu0 %v15274_v18 }
 0x19d   : > { %v3834_v58 = vand.u32 4294901760, %v3833_v55 }
 0x19e   : > { %13257 = vmatmul.mubr.f32.vlgmr.msra.gmra.mrb[2].mxu0 %v15488_v24 }
 0x19f   : > { %14470 = vmatpush3.bf16.msra.mxu0 %v15571_v44  ;;  %13267 = vmatprep.mubr.msk.f32.mxu0 %vm15275_vm1, %v15276_v38 }
 0x1a0   : > { %14471 = vmatprep.subr.bf16.mxu0 %v15274_v18 }
 0x1a3   : > { %14473 = vmatpush3.bf16.msra.mxu0 %v14454_v47 }
 0x1a4   : > { %14474 = vmatprep.subr.bf16.mxu0 %v15274_v18 }
 0x1a6   : > { %13268 = vmatmul.mubr.f32.vlgmr.msra.gmra.mrb[2].mxu0 %v15491_v25 }
 0x1a7   : > { %14476 = vmatpush3.bf16.msra.mxu0 %v14475_v56  ;;  %13278 = vmatprep.mubr.msk.f32.mxu0 %vm15275_vm1, %v15276_v38 }
 0x1a8   : > { %14477 = vmatprep.subr.bf16.mxu0 %v15274_v18 }
 0x1ab   : > { %14479 = vmatpush3.bf16.msra.mxu0 %v14478_v59 }
 0x1ac   : > { %14480 = vmatprep.subr.bf16.mxu0 %v15274_v18 }
 0x1ae   : > { %13279 = vmatmul.mubr.f32.vlgmr.msra.gmra.mrb[2].mxu0 %v15485_v23 }
 0x1af   : > { %14482 = vmatpush3.bf16.msra.mxu0 %v15571_v44  ;;  %13289 = vmatprep.mubr.msk.f32.mxu0 %vm15275_vm1, %v15276_v38  ;;  %v3736_v44 = vand.u32 4294901760, %v12481_v40 }
 0x1b0   : > { %14483 = vmatprep.subr.bf16.mxu0 %v15274_v18 }
 0x1b1   : > { %v3824_v19 = vsub.f32 %v12481_v40, %v3736_v44  ;;  %v14562_v51 = vpack.c.bf16 %v3739_v15, %v3736_v44  ;;  %v6112_v44 = vand.u32 4294901760, %v12491_v41  ;;  %v6115_v15 = vand.u32 4294901760, %v12492_v42 }
 0x1b3   : > { %14485 = vmatpush3.bf16.msra.mxu0 %v14454_v47  ;;  %v3818_v47 = vand.u32 4294901760, %v3817_v43  ;;  %v3825_v49 = vand.u32 4294901760, %v3824_v19  ;;  %v14574_v61 = vpack.c.bf16 %v3831_v45, %v3824_v19  ;;  %v12494_v45 = vld [vmem:[%s16629_s5 + $0x58] sm:$0xff] }
 0x1b4   : > { %14486 = vmatprep.subr.bf16.mxu0 %v15274_v18  ;;  %v6121_v35 = vand.u32 4294901760, %v12494_v45 }
 0x1b5   : > { %v3819_v48 = vsub.f32 %v3817_v43, %v3818_v47  ;;  %v3826_v54 = vsub.f32 %v3824_v19, %v3825_v49  ;;  %v14583_v62 = vpack.c.bf16 %v3818_v47, %v3811_v46  ;;  %v14586_v1 = vpack.c.bf16 %v3832_v50, %v3825_v49  ;;  %v12493_v19 = vld [vmem:[%s16629_s5 + $0x50] sm:$0xff] }
 0x1b6   : > { %13290 = vmatmul.mubr.f32.vlgmr.msra.gmra.mrb[2].mxu0 %v15485_v23  ;;  %v15749_v46 = vsub.f32 %v12491_v41, %v6112_v44  ;;  %v15751_v47 = vsub.f32 %v12492_v42, %v6115_v15  ;;  %v15759_v49 = vsub.f32 %v12494_v45, %v6121_v35 }
 0x1b7   : > { %14488 = vmatpush3.bf16.msra.mxu0 %v14487_v9  ;;  %13360 = vmatprep.mubr.msk.f32.mxu0 %vm15275_vm1, %v15276_v38  ;;  %v3820_v53 = vand.u32 4294901760, %v3819_v48  ;;  %v3827_v57 = vand.u32 4294901760, %v3826_v54 }
 0x1b8   : > { %14489 = vmatprep.subr.bf16.mxu0 %v15274_v18  ;;  %v6193_v50 = vand.u32 4294901760, %v15749_v46  ;;  %v14679_v2 = vpack.c.bf16 %v15751_v47, %v15749_v46 }
 0x1b9   : > { %v14565_v56 = vpack.c.bf16 %v3820_v53, %v3813_v52  ;;  %v14568_v59 = vpack.c.bf16 %v3834_v58, %v3827_v57  ;;  %v15764_v52 = vpack.c.bf16 %v6115_v15, %v6112_v44 }
 0x1ba   : > { %v6194_v53 = vsub.f32 %v15749_v46, %v6193_v50 }
 0x1bb   : > { %14491 = vmatpush3.bf16.msra.mxu0 %v14490_v14 }
 0x1bc   : > { %14492 = vmatprep.subr.bf16.mxu0 %v15274_v18  ;;  %v6195_v58 = vand.u32 4294901760, %v6194_v53 }
 0x1be   : > { %13361 = vmatmul.mubr.f32.vlgmr.msra.gmra.mrb[4].mxu0 %v15495_v4 }
 0x1bf   : > { %14494 = vmatpush3.bf16.msra.mxu0 %v14493_v22  ;;  %13371 = vmatprep.mubr.msk.f32.mxu0 %vm15275_vm1, %v15276_v38  ;;  %v5234_v22 = vand.u32 4294901760, %v5233_v12 }
 0x1c0   : > { %14495 = vmatprep.subr.bf16.mxu0 %v15274_v18 }
 0x1c3   : > { %14497 = vmatpush3.bf16.msra.mxu0 %v14496_v28 }
 0x1c4   : > { %14498 = vmatprep.subr.bf16.mxu0 %v15274_v18 }
 0x1c6   : > { %13372 = vmatmul.mubr.f32.vlgmr.msra.gmra.mrb[4].mxu0 %v15485_v23 }
 0x1c7   : > { %14500 = vmatpush3.bf16.msra.mxu0 %v14499_v29  ;;  %13382 = vmatprep.mubr.msk.f32.mxu0 %vm15275_vm1, %v15276_v38 }
 0x1c8   : > { %14501 = vmatprep.subr.bf16.mxu0 %v15274_v18 }
 0x1cb   : > { %14503 = vmatpush3.bf16.msra.mxu0 %v14502_v30  ;;  %v5235_v30 = vsub.f32 %v5233_v12, %v5234_v22 }
 0x1cc   : > { %14504 = vmatprep.subr.bf16.mxu0 %v15274_v18 }
 0x1cd   : > { %v5236_v34 = vand.u32 4294901760, %v5235_v30 }
 0x1ce   : > { %13383 = vmatmul.mubr.f32.vlgmr.msra.gmra.mrb[4].mxu0 %v15488_v24 }
 0x1cf   : > { %14506 = vmatpush3.bf16.msra.mxu0 %v14487_v9  ;;  %13393 = vmatprep.mubr.msk.f32.mxu0 %vm15275_vm1, %v15276_v38 }
 0x1d0   : > { %14507 = vmatprep.subr.bf16.mxu0 %v15274_v18 }
 0x1d3   : > { %14509 = vmatpush3.bf16.msra.mxu0 %v14490_v14 }
 0x1d4   : > { %14510 = vmatprep.subr.bf16.mxu0 %v15274_v18 }
 0x1d6   : > { %13394 = vmatmul.mubr.f32.vlgmr.msra.gmra.mrb[4].mxu0 %v15491_v25 }
 0x1d7   : > { %14512 = vmatpush3.bf16.msra.mxu0 %v14511_v31  ;;  %13404 = vmatprep.mubr.msk.f32.mxu0 %vm15275_vm1, %v15276_v38 }
 0x1d8   : > { %14513 = vmatprep.subr.bf16.mxu0 %v15274_v18 }
 0x1db   : > { %14515 = vmatpush3.bf16.msra.mxu0 %v14514_v36 }
 0x1dc   : > { %14516 = vmatprep.subr.bf16.mxu0 %v15274_v18 }
 0x1de   : > { %13405 = vmatmul.mubr.f32.vlgmr.msra.gmra.mrb[4].mxu0 %v15485_v23 }
 0x1df   : > { %14518 = vmatpush3.bf16.msra.mxu0 %v14487_v9  ;;  %13415 = vmatprep.mubr.msk.f32.mxu0 %vm15275_vm1, %v15276_v38  ;;  %v5138_v9 = vand.u32 4294901760, %v12485_v5 }
 0x1e0   : > { %14519 = vmatprep.subr.bf16.mxu0 %v15274_v18 }
 0x1e1   : > { %v5226_v11 = vsub.f32 %v12485_v5, %v5138_v9  ;;  %v14598_v26 = vpack.c.bf16 %v5141_v10, %v5138_v9 }
 0x1e3   : > { %14521 = vmatpush3.bf16.msra.mxu0 %v14490_v14  ;;  %v5220_v14 = vand.u32 4294901760, %v5219_v8  ;;  %v5227_v21 = vand.u32 4294901760, %v5226_v11  ;;  %v14610_v39 = vpack.c.bf16 %v5233_v12, %v5226_v11 }
 0x1e4   : > { %14558 = vmatprep.subr.bf16.mxu0 %v15274_v18 }
 0x1e5   : > { %v5221_v20 = vsub.f32 %v5219_v8, %v5220_v14  ;;  %v5228_v29 = vsub.f32 %v5226_v11, %v5227_v21  ;;  %v14619_v40 = vpack.c.bf16 %v5220_v14, %v5213_v13  ;;  %v14622_v43 = vpack.c.bf16 %v5234_v22, %v5227_v21 }
 0x1e6   : > { %13416 = vmatmul.mubr.f32.vlgmr.msra.gmra.mrb[4].mxu0 %v15485_v23 }
 0x1e7   : > { %14560 = vmatpush3.bf16.msra.mxu0 %v14559_v32  ;;  %13492 = vmatprep.mubr.msk.f32.mxu0 %vm15275_vm1, %v15276_v38  ;;  %v5222_v28 = vand.u32 4294901760, %v5221_v20  ;;  %v5229_v33 = vand.u32 4294901760, %v5228_v29  ;;  %v12496_v29 = vld [vmem:[%s16627_s3 + $0x68] sm:$0xff] }
 0x1e8   : > { %14561 = vmatprep.subr.bf16.mxu0 %v15274_v18 }
 0x1e9   : > { %v14601_v31 = vpack.c.bf16 %v5222_v28, %v5215_v27  ;;  %v14604_v36 = vpack.c.bf16 %v5236_v34, %v5229_v33  ;;  %v12495_v28 = vld [vmem:[%s16627_s3 + $0x60] sm:$0xff]  ;;  %v7517_v33 = vand.u32 4294901760, %v12496_v29  ;;  %v12497_v34 = vld [vmem:[%s16627_s3 + $0x70] sm:$0xff] }
 0x1eb   : > { %14563 = vmatpush3.bf16.msra.mxu0 %v14562_v51 }
 0x1ec   : > { %14564 = vmatprep.subr.bf16.mxu0 %v15274_v18 }
 0x1ee   : > { %13493 = vmatmul.mubr.f32.vlgmr.msra.gmra.mrb[6].mxu0 %v15495_v4 }
 0x1ef   : > { %14566 = vmatpush3.bf16.msra.mxu0 %v14565_v56  ;;  %13503 = vmatprep.mubr.msk.f32.mxu0 %vm15275_vm1, %v15276_v38  ;;  %v6214_v56 = vand.u32 4294901760, %v15759_v49 }
 0x1f0   : > { %14567 = vmatprep.subr.bf16.mxu0 %v15274_v18 }
 0x1f3   : > { %14569 = vmatpush3.bf16.msra.mxu0 %v14568_v59 }
 0x1f4   : > { %14570 = vmatprep.subr.bf16.mxu0 %v15274_v18 }
 0x1f6   : > { %13504 = vmatmul.mubr.f32.vlgmr.msra.gmra.mrb[6].mxu0 %v15485_v23 }
 0x1f7   : > { %14572 = vmatpush3.bf16.msra.mxu0 %v14571_v60  ;;  %13514 = vmatprep.mubr.msk.f32.mxu0 %vm15275_vm1, %v15276_v38 }
 0x1f8   : > { %14573 = vmatprep.subr.bf16.mxu0 %v15274_v18 }
 0x1fb   : > { %14575 = vmatpush3.bf16.msra.mxu0 %v14574_v61  ;;  %v6215_v61 = vsub.f32 %v15759_v49, %v6214_v56 }
 0x1fc   : > { %14576 = vmatprep.subr.bf16.mxu0 %v15274_v18 }
 0x1fd   : > { %v6216_v0 = vand.u32 4294901760, %v6215_v61 }
 0x1fe   : > { %13515 = vmatmul.mubr.f32.vlgmr.msra.gmra.mrb[6].mxu0 %v15488_v24 }
 0x1ff   : > { %14578 = vmatpush3.bf16.msra.mxu0 %v14559_v32  ;;  %13525 = vmatprep.mubr.msk.f32.mxu0 %vm15275_vm1, %v15276_v38 }
 0x200   : > { %14579 = vmatprep.subr.bf16.mxu0 %v15274_v18 }
 0x203   : > { %14581 = vmatpush3.bf16.msra.mxu0 %v14562_v51 }
 0x204   : > { %14582 = vmatprep.subr.bf16.mxu0 %v15274_v18 }
 0x206   : > { %13526 = vmatmul.mubr.f32.vlgmr.msra.gmra.mrb[6].mxu0 %v15491_v25 }
 0x207   : > { %14584 = vmatpush3.bf16.msra.mxu0 %v14583_v62  ;;  %13536 = vmatprep.mubr.msk.f32.mxu0 %vm15275_vm1, %v15276_v38 }
 0x208   : > { %14585 = vmatprep.subr.bf16.mxu0 %v15274_v18 }
 0x20b   : > { %14587 = vmatpush3.bf16.msra.mxu0 %v14586_v1 }
 0x20c   : > { %14588 = vmatprep.subr.bf16.mxu0 %v15274_v18 }
 0x20e   : > { %13537 = vmatmul.mubr.f32.vlgmr.msra.gmra.mrb[6].mxu0 %v15485_v23 }
 0x20f   : > { %14590 = vmatpush3.bf16.msra.mxu0 %v14559_v32  ;;  %13547 = vmatprep.mubr.msk.f32.mxu0 %vm15275_vm1, %v15276_v38  ;;  %v6118_v32 = vand.u32 4294901760, %v12493_v19 }
 0x210   : > { %14591 = vmatprep.subr.bf16.mxu0 %v15274_v18 }
 0x211   : > { %v15757_v48 = vsub.f32 %v12493_v19, %v6118_v32  ;;  %v15774_v57 = vpack.c.bf16 %v6121_v35, %v6118_v32 }
 0x213   : > { %14593 = vmatpush3.bf16.msra.mxu0 %v14562_v51  ;;  %v6200_v51 = vand.u32 4294901760, %v15751_v47  ;;  %v6207_v55 = vand.u32 4294901760, %v15757_v48  ;;  %v14682_v3 = vpack.c.bf16 %v15759_v49, %v15757_v48 }
 0x214   : > { %14594 = vmatprep.subr.bf16.mxu0 %v15274_v18 }
 0x215   : > { %v6201_v54 = vsub.f32 %v15751_v47, %v6200_v51  ;;  %v6208_v60 = vsub.f32 %v15757_v48, %v6207_v55  ;;  %v14691_v27 = vpack.c.bf16 %v6200_v51, %v6193_v50  ;;  %v14694_v30 = vpack.c.bf16 %v6214_v56, %v6207_v55 }
 0x216   : > { %13548 = vmatmul.mubr.f32.vlgmr.msra.gmra.mrb[6].mxu0 %v15485_v23 }
 0x217   : > { %14596 = vmatpush3.bf16.msra.mxu0 %v14595_v16  ;;  %13618 = vmatprep.mubr.msk.f32.mxu0 %vm15275_vm1, %v15276_v38  ;;  %v6202_v59 = vand.u32 4294901760, %v6201_v54  ;;  %v6209_v63 = vand.u32 4294901760, %v6208_v60 }
 0x218   : > { %14597 = vmatprep.subr.bf16.mxu0 %v15274_v18 }
 0x219   : > { %v14673_v62 = vpack.c.bf16 %v6202_v59, %v6195_v58  ;;  %v14676_v1 = vpack.c.bf16 %v6216_v0, %v6209_v63  ;;  %v12504_v63 = vld [vmem:[%s16629_s5 + $0x68] sm:$0xff] }
 0x21b   : > { %14599 = vmatpush3.bf16.msra.mxu0 %v14598_v26 }
 0x21c   : > { %14600 = vmatprep.subr.bf16.mxu0 %v15274_v18 }
 0x21e   : > { %13619 = vmatmul.mubr.f32.vlgmr.msra.gmra.mrb[8].mxu0 %v15495_v4 }
 0x21f   : > { %14602 = vmatpush3.bf16.msra.mxu0 %v14601_v31  ;;  %13629 = vmatprep.mubr.msk.f32.mxu0 %vm15275_vm1, %v15276_v38  ;;  %v7514_v31 = vand.u32 4294901760, %v12495_v28 }
 0x220   : > { %14603 = vmatprep.subr.bf16.mxu0 %v15274_v18 }
 0x221   : > { %v15877_v19 = vpack.c.bf16 %v7517_v33, %v7514_v31 }
 0x223   : > { %14605 = vmatpush3.bf16.msra.mxu0 %v14604_v36  ;;  %v12498_v36 = vld [vmem:[%s16627_s3 + $0x78] sm:$0xff] }
 0x224   : > { %14606 = vmatprep.subr.bf16.mxu0 %v15274_v18  ;;  %v7523_v41 = vand.u32 4294901760, %v12498_v36 }
 0x226   : > { %13630 = vmatmul.mubr.f32.vlgmr.msra.gmra.mrb[8].mxu0 %v15485_v23 }
 0x227   : > { %14608 = vmatpush3.bf16.msra.mxu0 %v14607_v37  ;;  %13640 = vmatprep.mubr.msk.f32.mxu0 %vm15275_vm1, %v15276_v38  ;;  %v15856_v37 = vsub.f32 %v12495_v28, %v7514_v31 }
 0x228   : > { %14609 = vmatprep.subr.bf16.mxu0 %v15274_v18 }
 0x229   : > { %v7595_v44 = vand.u32 4294901760, %v15856_v37 }
 0x22b   : > { %14611 = vmatpush3.bf16.msra.mxu0 %v14610_v39  ;;  %v15858_v39 = vsub.f32 %v12496_v29, %v7517_v33  ;;  %v7596_v45 = vsub.f32 %v15856_v37, %v7595_v44 }
 0x22c   : > { %14612 = vmatprep.subr.bf16.mxu0 %v15274_v18 }
 0x22d   : > { %v7602_v15 = vand.u32 4294901760, %v15858_v39  ;;  %v7597_v48 = vand.u32 4294901760, %v7596_v45  ;;  %v14715_v56 = vpack.c.bf16 %v15858_v39, %v15856_v37 }
 0x22e   : > { %13641 = vmatmul.mubr.f32.vlgmr.msra.gmra.mrb[8].mxu0 %v15488_v24 }
 0x22f   : > { %14614 = vmatpush3.bf16.msra.mxu0 %v14595_v16  ;;  %13651 = vmatprep.mubr.msk.f32.mxu0 %vm15275_vm1, %v15276_v38  ;;  %v7603_v46 = vsub.f32 %v15858_v39, %v7602_v15  ;;  %v14727_v61 = vpack.c.bf16 %v7602_v15, %v7595_v44 }
 0x230   : > { %14615 = vmatprep.subr.bf16.mxu0 %v15274_v18 }
 0x231   : > { %v7604_v49 = vand.u32 4294901760, %v7603_v46 }
 0x233   : > { %14617 = vmatpush3.bf16.msra.mxu0 %v14598_v26 }
 0x234   : > { %14618 = vmatprep.subr.bf16.mxu0 %v15274_v18 }
 0x236   : > { %13652 = vmatmul.mubr.f32.vlgmr.msra.gmra.mrb[8].mxu0 %v15491_v25 }
 0x237   : > { %14620 = vmatpush3.bf16.msra.mxu0 %v14619_v40  ;;  %13662 = vmatprep.mubr.msk.f32.mxu0 %vm15275_vm1, %v15276_v38  ;;  %v7520_v40 = vand.u32 4294901760, %v12497_v34 }
 0x238   : > { %14621 = vmatprep.subr.bf16.mxu0 %v15274_v18 }
 0x239   : > { %v15867_v42 = vsub.f32 %v12497_v34, %v7520_v40  ;;  %v15892_v35 = vpack.c.bf16 %v7523_v41, %v7520_v40 }
 0x23b   : > { %14623 = vmatpush3.bf16.msra.mxu0 %v14622_v43  ;;  %v15869_v43 = vsub.f32 %v12498_v36, %v7523_v41  ;;  %v7609_v47 = vand.u32 4294901760, %v15867_v42 }
 0x23c   : > { %14624 = vmatprep.subr.bf16.mxu0 %v15274_v18 }
 0x23d   : > { %v7616_v32 = vand.u32 4294901760, %v15869_v43  ;;  %v7610_v50 = vsub.f32 %v15867_v42, %v7609_v47 }
 0x23e   : > { %13663 = vmatmul.mubr.f32.vlgmr.msra.gmra.mrb[8].mxu0 %v15485_v23 }
 0x23f   : > { %14626 = vmatpush3.bf16.msra.mxu0 %v14595_v16  ;;  %13673 = vmatprep.mubr.msk.f32.mxu0 %vm15275_vm1, %v15276_v38  ;;  %v7617_v51 = vsub.f32 %v15869_v43, %v7616_v32  ;;  %v7611_v53 = vand.u32 4294901760, %v7610_v50  ;;  %v14730_v0 = vpack.c.bf16 %v7616_v32, %v7609_v47 }
 0x240   : > { %14627 = vmatprep.subr.bf16.mxu0 %v15274_v18 }
 0x241   : > { %v7618_v54 = vand.u32 4294901760, %v7617_v51 }
 0x243   : > { %14629 = vmatpush3.bf16.msra.mxu0 %v14598_v26  ;;  %v14712_v55 = vpack.c.bf16 %v7618_v54, %v7611_v53 }
 0x244   : > { %14666 = vmatprep.subr.bf16.mxu0 %v15274_v18 }
 0x246   : > { %13674 = vmatmul.mubr.f32.vlgmr.msra.gmra.mrb[8].mxu0 %v15485_v23 }
 0x247   : > { %14668 = vmatpush3.bf16.msra.mxu0 %v15764_v52  ;;  %13750 = vmatprep.mubr.msk.f32.mxu0 %vm15275_vm1, %v15276_v38 }
 0x248   : > { %14669 = vmatprep.subr.bf16.mxu0 %v15274_v18 }
 0x24b   : > { %14671 = vmatpush3.bf16.msra.mxu0 %v15774_v57 }
 0x24c   : > { %14672 = vmatprep.subr.bf16.mxu0 %v15274_v18 }
 0x24e   : > { %13751 = vmatmul.mubr.f32.vlgmr.msra.gmra.mrb[10].mxu0 %v15495_v4 }
 0x24f   : > { %14674 = vmatpush3.bf16.msra.mxu0 %v14673_v62  ;;  %13761 = vmatprep.mubr.msk.f32.mxu0 %vm15275_vm1, %v15276_v38  ;;  %v12503_v62 = vld [vmem:[%s16629_s5 + $0x60] sm:$0xff] }
 0x250   : > { %14675 = vmatprep.subr.bf16.mxu0 %v15274_v18 }
 0x253   : > { %14677 = vmatpush3.bf16.msra.mxu0 %v14676_v1  ;;  %v8494_v1 = vand.u32 4294901760, %v12503_v62 }
 0x254   : > { %14678 = vmatprep.subr.bf16.mxu0 %v15274_v18 }
 0x256   : > { %13762 = vmatmul.mubr.f32.vlgmr.msra.gmra.mrb[10].mxu0 %v15485_v23 }
 0x257   : > { %14680 = vmatpush3.bf16.msra.mxu0 %v14679_v2  ;;  %13772 = vmatprep.mubr.msk.f32.mxu0 %vm15275_vm1, %v15276_v38  ;;  %v8497_v2 = vand.u32 4294901760, %v12504_v63 }
 0x258   : > { %14681 = vmatprep.subr.bf16.mxu0 %v15274_v18 }
 0x259   : > { %v848_v5 = vpop.f32.mrb[0].mxu0  ;;  %v1337_v6 = vpop.f32.mrb[0].mxu1 }
 0x25a   : > { %v1832_v7 = vsel %vm1830_vm2, %v848_v5, 0  ;;  %v1835_v8 = vsel %vm1830_vm2, %v1337_v6, 0  ;;  %v13159_v9 = vpop.f32.mrb[1].mxu0  ;;  %v13225_v10 = vpop.f32.mrb[1].mxu1  ;;  %v12506_v5 = vld [vmem:[%s16629_s5 + $0x78] sm:$0xff]  ;;  %v8574_v6 = vsub.f32 %v12503_v62, %v8494_v1 }
 0x25b   : > { %v15803_v11 = vand.u32 4294901760, %v1832_v7  ;;  %v15805_v12 = vand.u32 4294901760, %v1835_v8  ;;  %14683 = vmatpush3.bf16.msra.mxu0 %v14682_v3  ;;  %v12505_v3 = vld [vmem:[%s16629_s5 + $0x70] sm:$0xff]  ;;  %v8503_v9 = vand.u32 4294901760, %v12506_v5 }
 0x25c   : > { %14684 = vmatprep.subr.bf16.mxu0 %v15274_v18 }
 0x25d   : > { %v15809_v13 = vsub.f32 %v1832_v7, %v15803_v11  ;;  %v15812_v14 = vsub.f32 %v1835_v8, %v15805_v12  ;;  %13293 = vmatpush3.xpose.msra.mxu1 %v15805_v12  ;;  %v8581_v7 = vsub.f32 %v12504_v63, %v8497_v2  ;;  %v8500_v8 = vand.u32 4294901760, %v12505_v3 }
 0x25e   : > { %13773 = vmatmul.mubr.f32.vlgmr.msra.gmra.mrb[10].mxu0 %v15488_v24  ;;  %13297 = vmatprep.subr.mxu1 %v15276_v38 }
 0x25f   : > { %v1905_v16 = vand.u32 4294901760, %v15809_v13  ;;  %v1916_v17 = vand.u32 4294901760, %v15812_v14  ;;  %14686 = vmatpush3.bf16.msra.mxu0 %v15764_v52  ;;  %13783 = vmatprep.mubr.msk.f32.mxu0 %vm15275_vm1, %v15276_v38  ;;  %v8588_v10 = vsub.f32 %v12505_v3, %v8500_v8  ;;  %v14787_v36 = vpack.c.bf16 %v8581_v7, %v8574_v6 }
 0x260   : > { %14687 = vmatprep.subr.bf16.mxu0 %v15274_v18 }
 0x261   : > { %v1906_v20 = vsub.f32 %v15809_v13, %v1905_v16  ;;  %v1917_v21 = vsub.f32 %v15812_v14, %v1916_v17 }
 0x263   : > { %v1907_v22 = vand.u32 4294901760, %v1906_v20  ;;  %v1918_v26 = vand.u32 4294901760, %v1917_v21  ;;  %14689 = vmatpush3.bf16.msra.mxu0 %v15774_v57  ;;  %v8589_v20 = vand.u32 4294901760, %v8588_v10 }
 0x264   : > { %14690 = vmatprep.subr.bf16.mxu0 %v15274_v18 }
 0x265   : > { %13295 = vmatmul.mubr.f32.vlgmr.msra.gmra.mrb[2].mxu1 %v1907_v22  ;;  %v14778_v22 = vpack.c.bf16 %v8503_v9, %v8500_v8  ;;  %v8590_v28 = vsub.f32 %v8588_v10, %v8589_v20 }
 0x266   : > { %13298 = vmatpush3.xpose.msra.mxu1 %v1918_v26  ;;  %13784 = vmatmul.mubr.f32.vlgmr.msra.gmra.mrb[10].mxu0 %v15491_v25 }
 0x267   : > { %14692 = vmatpush3.bf16.msra.mxu0 %v14691_v27  ;;  %13299 = vmatprep.mubr.msk.f32.mxu1 %vm15275_vm1, %v15276_v38  ;;  %v8591_v31 = vand.u32 4294901760, %v8590_v28 }
 0x268   : > { %14693 = vmatprep.subr.bf16.mxu0 %v15274_v18  ;;  %13302 = vmatprep.subr.mxu1 %v15276_v38 }
 0x269   : > { %13794 = vmatprep.mubr.msk.f32.mxu0 %vm15275_vm1, %v15276_v38 }
 0x26b   : > { %14695 = vmatpush3.bf16.msra.mxu0 %v14694_v30 }
 0x26c   : > { %14696 = vmatprep.subr.bf16.mxu0 %v15274_v18 }
 0x26d   : > { %13300 = vmatmul.mubr.f32.vlgmr.msra.gmra.mrb[2].mxu1 %v15803_v11 }
 0x26e   : > { %13303 = vmatpush3.xpose.msra.mxu1 %v15812_v14  ;;  %13795 = vmatmul.mubr.f32.vlgmr.msra.gmra.mrb[10].mxu0 %v15485_v23  ;;  %v14775_v14 = vpack.c.bf16 %v8497_v2, %v8494_v1 }
 0x26f   : > { %14698 = vmatpush3.bf16.msra.mxu0 %v15764_v52  ;;  %13304 = vmatprep.mubr.msk.f32.mxu1 %vm15275_vm1, %v15276_v38  ;;  %v14709_v52 = vpack.c.bf16 %v7604_v49, %v7597_v48 }
 0x270   : > { %14699 = vmatprep.subr.bf16.mxu0 %v15274_v18  ;;  %13307 = vmatprep.subr.mxu1 %v15276_v38 }
 0x271   : > { %13805 = vmatprep.mubr.msk.f32.mxu0 %vm15275_vm1, %v15276_v38 }
 0x273   : > { %14701 = vmatpush3.bf16.msra.mxu0 %v15774_v57  ;;  %v14718_v57 = vpack.c.bf16 %v15869_v43, %v15867_v42 }
 0x274   : > { %14702 = vmatprep.subr.bf16.mxu0 %v15274_v18 }
 0x275   : > { %13305 = vmatmul.mubr.f32.vlgmr.msra.gmra.mrb[2].mxu1 %v15809_v13  ;;  %v8582_v13 = vand.u32 4294901760, %v8581_v7 }
 0x276   : > { %13308 = vmatpush3.xpose.msra.mxu1 %v15805_v12  ;;  %13806 = vmatmul.mubr.f32.vlgmr.msra.gmra.mrb[10].mxu0 %v15485_v23 }
 0x277   : > { %14704 = vmatpush3.bf16.msra.mxu0 %v15877_v19  ;;  %13309 = vmatprep.mubr.msk.f32.mxu1 %vm15275_vm1, %v15276_v38 }
 0x278   : > { %14705 = vmatprep.subr.bf16.mxu0 %v15274_v18  ;;  %13312 = vmatprep.subr.mxu1 %v15276_v38 }
 0x279   : > { %13876 = vmatprep.mubr.msk.f32.mxu0 %vm15275_vm1, %v15276_v38 }
 0x27b   : > { %14707 = vmatpush3.bf16.msra.mxu0 %v15892_v35 }
 0x27c   : > { %14708 = vmatprep.subr.bf16.mxu0 %v15274_v18 }
 0x27d   : > { %13310 = vmatmul.mubr.f32.vlgmr.msra.gmra.mrb[2].mxu1 %v1905_v16 }
 0x27e   : > { %13313 = vmatpush3.xpose.msra.mxu1 %v1916_v17  ;;  %13877 = vmatmul.mubr.f32.vlgmr.msra.gmra.mrb[12].mxu0 %v15495_v4  ;;  %v8583_v17 = vsub.f32 %v8581_v7, %v8582_v13 }
 0x27f   : > { %14710 = vmatpush3.bf16.msra.mxu0 %v14709_v52  ;;  %13314 = vmatprep.mubr.msk.f32.mxu1 %vm15275_vm1, %v15276_v38 }
 0x280   : > { %14711 = vmatprep.subr.bf16.mxu0 %v15274_v18  ;;  %13317 = vmatprep.subr.mxu1 %v15276_v38  ;;  %v8584_v27 = vand.u32 4294901760, %v8583_v17 }
 0x281   : > { %13887 = vmatprep.mubr.msk.f32.mxu0 %vm15275_vm1, %v15276_v38 }
 0x283   : > { %14713 = vmatpush3.bf16.msra.mxu0 %v14712_v55 }
 0x284   : > { %14714 = vmatprep.subr.bf16.mxu0 %v15274_v18 }
 0x285   : > { %13315 = vmatmul.mubr.f32.vlgmr.msra.gmra.mrb[2].mxu1 %v15803_v11 }
 0x286   : > { %13318 = vmatpush3.xpose.msra.mxu1 %v15805_v12  ;;  %13888 = vmatmul.mubr.f32.vlgmr.msra.gmra.mrb[12].mxu0 %v15485_v23  ;;  %v8575_v12 = vand.u32 4294901760, %v8574_v6 }
 0x287   : > { %14716 = vmatpush3.bf16.msra.mxu0 %v14715_v56  ;;  %13319 = vmatprep.mubr.msk.f32.mxu1 %vm15275_vm1, %v15276_v38 }
 0x288   : > { %14717 = vmatprep.subr.bf16.mxu0 %v15274_v18  ;;  %13322 = vmatprep.subr.mxu1 %v15276_v38  ;;  %v8576_v16 = vsub.f32 %v8574_v6, %v8575_v12  ;;  %v14799_v41 = vpack.c.bf16 %v8582_v13, %v8575_v12  ;;  %v12477_v12 = vld [vmem:[%s16628_s4 + $0x30] sm:$0xff]  ;;  %v12478_v13 = vld [vmem:[%s16628_s4 + $0x38] sm:$0xff] }
 0x289   : > { %v15928_v58 = vpop.f32.mrb[2].mxu0  ;;  %13898 = vmatprep.mubr.msk.f32.mxu0 %vm15275_vm1, %v15276_v38  ;;  %v3246_v17 = vand.u32 4294901760, %v12477_v12 }
 0x28a   : > { %v13291_v59 = vpop.f32.mrb[3].mxu0  ;;  %v15933_v60 = vand.u32 4294901760, %v15928_v58  ;;  %v8577_v26 = vand.u32 4294901760, %v8576_v16 }
 0x28b   : > { %14719 = vmatpush3.bf16.msra.mxu0 %v14718_v57 }
 0x28c   : > { %14720 = vmatprep.subr.bf16.mxu0 %v15274_v18  ;;  %v14781_v30 = vpack.c.bf16 %v8584_v27, %v8577_v26 }
 0x28d   : > { %13320 = vmatmul.mubr.f32.vlgmr.msra.gmra.mrb[2].mxu1 %v15803_v11  ;;  %v8595_v11 = vsub.f32 %v12506_v5, %v8503_v9  ;;  %v12476_v9 = vld [vmem:[%s16628_s4 + $0x28] sm:$0xff] }
 0x28e   : > { %13323 = vmatpush3.msra.mxu1 %v15933_v60  ;;  %13899 = vmatmul.mubr.f32.vlgmr.msra.gmra.mrb[12].mxu0 %v15488_v24 }
 0x28f   : > { %14722 = vmatpush3.bf16.msra.mxu0 %v15877_v19  ;;  %13909 = vmatprep.mubr.msk.f32.mxu0 %vm15275_vm1, %v15276_v38  ;;  %v8596_v21 = vand.u32 4294901760, %v8595_v11  ;;  %v14790_v37 = vpack.c.bf16 %v8595_v11, %v8588_v10 }
 0x290   : > { %14723 = vmatprep.subr.bf16.mxu0 %v15274_v18  ;;  %13324 = vmatprep.mubr.msk.f32.mxu1 %vm15275_vm1, %v15276_v38 }
 0x291   : > { %13327 = vmatprep.subr.mxu1 %v15276_v38  ;;  %v8597_v29 = vsub.f32 %v8595_v11, %v8596_v21  ;;  %v14802_v42 = vpack.c.bf16 %v8596_v21, %v8589_v20  ;;  %v3243_v11 = vand.u32 4294901760, %v12476_v9  ;;  %v3249_v20 = vand.u32 4294901760, %v12478_v13 }
 0x292   : > { %v3334_v21 = vsub.f32 %v12477_v12, %v3246_v17 }
 0x293   : > { %14725 = vmatpush3.bf16.msra.mxu0 %v15892_v35  ;;  %v8598_v33 = vand.u32 4294901760, %v8597_v29  ;;  %v3327_v16 = vsub.f32 %v12476_v9, %v3243_v11 }
 0x294   : > { %14726 = vmatprep.subr.bf16.mxu0 %v15274_v18 }
 0x295   : > { %v14784_v34 = vpack.c.bf16 %v8598_v33, %v8591_v31  ;;  %v3328_v27 = vand.u32 4294901760, %v3327_v16  ;;  %v3335_v31 = vand.u32 4294901760, %v3334_v21 }
 0x296   : > { %13910 = vmatmul.mubr.f32.vlgmr.msra.gmra.mrb[12].mxu0 %v15491_v25 }
 0x297   : > { %14728 = vmatpush3.bf16.msra.mxu0 %v14727_v61  ;;  %13920 = vmatprep.mubr.msk.f32.mxu0 %vm15275_vm1, %v15276_v38  ;;  %v2376_v61 = vsub.f32 %v15928_v58, %v15933_v60  ;;  %v12475_v58 = vld [vmem:[%s16628_s4 + $0x20] sm:$0xff] }
 0x298   : > { %14729 = vmatprep.subr.bf16.mxu0 %v15274_v18  ;;  %v3240_v10 = vand.u32 4294901760, %v12475_v58 }
 0x299   : > { %v2377_v1 = vand.u32 4294901760, %v2376_v61 }
 0x29a   : > { %v14523_v28 = vpack.c.bf16 %v3243_v11, %v3240_v10 }
 0x29b   : > { %14731 = vmatpush3.bf16.msra.mxu0 %v14730_v0  ;;  %v2378_v5 = vsub.f32 %v2376_v61, %v2377_v1 }
 0x29c   : > { %14732 = vmatprep.subr.bf16.mxu0 %v15274_v18 }
 0x29d   : > { %v2379_v8 = vand.u32 4294901760, %v2378_v5 }
 0x29e   : > { %13921 = vmatmul.mubr.f32.vlgmr.msra.gmra.mrb[12].mxu0 %v15485_v23 }
 0x29f   : > { %14734 = vmatpush3.bf16.msra.mxu0 %v15877_v19  ;;  %13931 = vmatprep.mubr.msk.f32.mxu0 %vm15275_vm1, %v15276_v38 }
 0x2a0   : > { %14735 = vmatprep.subr.bf16.mxu0 %v15274_v18 }
 0x2a3   : > { %14737 = vmatpush3.bf16.msra.mxu0 %v15892_v35 }
 0x2a4   : > { %14774 = vmatprep.subr.bf16.mxu0 %v15274_v18 }
 0x2a6   : > { %13932 = vmatmul.mubr.f32.vlgmr.msra.gmra.mrb[12].mxu0 %v15485_v23 }
 0x2a7   : > { %14776 = vmatpush3.bf16.msra.mxu0 %v14775_v14  ;;  %14008 = vmatprep.mubr.msk.f32.mxu0 %vm15275_vm1, %v15276_v38 }
 0x2a8   : > { %14777 = vmatprep.subr.bf16.mxu0 %v15274_v18 }
 0x2ab   : > { %14779 = vmatpush3.bf16.msra.mxu0 %v14778_v22 }
 0x2ac   : > { %14780 = vmatprep.subr.bf16.mxu0 %v15274_v18 }
 0x2ae   : > { %14009 = vmatmul.mubr.f32.vlgmr.msra.gmra.mrb[14].mxu0 %v15495_v4 }
 0x2af   : > { %14782 = vmatpush3.bf16.msra.mxu0 %v14781_v30  ;;  %14019 = vmatprep.mubr.msk.f32.mxu0 %vm15275_vm1, %v15276_v38  ;;  %v3329_v30 = vsub.f32 %v3327_v16, %v3328_v27 }
 0x2b0   : > { %14783 = vmatprep.subr.bf16.mxu0 %v15274_v18 }
 0x2b3   : > { %14785 = vmatpush3.bf16.msra.mxu0 %v14784_v34  ;;  %v14526_v34 = vpack.c.bf16 %v3249_v20, %v3246_v17 }
 0x2b4   : > { %14786 = vmatprep.subr.bf16.mxu0 %v15274_v18 }
 0x2b6   : > { %14020 = vmatmul.mubr.f32.vlgmr.msra.gmra.mrb[14].mxu0 %v15485_v23 }
 0x2b7   : > { %14788 = vmatpush3.bf16.msra.mxu0 %v14787_v36  ;;  %14030 = vmatprep.mubr.msk.f32.mxu0 %vm15275_vm1, %v15276_v38  ;;  %v3330_v36 = vand.u32 4294901760, %v3329_v30 }
 0x2b8   : > { %14789 = vmatprep.subr.bf16.mxu0 %v15274_v18 }
 0x2b9   : > { %v15990_v39 = vpop.f32.mrb[4].mxu0 }
 0x2ba   : > { %v13417_v40 = vpop.f32.mrb[5].mxu0 }
 0x2bb   : > { %14791 = vmatpush3.bf16.msra.mxu0 %v14790_v37  ;;  %v3336_v37 = vsub.f32 %v3334_v21, %v3335_v31 }
 0x2bc   : > { %14792 = vmatprep.subr.bf16.mxu0 %v15274_v18 }
 0x2be   : > { %14031 = vmatmul.mubr.f32.vlgmr.msra.gmra.mrb[14].mxu0 %v15488_v24 }
 0x2bf   : > { %14794 = vmatpush3.bf16.msra.mxu0 %v14775_v14  ;;  %14041 = vmatprep.mubr.msk.f32.mxu0 %vm15275_vm1, %v15276_v38 }
 0x2c0   : > { %14795 = vmatprep.subr.bf16.mxu0 %v15274_v18 }
 0x2c3   : > { %14797 = vmatpush3.bf16.msra.mxu0 %v14778_v22 }
 0x2c4   : > { %14798 = vmatprep.subr.bf16.mxu0 %v15274_v18 }
 0x2c6   : > { %14042 = vmatmul.mubr.f32.vlgmr.msra.gmra.mrb[14].mxu0 %v15491_v25 }
 0x2c7   : > { %14800 = vmatpush3.bf16.msra.mxu0 %v14799_v41  ;;  %14052 = vmatprep.mubr.msk.f32.mxu0 %vm15275_vm1, %v15276_v38 }
 0x2c8   : > { %14801 = vmatprep.subr.bf16.mxu0 %v15274_v18 }
 0x2cb   : > { %14803 = vmatpush3.bf16.msra.mxu0 %v14802_v42  ;;  %v3337_v42 = vand.u32 4294901760, %v3336_v37 }
 0x2cc   : > { %14804 = vmatprep.subr.bf16.mxu0 %v15274_v18 }
 0x2ce   : > { %14053 = vmatmul.mubr.f32.vlgmr.msra.gmra.mrb[14].mxu0 %v15485_v23 }
 0x2cf   : > { %14806 = vmatpush3.bf16.msra.mxu0 %v14775_v14  ;;  %14063 = vmatprep.mubr.msk.f32.mxu0 %vm15275_vm1, %v15276_v38  ;;  %v3320_v14 = vsub.f32 %v12475_v58, %v3240_v10 }
 0x2d0   : > { %14807 = vmatprep.subr.bf16.mxu0 %v15274_v18 }
 0x2d1   : > { %v3321_v26 = vand.u32 4294901760, %v3320_v14 }
 0x2d3   : > { %14809 = vmatpush3.bf16.msra.mxu0 %v14778_v22  ;;  %v3341_v22 = vsub.f32 %v12478_v13, %v3249_v20  ;;  %v3322_v29 = vsub.f32 %v3320_v14, %v3321_v26 }
 0x2d5   : > { %v3342_v33 = vand.u32 4294901760, %v3341_v22 }
 0x2d6   : > { %14064 = vmatmul.mubr.f32.vlgmr.msra.gmra.mrb[14].mxu0 %v15485_v23 }
 0x2d7   : > { %v3343_v40 = vsub.f32 %v3341_v22, %v3342_v33 }
 0x2e9   : > { %v16008_v43 = vpop.f32.mrb[6].mxu0 }
 0x2ea   : > { %v13549_v44 = vpop.f32.mrb[7].mxu0 }
 0x2eb   : > { %v3344_v44 = vand.u32 4294901760, %v3343_v40 }
 0x319   : > { %v16010_v15 = vpop.f32.mrb[8].mxu0 }
 0x31a   : > { %v13675_v19 = vpop.f32.mrb[9].mxu0 }
 0x31b   : > { %v14532_v19 = vpack.c.bf16 %v3344_v44, %v3337_v42 }
 0x349   : > { %v16012_v45 = vpop.f32.mrb[10].mxu0 }
 0x34a   : > { %v13807_v46 = vpop.f32.mrb[11].mxu0 }
 0x34b   : > { %v14535_v46 = vpack.c.bf16 %v3327_v16, %v3320_v14 }
 0x360   : > { %v2279_v47 = vpop.f32.mrb[2].mxu1 }
 0x361   : > { %v13321_v32 = vpop.f32.mrb[3].mxu1  ;;  %v2284_v35 = vsel %vm2283_vm3, %v2279_v47, -inf }
 0x362   : > { %2285 = vmax.xlane.f32.xlu1 %v2284_v35  ;;  %v14547_v32 = vpack.c.bf16 %v3328_v27, %v3321_v26  ;;  %v14550_v35 = vpack.c.bf16 %v3342_v33, %v3335_v31  ;;  %v12488_v31 = vld [vmem:[%s16628_s4 + $0x48] sm:$0xff] }
 0x379   : > { %v16015_v48 = vpop.f32.mrb[12].mxu0 }
 0x37a   : > { %v13933_v49 = vpop.f32.mrb[13].mxu0 }
 0x3a9   : > { %v16017_v50 = vpop.f32.mrb[14].mxu0 }
 0x3aa   : > { %v14065_v51 = vpop.f32.mrb[15].mxu0 }
 0x3ef   : > { %v2286_v52 = vpop.xlane.xlu1 %2285 }
 0x3f0   : > { %v2287_v53 = vsub.f32 %v2279_v47, %v2286_v52  ;;  %v14538_v47 = vpack.c.bf16 %v3341_v22, %v3334_v21  ;;  %v4215_v52 = vsel %vm1830_vm2, %v15990_v39, 0 }
 0x3f2   : > { %v2288_v54 = vmul.f32 1.442695, %v2287_v53  ;;  %v4286_v53 = vand.u32 4294901760, %v4215_v52 }
 0x3f4   : > { %15194 = vpow2.f32 %v2288_v54  ;;  %v4287_v54 = vsub.f32 %v4215_v52, %v4286_v53 }
 0x3fe   : > { %v15195_v55 = vpop.eup %15194 }
 0x3ff   : > { %v2290_v56 = vsel %vm2283_vm3, %v15195_v55, 0.0 }
 0x400   : > { %2291 = vadd.xlane.f32.xlu1 %v2290_v56 }
 0x48d   : > { %v2292_v57 = vpop.xlane.xlu1 %2291 }
 0x48e   : > { %15196 = vrcp.f32 %v2292_v57 }
 0x498   : > { %v15197_v59 = vpop.eup %15196 }
 0x499   : > { %v2294_v62 = vmul.f32 %v15197_v59, %v15195_v55  ;;  %v4288_v55 = vand.u32 4294901760, %v4287_v54 }
 0x49b   : > { %v2296_v63 = vsel %vm2283_vm3, %v2294_v62, 0  ;;  %v4289_v57 = vsub.f32 %v4287_v54, %v4288_v55 }
 0x49c   : > { %v2364_v0 = vand.u32 4294901760, %v2296_v63 }
 0x49e   : > { %v2365_v2 = vsub.f32 %v2296_v63, %v2364_v0 }
 0x4a0   : > { %v2366_v3 = vand.u32 4294901760, %v2365_v2 }
 0x4a2   : > { %v2367_v6 = vsub.f32 %v2365_v2, %v2366_v3 }
 0x4a4   : > { %v2368_v7 = vand.u32 4294901760, %v2367_v6 }
 0x4a6   : > { %13325 = vmatmul.mubr.f32.vlgmr.msra.gmra.mrb[4].mxu1 %v2368_v7 }
 0x4a7   : > { %13328 = vmatpush3.msra.mxu1 %v2379_v8  ;;  %13329 = vmatprep.mubr.msk.f32.mxu1 %vm15275_vm1, %v15276_v38 }
 0x4a8   : > { %13332 = vmatprep.subr.mxu1 %v15276_v38 }
 0x4ae   : > { %13330 = vmatmul.mubr.f32.vlgmr.msra.gmra.mrb[4].mxu1 %v2364_v0 }
 0x4af   : > { %13333 = vmatpush3.msra.mxu1 %v2376_v61  ;;  %13334 = vmatprep.mubr.msk.f32.mxu1 %vm15275_vm1, %v15276_v38 }
 0x4b0   : > { %13337 = vmatprep.subr.mxu1 %v15276_v38 }
 0x4b6   : > { %13335 = vmatmul.mubr.f32.vlgmr.msra.gmra.mrb[4].mxu1 %v2365_v2 }
 0x4b7   : > { %13338 = vmatpush3.msra.mxu1 %v15933_v60  ;;  %13339 = vmatprep.mubr.msk.f32.mxu1 %vm15275_vm1, %v15276_v38 }
 0x4b8   : > { %13342 = vmatprep.subr.mxu1 %v15276_v38 }
 0x4be   : > { %13340 = vmatmul.mubr.f32.vlgmr.msra.gmra.mrb[4].mxu1 %v2366_v3  ;;  %v4681_v3 = vand.u32 4294901760, %v16008_v43 }
 0x4bf   : > { %13343 = vmatpush3.msra.mxu1 %v2377_v1  ;;  %13344 = vmatprep.mubr.msk.f32.mxu1 %vm15275_vm1, %v15276_v38 }
 0x4c0   : > { %13347 = vmatprep.subr.mxu1 %v15276_v38  ;;  %v4758_v14 = vsub.f32 %v16008_v43, %v4681_v3  ;;  %v12487_v43 = vld [vmem:[%s16628_s4 + $0x40] sm:$0xff] }
 0x4c1   : > { %v5622_v33 = vand.u32 4294901760, %v12487_v43 }
 0x4c2   : > { %v4759_v21 = vand.u32 4294901760, %v4758_v14 }
 0x4c3   : > { %v5702_v37 = vsub.f32 %v12487_v43, %v5622_v33 }
 0x4c4   : > { %v4760_v27 = vsub.f32 %v4758_v14, %v4759_v21 }
 0x4c6   : > { %13345 = vmatmul.mubr.f32.vlgmr.msra.gmra.mrb[4].mxu1 %v2364_v0  ;;  %v4761_v30 = vand.u32 4294901760, %v4760_v27 }
 0x4c7   : > { %13348 = vmatpush3.msra.mxu1 %v15933_v60  ;;  %13349 = vmatprep.mubr.msk.f32.mxu1 %vm15275_vm1, %v15276_v38  ;;  %v3323_v60 = vand.u32 4294901760, %v3322_v29 }
 0x4c8   : > { %14522 = vmatprep.subr.bf16.mxu1 %v15274_v18 }
 0x4c9   : > { %v14529_v41 = vpack.c.bf16 %v3330_v36, %v3323_v60  ;;  %v12489_v60 = vld [vmem:[%s16628_s4 + $0x50] sm:$0xff]  ;;  %v12490_v36 = vld [vmem:[%s16628_s4 + $0x58] sm:$0xff] }
 0x4ca   : > { %v5631_v42 = vand.u32 4294901760, %v12490_v36 }
 0x4ce   : > { %13350 = vmatmul.mubr.f32.vlgmr.msra.gmra.mrb[4].mxu1 %v2364_v0  ;;  %v4290_v0 = vand.u32 4294901760, %v4289_v57 }
 0x4cf   : > { %14524 = vmatpush3.bf16.msra.mxu1 %v14523_v28  ;;  %13426 = vmatprep.mubr.msk.f32.mxu1 %vm15275_vm1, %v15276_v38 }
 0x4d0   : > { %14525 = vmatprep.subr.bf16.mxu1 %v15274_v18 }
 0x4d3   : > { %14527 = vmatpush3.bf16.msra.mxu1 %v14526_v34 }
 0x4d4   : > { %14528 = vmatprep.subr.bf16.mxu1 %v15274_v18 }
 0x4d6   : > { %13427 = vmatmul.mubr.f32.vlgmr.msra.gmra.mrb[6].mxu1 %v15495_v4 }
 0x4d7   : > { %14530 = vmatpush3.bf16.msra.mxu1 %v14529_v41  ;;  %13437 = vmatprep.mubr.msk.f32.mxu1 %vm15275_vm1, %v15276_v38  ;;  %v5628_v41 = vand.u32 4294901760, %v12489_v60 }
 0x4d8   : > { %14531 = vmatprep.subr.bf16.mxu1 %v15274_v18 }
 0x4d9   : > { %v5716_v44 = vsub.f32 %v12489_v60, %v5628_v41 }
 0x4db   : > { %14533 = vmatpush3.bf16.msra.mxu1 %v14532_v19  ;;  %v5723_v19 = vsub.f32 %v12490_v36, %v5631_v42  ;;  %v5717_v52 = vand.u32 4294901760, %v5716_v44 }
 0x4dc   : > { %14534 = vmatprep.subr.bf16.mxu1 %v15274_v18 }
 0x4dd   : > { %v5718_v57 = vsub.f32 %v5716_v44, %v5717_v52 }
 0x4de   : > { %13438 = vmatmul.mubr.f32.vlgmr.msra.gmra.mrb[6].mxu1 %v15485_v23 }
 0x4df   : > { %14536 = vmatpush3.bf16.msra.mxu1 %v14535_v46  ;;  %13448 = vmatprep.mubr.msk.f32.mxu1 %vm15275_vm1, %v15276_v38  ;;  %v5703_v46 = vand.u32 4294901760, %v5702_v37 }
 0x4e0   : > { %14537 = vmatprep.subr.bf16.mxu1 %v15274_v18 }
 0x4e3   : > { %14539 = vmatpush3.bf16.msra.mxu1 %v14538_v47 }
 0x4e4   : > { %14540 = vmatprep.subr.bf16.mxu1 %v15274_v18 }
 0x4e6   : > { %13449 = vmatmul.mubr.f32.vlgmr.msra.gmra.mrb[6].mxu1 %v15488_v24 }
 0x4e7   : > { %14542 = vmatpush3.bf16.msra.mxu1 %v14523_v28  ;;  %13459 = vmatprep.mubr.msk.f32.mxu1 %vm15275_vm1, %v15276_v38 }
 0x4e8   : > { %14543 = vmatprep.subr.bf16.mxu1 %v15274_v18 }
 0x4eb   : > { %14545 = vmatpush3.bf16.msra.mxu1 %v14526_v34 }
 0x4ec   : > { %14546 = vmatprep.subr.bf16.mxu1 %v15274_v18 }
 0x4ee   : > { %13460 = vmatmul.mubr.f32.vlgmr.msra.gmra.mrb[6].mxu1 %v15491_v25 }
 0x4ef   : > { %14548 = vmatpush3.bf16.msra.mxu1 %v14547_v32  ;;  %13470 = vmatprep.mubr.msk.f32.mxu1 %vm15275_vm1, %v15276_v38 }
 0x4f0   : > { %14549 = vmatprep.subr.bf16.mxu1 %v15274_v18 }
 0x4f3   : > { %14551 = vmatpush3.bf16.msra.mxu1 %v14550_v35  ;;  %v5704_v35 = vsub.f32 %v5702_v37, %v5703_v46 }
 0x4f4   : > { %14552 = vmatprep.subr.bf16.mxu1 %v15274_v18 }
 0x4f6   : > { %13471 = vmatmul.mubr.f32.vlgmr.msra.gmra.mrb[6].mxu1 %v15485_v23 }
 0x4f7   : > { %14554 = vmatpush3.bf16.msra.mxu1 %v14523_v28  ;;  %13481 = vmatprep.mubr.msk.f32.mxu1 %vm15275_vm1, %v15276_v38 }
 0x4f8   : > { %14555 = vmatprep.subr.bf16.mxu1 %v15274_v18 }
 0x4fb   : > { %14557 = vmatpush3.bf16.msra.mxu1 %v14526_v34  ;;  %v5625_v34 = vand.u32 4294901760, %v12488_v31 }
 0x4fc   : > { %13550 = vmatprep.subr.mxu1 %v15276_v38 }
 0x4fd   : > { %v5709_v40 = vsub.f32 %v12488_v31, %v5625_v34  ;;  %v14631_v32 = vpack.c.bf16 %v5625_v34, %v5622_v33 }
 0x4fe   : > { %13482 = vmatmul.mubr.f32.vlgmr.msra.gmra.mrb[6].mxu1 %v15485_v23 }
 0x4ff   : > { %13552 = vmatprep.mubr.msk.f32.mxu1 %vm15275_vm1, %v15276_v38  ;;  %v5710_v47 = vand.u32 4294901760, %v5709_v40 }
 0x5a1   : > { %v16084_v49 = vpop.f32.mrb[4].mxu1 }
 0x5a2   : > { %v13351_v51 = vpop.f32.mrb[5].mxu1 }
 0x5a3   : > { %v5711_v51 = vsub.f32 %v5709_v40, %v5710_v47 }
 0x5d1   : > { %v3720_v56 = vpop.f32.mrb[6].mxu1 }
 0x5d2   : > { %v4218_v59 = vsel %vm1830_vm2, %v3720_v56, 0  ;;  %v13483_v61 = vpop.f32.mrb[7].mxu1  ;;  %v5712_v56 = vand.u32 4294901760, %v5711_v51 }
 0x5d3   : > { %v4221_v62 = vand.u32 4294901760, %v4218_v59 }
 0x5d5   : > { %v4298_v63 = vsub.f32 %v4218_v59, %v4221_v62  ;;  %13551 = vmatpush3.xpose.msra.mxu1 %v4221_v62 }
 0x5d6   : > { %13555 = vmatprep.subr.mxu1 %v15276_v38 }
 0x5d7   : > { %v4299_v1 = vand.u32 4294901760, %v4298_v63 }
 0x5d8   : > { %13553 = vmatmul.mubr.f32.vlgmr.msra.gmra.mrb[8].mxu1 %v4290_v0 }
 0x5d9   : > { %v4300_v2 = vsub.f32 %v4298_v63, %v4299_v1  ;;  %13557 = vmatprep.mubr.msk.f32.mxu1 %vm15275_vm1, %v15276_v38 }
 0x5db   : > { %v4301_v39 = vand.u32 4294901760, %v4300_v2  ;;  %v14646_v2 = vpack.c.bf16 %v5723_v19, %v5716_v44 }
 0x5dd   : > { %13556 = vmatpush3.xpose.msra.mxu1 %v4301_v39  ;;  %v14655_v39 = vpack.c.bf16 %v5710_v47, %v5703_v46 }
 0x5de   : > { %13560 = vmatprep.subr.mxu1 %v15276_v38 }
 0x5e0   : > { %13558 = vmatmul.mubr.f32.vlgmr.msra.gmra.mrb[8].mxu1 %v4286_v53 }
 0x5e1   : > { %13561 = vmatpush3.xpose.msra.mxu1 %v4298_v63  ;;  %13562 = vmatprep.mubr.msk.f32.mxu1 %vm15275_vm1, %v15276_v38 }
 0x5e2   : > { %13565 = vmatprep.subr.mxu1 %v15276_v38 }
 0x5e8   : > { %13563 = vmatmul.mubr.f32.vlgmr.msra.gmra.mrb[8].mxu1 %v4287_v54  ;;  %v14634_v54 = vpack.c.bf16 %v5631_v42, %v5628_v41 }
 0x5e9   : > { %13566 = vmatpush3.xpose.msra.mxu1 %v4221_v62  ;;  %13567 = vmatprep.mubr.msk.f32.mxu1 %vm15275_vm1, %v15276_v38 }
 0x5ea   : > { %13570 = vmatprep.subr.mxu1 %v15276_v38 }
 0x5f0   : > { %13568 = vmatmul.mubr.f32.vlgmr.msra.gmra.mrb[8].mxu1 %v4288_v55  ;;  %v5705_v55 = vand.u32 4294901760, %v5704_v35 }
 0x5f1   : > { %13571 = vmatpush3.xpose.msra.mxu1 %v4299_v1  ;;  %13572 = vmatprep.mubr.msk.f32.mxu1 %vm15275_vm1, %v15276_v38  ;;  %v14643_v1 = vpack.c.bf16 %v5709_v40, %v5702_v37  ;;  %v7063_v40 = vand.u32 4294901760, %v16012_v45 }
 0x5f2   : > { %13575 = vmatprep.subr.mxu1 %v15276_v38  ;;  %v14637_v61 = vpack.c.bf16 %v5712_v56, %v5705_v55 }
 0x5f8   : > { %13573 = vmatmul.mubr.f32.vlgmr.msra.gmra.mrb[8].mxu1 %v4286_v53 }
 0x5f9   : > { %13576 = vmatpush3.xpose.msra.mxu1 %v4221_v62  ;;  %13577 = vmatprep.mubr.msk.f32.mxu1 %vm15275_vm1, %v15276_v38  ;;  %v5719_v62 = vand.u32 4294901760, %v5718_v57 }
 0x5fa   : > { %13580 = vmatprep.subr.mxu1 %v15276_v38 }
 0x600   : > { %13578 = vmatmul.mubr.f32.vlgmr.msra.gmra.mrb[8].mxu1 %v4286_v53  ;;  %v5724_v53 = vand.u32 4294901760, %v5723_v19 }
 0x601   : > { %13581 = vmatpush3.msra.mxu1 %v4681_v3  ;;  %13582 = vmatprep.mubr.msk.f32.mxu1 %vm15275_vm1, %v15276_v38 }
 0x602   : > { %13585 = vmatprep.subr.mxu1 %v15276_v38  ;;  %v5725_v59 = vsub.f32 %v5723_v19, %v5724_v53 }
 0x604   : > { %v5726_v63 = vand.u32 4294901760, %v5725_v59 }
 0x606   : > { %v14640_v0 = vpack.c.bf16 %v5726_v63, %v5719_v62 }
 0x6d3   : > { %v4662_v5 = vpop.f32.mrb[8].mxu1 }
 0x6d4   : > { %v13579_v6 = vpop.f32.mrb[9].mxu1  ;;  %v4666_v7 = vsel %vm2283_vm3, %v4662_v5, -inf }
 0x6d5   : > { %4667 = vmax.xlane.f32.xlu0 %v4666_v7 }
 0x762   : > { %v4668_v8 = vpop.xlane.xlu0 %4667 }
 0x763   : > { %v4669_v58 = vsub.f32 %v4662_v5, %v4668_v8  ;;  %v9907_v5 = vand.u32 4294901760, %v16084_v49 }
 0x765   : > { %v4670_v9 = vmul.f32 1.442695, %v4669_v58  ;;  %v10017_v6 = vsub.f32 %v16084_v49, %v9907_v5 }
 0x767   : > { %15198 = vpow2.f32 %v4670_v9  ;;  %v10018_v8 = vand.u32 4294901760, %v10017_v6 }
 0x771   : > { %v15199_v10 = vpop.eup %15198 }
 0x772   : > { %v4672_v11 = vsel %vm2283_vm3, %v15199_v10, 0.0 }
 0x773   : > { %4673 = vadd.xlane.f32.xlu1 %v4672_v11 }
 0x800   : > { %v4674_v12 = vpop.xlane.xlu1 %4673 }
 0x801   : > { %15200 = vrcp.f32 %v4674_v12  ;;  %v10019_v12 = vsub.f32 %v10017_v6, %v10018_v8 }
 0x80b   : > { %v15201_v13 = vpop.eup %15200 }
 0x80c   : > { %v4676_v16 = vmul.f32 %v15201_v13, %v15199_v10 }
 0x80e   : > { %v4678_v17 = vsel %vm2283_vm3, %v4676_v16, 0 }
 0x80f   : > { %v4746_v20 = vand.u32 4294901760, %v4678_v17 }
 0x811   : > { %v4747_v22 = vsub.f32 %v4678_v17, %v4746_v20 }
 0x813   : > { %v4748_v26 = vand.u32 4294901760, %v4747_v22 }
 0x815   : > { %v4749_v28 = vsub.f32 %v4747_v22, %v4748_v26 }
 0x817   : > { %v4750_v29 = vand.u32 4294901760, %v4749_v28 }
 0x819   : > { %13583 = vmatmul.mubr.f32.vlgmr.msra.gmra.mrb[10].mxu1 %v4750_v29 }
 0x81a   : > { %13586 = vmatpush3.msra.mxu1 %v4761_v30  ;;  %13587 = vmatprep.mubr.msk.f32.mxu1 %vm15275_vm1, %v15276_v38 }
 0x81b   : > { %13590 = vmatprep.subr.mxu1 %v15276_v38 }
 0x821   : > { %13588 = vmatmul.mubr.f32.vlgmr.msra.gmra.mrb[10].mxu1 %v4746_v20 }
 0x822   : > { %13591 = vmatpush3.msra.mxu1 %v4758_v14  ;;  %13592 = vmatprep.mubr.msk.f32.mxu1 %vm15275_vm1, %v15276_v38 }
 0x823   : > { %13595 = vmatprep.subr.mxu1 %v15276_v38 }
 0x829   : > { %13593 = vmatmul.mubr.f32.vlgmr.msra.gmra.mrb[10].mxu1 %v4747_v22  ;;  %v6597_v22 = vsel %vm1830_vm2, %v16010_v15, 0 }
 0x82a   : > { %13596 = vmatpush3.msra.mxu1 %v4681_v3  ;;  %13597 = vmatprep.mubr.msk.f32.mxu1 %vm15275_vm1, %v15276_v38 }
 0x82b   : > { %13600 = vmatprep.subr.mxu1 %v15276_v38 }
 0x831   : > { %13598 = vmatmul.mubr.f32.vlgmr.msra.gmra.mrb[10].mxu1 %v4748_v26  ;;  %v6668_v26 = vand.u32 4294901760, %v6597_v22 }
 0x832   : > { %13601 = vmatpush3.msra.mxu1 %v4759_v21  ;;  %13602 = vmatprep.mubr.msk.f32.mxu1 %vm15275_vm1, %v15276_v38 }
 0x833   : > { %13605 = vmatprep.subr.mxu1 %v15276_v38  ;;  %v6669_v27 = vsub.f32 %v6597_v22, %v6668_v26 }
 0x835   : > { %v6670_v28 = vand.u32 4294901760, %v6669_v27 }
 0x837   : > { %v6671_v30 = vsub.f32 %v6669_v27, %v6670_v28 }
 0x839   : > { %13603 = vmatmul.mubr.f32.vlgmr.msra.gmra.mrb[10].mxu1 %v4746_v20  ;;  %v6672_v60 = vand.u32 4294901760, %v6671_v30 }
 0x83a   : > { %13606 = vmatpush3.msra.mxu1 %v4681_v3  ;;  %13607 = vmatprep.mubr.msk.f32.mxu1 %vm15275_vm1, %v15276_v38  ;;  %v14658_v3 = vpack.c.bf16 %v5724_v53, %v5717_v52  ;;  %v7140_v53 = vsub.f32 %v16012_v45, %v7063_v40  ;;  %v12499_v45 = vld [vmem:[%s16628_s4 + $0x60] sm:$0xff] }
 0x83b   : > { %14630 = vmatprep.subr.bf16.mxu1 %v15274_v18 }
 0x83c   : > { %v7141_v57 = vand.u32 4294901760, %v7140_v53 }
 0x83e   : > { %v7142_v62 = vsub.f32 %v7140_v53, %v7141_v57 }
 0x841   : > { %13608 = vmatmul.mubr.f32.vlgmr.msra.gmra.mrb[10].mxu1 %v4746_v20  ;;  %v10020_v20 = vand.u32 4294901760, %v10019_v12 }
 0x842   : > { %14632 = vmatpush3.bf16.msra.mxu1 %v14631_v32  ;;  %13684 = vmatprep.mubr.msk.f32.mxu1 %vm15275_vm1, %v15276_v38 }
 0x843   : > { %14633 = vmatprep.subr.bf16.mxu1 %v15274_v18 }
 0x846   : > { %14635 = vmatpush3.bf16.msra.mxu1 %v14634_v54 }
 0x847   : > { %14636 = vmatprep.subr.bf16.mxu1 %v15274_v18 }
 0x849   : > { %13685 = vmatmul.mubr.f32.vlgmr.msra.gmra.mrb[12].mxu1 %v15495_v4 }
 0x84a   : > { %14638 = vmatpush3.bf16.msra.mxu1 %v14637_v61  ;;  %13695 = vmatprep.mubr.msk.f32.mxu1 %vm15275_vm1, %v15276_v38 }
 0x84b   : > { %14639 = vmatprep.subr.bf16.mxu1 %v15274_v18 }
 0x84e   : > { %14641 = vmatpush3.bf16.msra.mxu1 %v14640_v0 }
 0x84f   : > { %14642 = vmatprep.subr.bf16.mxu1 %v15274_v18 }
 0x851   : > { %13696 = vmatmul.mubr.f32.vlgmr.msra.gmra.mrb[12].mxu1 %v15485_v23 }
 0x852   : > { %14644 = vmatpush3.bf16.msra.mxu1 %v14643_v1  ;;  %13706 = vmatprep.mubr.msk.f32.mxu1 %vm15275_vm1, %v15276_v38  ;;  %v7143_v1 = vand.u32 4294901760, %v7142_v62 }
 0x853   : > { %14645 = vmatprep.subr.bf16.mxu1 %v15274_v18 }
 0x856   : > { %14647 = vmatpush3.bf16.msra.mxu1 %v14646_v2  ;;  %v12500_v2 = vld [vmem:[%s16628_s4 + $0x68] sm:$0xff] }
 0x857   : > { %14648 = vmatprep.subr.bf16.mxu1 %v15274_v18 }
 0x859   : > { %13707 = vmatmul.mubr.f32.vlgmr.msra.gmra.mrb[12].mxu1 %v15488_v24 }
 0x85a   : > { %14650 = vmatpush3.bf16.msra.mxu1 %v14631_v32  ;;  %13717 = vmatprep.mubr.msk.f32.mxu1 %vm15275_vm1, %v15276_v38 }
 0x85b   : > { %14651 = vmatprep.subr.bf16.mxu1 %v15274_v18 }
 0x85e   : > { %14653 = vmatpush3.bf16.msra.mxu1 %v14634_v54 }
 0x85f   : > { %14654 = vmatprep.subr.bf16.mxu1 %v15274_v18 }
 0x861   : > { %13718 = vmatmul.mubr.f32.vlgmr.msra.gmra.mrb[12].mxu1 %v15491_v25 }
 0x862   : > { %14656 = vmatpush3.bf16.msra.mxu1 %v14655_v39  ;;  %13728 = vmatprep.mubr.msk.f32.mxu1 %vm15275_vm1, %v15276_v38  ;;  %v8004_v39 = vand.u32 4294901760, %v12499_v45 }
 0x863   : > { %14657 = vmatprep.subr.bf16.mxu1 %v15274_v18 }
 0x866   : > { %14659 = vmatpush3.bf16.msra.mxu1 %v14658_v3  ;;  %v8007_v3 = vand.u32 4294901760, %v12500_v2 }
 0x867   : > { %14660 = vmatprep.subr.bf16.mxu1 %v15274_v18 }
 0x869   : > { %13729 = vmatmul.mubr.f32.vlgmr.msra.gmra.mrb[12].mxu1 %v15485_v23 }
 0x86a   : > { %14662 = vmatpush3.bf16.msra.mxu1 %v14631_v32  ;;  %13739 = vmatprep.mubr.msk.f32.mxu1 %vm15275_vm1, %v15276_v38 }
 0x86b   : > { %14663 = vmatprep.subr.bf16.mxu1 %v15274_v18 }
 0x86e   : > { %14665 = vmatpush3.bf16.msra.mxu1 %v14634_v54 }
 0x86f   : > { %13808 = vmatprep.subr.mxu1 %v15276_v38 }
 0x871   : > { %13740 = vmatmul.mubr.f32.vlgmr.msra.gmra.mrb[12].mxu1 %v15485_v23 }
 0x872   : > { %13810 = vmatprep.mubr.msk.f32.mxu1 %vm15275_vm1, %v15276_v38 }
 0x914   : > { %v5122_v7 = vpop.f32.mrb[10].mxu1 }
 0x915   : > { %v9910_v58 = vand.u32 4294901760, %v5122_v7  ;;  %v13609_v9 = vpop.f32.mrb[11].mxu1 }
 0x917   : > { %v16174_v10 = vpack.c.bf16 %v9910_v58, %v9907_v5  ;;  %v10024_v11 = vsub.f32 %v5122_v7, %v9910_v58  ;;  %v12501_v5 = vld [vmem:[%s16628_s4 + $0x70] sm:$0xff]  ;;  %v8084_v7 = vsub.f32 %v12499_v45, %v8004_v39 }
 0x918   : > { %v8010_v58 = vand.u32 4294901760, %v12501_v5 }
 0x919   : > { %v10025_v13 = vand.u32 4294901760, %v10024_v11  ;;  %14811 = vmatprep.subr.bf16.mxu0 %v16174_v10  ;;  %v16177_v14 = vpack.c.bf16 %v10024_v11, %v10017_v6  ;;  %v12502_v6 = vld [vmem:[%s16628_s4 + $0x78] sm:$0xff] }
 0x91a   : > { %14813 = vmatpush3.bf16.msra.mxu0 %v16174_v10  ;;  %v8013_v9 = vand.u32 4294901760, %v12502_v6 }
 0x91b   : > { %v10026_v16 = vsub.f32 %v10024_v11, %v10025_v13  ;;  %v16180_v17 = vpack.c.bf16 %v10025_v13, %v10018_v8  ;;  %v8091_v8 = vsub.f32 %v12500_v2, %v8007_v3  ;;  %v8098_v11 = vsub.f32 %v12501_v5, %v8010_v58 }
 0x91c   : > { %v8105_v12 = vsub.f32 %v12502_v6, %v8013_v9  ;;  %v8085_v13 = vand.u32 4294901760, %v8084_v7 }
 0x91d   : > { %v10027_v49 = vand.u32 4294901760, %v10026_v16  ;;  %v8092_v16 = vand.u32 4294901760, %v8091_v8 }
 0x91f   : > { %v16182_v21 = vpack.c.bf16 %v10027_v49, %v10020_v20  ;;  %v14739_v20 = vpack.c.bf16 %v8007_v3, %v8004_v39  ;;  %v8086_v49 = vsub.f32 %v8084_v7, %v8085_v13  ;;  %v8093_v22 = vsub.f32 %v8091_v8, %v8092_v16 }
 0x921   : > { %v8094_v30 = vand.u32 4294901760, %v8093_v22 }
 0x944   : > { %v6102_v29 = vpop.f32.mrb[12].mxu1 }
 0x945   : > { %v6600_v43 = vsel %vm1830_vm2, %v6102_v29, 0  ;;  %v13741_v31 = vpop.f32.mrb[13].mxu1  ;;  %v8087_v29 = vand.u32 4294901760, %v8086_v49 }
 0x946   : > { %v6603_v33 = vand.u32 4294901760, %v6600_v43 }
 0x948   : > { %v6680_v34 = vsub.f32 %v6600_v43, %v6603_v33  ;;  %13809 = vmatpush3.xpose.msra.mxu1 %v6603_v33 }
 0x949   : > { %13813 = vmatprep.subr.mxu1 %v15276_v38 }
 0x94a   : > { %v6681_v36 = vand.u32 4294901760, %v6680_v34 }
 0x94b   : > { %13811 = vmatmul.mubr.f32.vlgmr.msra.gmra.mrb[14].mxu1 %v6672_v60 }
 0x94c   : > { %v6682_v37 = vsub.f32 %v6680_v34, %v6681_v36  ;;  %13815 = vmatprep.mubr.msk.f32.mxu1 %vm15275_vm1, %v15276_v38 }
 0x94e   : > { %v6683_v15 = vand.u32 4294901760, %v6682_v37  ;;  %v14751_v37 = vpack.c.bf16 %v8091_v8, %v8084_v7 }
 0x950   : > { %13814 = vmatpush3.xpose.msra.mxu1 %v6683_v15  ;;  %v14754_v15 = vpack.c.bf16 %v8105_v12, %v8098_v11 }
 0x951   : > { %13818 = vmatprep.subr.mxu1 %v15276_v38 }
 0x953   : > { %13816 = vmatmul.mubr.f32.vlgmr.msra.gmra.mrb[14].mxu1 %v6668_v26 }
 0x954   : > { %13819 = vmatpush3.xpose.msra.mxu1 %v6680_v34  ;;  %13820 = vmatprep.mubr.msk.f32.mxu1 %vm15275_vm1, %v15276_v38 }
 0x955   : > { %13823 = vmatprep.subr.mxu1 %v15276_v38 }
 0x95b   : > { %13821 = vmatmul.mubr.f32.vlgmr.msra.gmra.mrb[14].mxu1 %v6669_v27  ;;  %v8106_v27 = vand.u32 4294901760, %v8105_v12 }
 0x95c   : > { %13824 = vmatpush3.xpose.msra.mxu1 %v6603_v33  ;;  %13825 = vmatprep.mubr.msk.f32.mxu1 %vm15275_vm1, %v15276_v38 }
 0x95d   : > { %13828 = vmatprep.subr.mxu1 %v15276_v38  ;;  %v8107_v31 = vsub.f32 %v8105_v12, %v8106_v27 }
 0x95f   : > { %v8108_v60 = vand.u32 4294901760, %v8107_v31  ;;  %v9893_v31 = vld [vmem:[%s16630_s6 + $0x18] sm:$0xff] }
 0x963   : > { %13826 = vmatmul.mubr.f32.vlgmr.msra.gmra.mrb[14].mxu1 %v6670_v28  ;;  %v14742_v28 = vpack.c.bf16 %v8013_v9, %v8010_v58 }
 0x964   : > { %13829 = vmatpush3.xpose.msra.mxu1 %v6681_v36  ;;  %13830 = vmatprep.mubr.msk.f32.mxu1 %vm15275_vm1, %v15276_v38 }
 0x965   : > { %13833 = vmatprep.subr.mxu1 %v15276_v38 }
 0x96b   : > { %13831 = vmatmul.mubr.f32.vlgmr.msra.gmra.mrb[14].mxu1 %v6668_v26 }
 0x96c   : > { %13834 = vmatpush3.xpose.msra.mxu1 %v6603_v33  ;;  %13835 = vmatprep.mubr.msk.f32.mxu1 %vm15275_vm1, %v15276_v38  ;;  %v14745_v33 = vpack.c.bf16 %v8094_v30, %v8087_v29  ;;  %v9892_v29 = vld [vmem:[%s16630_s6 + $0x10] sm:$0xff] }
 0x96d   : > { %13838 = vmatprep.subr.mxu1 %v15276_v38 }
 0x973   : > { %13836 = vmatmul.mubr.f32.vlgmr.msra.gmra.mrb[14].mxu1 %v6668_v26  ;;  %v8099_v26 = vand.u32 4294901760, %v8098_v11 }
 0x974   : > { %13839 = vmatpush3.msra.mxu1 %v7063_v40  ;;  %13840 = vmatprep.mubr.msk.f32.mxu1 %vm15275_vm1, %v15276_v38 }
 0x975   : > { %13843 = vmatprep.subr.mxu1 %v15276_v38  ;;  %v8100_v43 = vsub.f32 %v8098_v11, %v8099_v26 }
 0x977   : > { %v8101_v34 = vand.u32 4294901760, %v8100_v43  ;;  %v9901_v43 = vsel %vm329_vm0, %v9892_v29, 0 }
 0x979   : > { %v14748_v36 = vpack.c.bf16 %v8108_v60, %v8101_v34  ;;  %v16342_v34 = vand.u32 4294901760, %v9901_v43  ;;  %v9904_v60 = vsel %vm329_vm0, %v9893_v31, 0 }
 0xa46   : > { %v7044_v41 = vpop.f32.mrb[14].mxu1 }
 0xa47   : > { %v13837_v42 = vpop.f32.mrb[15].mxu1  ;;  %v7048_v44 = vsel %vm2283_vm3, %v7044_v41, -inf }
 0xa48   : > { %7049 = vmax.xlane.f32.xlu0 %v7048_v44 }
 0xad5   : > { %v7050_v19 = vpop.xlane.xlu0 %7049 }
 0xad6   : > { %v7051_v46 = vsub.f32 %v7044_v41, %v7050_v19  ;;  %v8979_v41 = vsel %vm1830_vm2, %v16015_v48, 0 }
 0xad7   : > { %v9050_v42 = vand.u32 4294901760, %v8979_v41 }
 0xad8   : > { %v7052_v47 = vmul.f32 1.442695, %v7051_v46 }
 0xad9   : > { %v9051_v44 = vsub.f32 %v8979_v41, %v9050_v42 }
 0xada   : > { %15202 = vpow2.f32 %v7052_v47 }
 0xadb   : > { %v9052_v19 = vand.u32 4294901760, %v9051_v44 }
 0xadd   : > { %v9053_v47 = vsub.f32 %v9051_v44, %v9052_v19 }
 0xae4   : > { %v15203_v32 = vpop.eup %15202 }
 0xae5   : > { %v7054_v35 = vsel %vm2283_vm3, %v15203_v32, 0.0 }
 0xae6   : > { %7055 = vadd.xlane.f32.xlu1 %v7054_v35 }
 0xb73   : > { %v7056_v51 = vpop.xlane.xlu1 %7055 }
 0xb74   : > { %15204 = vrcp.f32 %v7056_v51 }
 0xb7e   : > { %v15205_v52 = vpop.eup %15204 }
 0xb7f   : > { %v7058_v54 = vmul.f32 %v15205_v52, %v15203_v32 }
 0xb81   : > { %v7060_v55 = vsel %vm2283_vm3, %v7058_v54, 0 }
 0xb82   : > { %v7128_v56 = vand.u32 4294901760, %v7060_v55 }
 0xb84   : > { %v7129_v59 = vsub.f32 %v7060_v55, %v7128_v56  ;;  %v9445_v55 = vand.u32 4294901760, %v16017_v50 }
 0xb86   : > { %v7130_v61 = vand.u32 4294901760, %v7129_v59  ;;  %v9522_v39 = vsub.f32 %v16017_v50, %v9445_v55  ;;  %v9890_v50 = vld [vmem:[%s16630_s6] sm:$0xff] }
 0xb88   : > { %v7131_v63 = vsub.f32 %v7129_v59, %v7130_v61  ;;  %v9523_v7 = vand.u32 4294901760, %v9522_v39 }
 0xb8a   : > { %v7132_v0 = vand.u32 4294901760, %v7131_v63  ;;  %v9524_v9 = vsub.f32 %v9522_v39, %v9523_v7 }
 0xb8c   : > { %13841 = vmatmul.mubr.f32.vlgmr.msra.gmra.mrb[16].mxu1 %v7132_v0 }
 0xb8d   : > { %13844 = vmatpush3.msra.mxu1 %v7143_v1  ;;  %13845 = vmatprep.mubr.msk.f32.mxu1 %vm15275_vm1, %v15276_v38 }
 0xb8e   : > { %13848 = vmatprep.subr.mxu1 %v15276_v38 }
 0xb94   : > { %13846 = vmatmul.mubr.f32.vlgmr.msra.gmra.mrb[16].mxu1 %v7128_v56 }
 0xb95   : > { %13849 = vmatpush3.msra.mxu1 %v7140_v53  ;;  %13850 = vmatprep.mubr.msk.f32.mxu1 %vm15275_vm1, %v15276_v38 }
 0xb96   : > { %13853 = vmatprep.subr.mxu1 %v15276_v38 }
 0xb9c   : > { %13851 = vmatmul.mubr.f32.vlgmr.msra.gmra.mrb[16].mxu1 %v7129_v59 }
 0xb9d   : > { %13854 = vmatpush3.msra.mxu1 %v7063_v40  ;;  %13855 = vmatprep.mubr.msk.f32.mxu1 %vm15275_vm1, %v15276_v38 }
 0xb9e   : > { %13858 = vmatprep.subr.mxu1 %v15276_v38 }
 0xba4   : > { %13856 = vmatmul.mubr.f32.vlgmr.msra.gmra.mrb[16].mxu1 %v7130_v61 }
 0xba5   : > { %13859 = vmatpush3.msra.mxu1 %v7141_v57  ;;  %13860 = vmatprep.mubr.msk.f32.mxu1 %vm15275_vm1, %v15276_v38 }
 0xba6   : > { %13863 = vmatprep.subr.mxu1 %v15276_v38 }
 0xbac   : > { %13861 = vmatmul.mubr.f32.vlgmr.msra.gmra.mrb[16].mxu1 %v7128_v56 }
 0xbad   : > { %13864 = vmatpush3.msra.mxu1 %v7063_v40  ;;  %13865 = vmatprep.mubr.msk.f32.mxu1 %vm15275_vm1, %v15276_v38  ;;  %v14766_v40 = vpack.c.bf16 %v8106_v27, %v8099_v26 }
 0xbae   : > { %14738 = vmatprep.subr.bf16.mxu1 %v15274_v18 }
 0xbb4   : > { %13866 = vmatmul.mubr.f32.vlgmr.msra.gmra.mrb[16].mxu1 %v7128_v56 }
 0xbb5   : > { %14740 = vmatpush3.bf16.msra.mxu1 %v14739_v20  ;;  %13942 = vmatprep.mubr.msk.f32.mxu1 %vm15275_vm1, %v15276_v38 }
 0xbb6   : > { %14741 = vmatprep.subr.bf16.mxu1 %v15274_v18 }
 0xbb9   : > { %14743 = vmatpush3.bf16.msra.mxu1 %v14742_v28 }
 0xbba   : > { %14744 = vmatprep.subr.bf16.mxu1 %v15274_v18 }
 0xbbc   : > { %13943 = vmatmul.mubr.f32.vlgmr.msra.gmra.mrb[18].mxu1 %v15495_v4  ;;  %v14763_v4 = vpack.c.bf16 %v8092_v16, %v8085_v13  ;;  %v9525_v13 = vand.u32 4294901760, %v9524_v9  ;;  %v9895_v16 = vsel %vm329_vm0, %v9890_v50, 0 }
 0xbbd   : > { %14746 = vmatpush3.bf16.msra.mxu1 %v14745_v33  ;;  %13953 = vmatprep.mubr.msk.f32.mxu1 %vm15275_vm1, %v15276_v38 }
 0xbbe   : > { %14747 = vmatprep.subr.bf16.mxu1 %v15274_v18 }
 0xbc1   : > { %14749 = vmatpush3.bf16.msra.mxu1 %v14748_v36 }
 0xbc2   : > { %14750 = vmatprep.subr.bf16.mxu1 %v15274_v18 }
 0xbc4   : > { %13954 = vmatmul.mubr.f32.vlgmr.msra.gmra.mrb[18].mxu1 %v15485_v23 }
 0xbc5   : > { %14752 = vmatpush3.bf16.msra.mxu1 %v14751_v37  ;;  %13964 = vmatprep.mubr.msk.f32.mxu1 %vm15275_vm1, %v15276_v38 }
 0xbc6   : > { %14753 = vmatprep.subr.bf16.mxu1 %v15274_v18 }
 0xbc9   : > { %14755 = vmatpush3.bf16.msra.mxu1 %v14754_v15  ;;  %v16347_v15 = vand.u32 4294901760, %v9904_v60 }
 0xbca   : > { %14756 = vmatprep.subr.bf16.mxu1 %v15274_v18 }
 0xbcb   : > { %v10006_v41 = vsub.f32 %v9904_v60, %v16347_v15  ;;  %v12512_v60 = vld [vmem:[%s16631_s7 + $0x38] sm:$0xff] }
 0xbcc   : > { %13965 = vmatmul.mubr.f32.vlgmr.msra.gmra.mrb[18].mxu1 %v15488_v24 }
 0xbcd   : > { %14758 = vmatpush3.bf16.msra.mxu1 %v14739_v20  ;;  %13975 = vmatprep.mubr.msk.f32.mxu1 %vm15275_vm1, %v15276_v38 }
 0xbce   : > { %14759 = vmatprep.subr.bf16.mxu1 %v15274_v18 }
 0xbd1   : > { %14761 = vmatpush3.bf16.msra.mxu1 %v14742_v28 }
 0xbd2   : > { %14762 = vmatprep.subr.bf16.mxu1 %v15274_v18 }
 0xbd4   : > { %13976 = vmatmul.mubr.f32.vlgmr.msra.gmra.mrb[18].mxu1 %v15491_v25 }
 0xbd5   : > { %14764 = vmatpush3.bf16.msra.mxu1 %v14763_v4  ;;  %13986 = vmatprep.mubr.msk.f32.mxu1 %vm15275_vm1, %v15276_v38  ;;  %v9996_v4 = vsub.f32 %v9901_v43, %v16342_v34 }
 0xbd6   : > { %14765 = vmatprep.subr.bf16.mxu1 %v15274_v18 }
 0xbd9   : > { %14767 = vmatpush3.bf16.msra.mxu1 %v14766_v40 }
 0xbda   : > { %14768 = vmatprep.subr.bf16.mxu1 %v15274_v18 }
 0xbdc   : > { %13987 = vmatmul.mubr.f32.vlgmr.msra.gmra.mrb[18].mxu1 %v15485_v23 }
 0xbdd   : > { %14770 = vmatpush3.bf16.msra.mxu1 %v14739_v20  ;;  %13997 = vmatprep.mubr.msk.f32.mxu1 %vm15275_vm1, %v15276_v38  ;;  %v16320_v20 = vand.u32 4294901760, %v9895_v16 }
 0xbde   : > { %14771 = vmatprep.subr.bf16.mxu1 %v15274_v18 }
 0xbdf   : > { %v16323_v49 = vsub.f32 %v9895_v16, %v16320_v20 }
 0xbe1   : > { %14773 = vmatpush3.bf16.msra.mxu1 %v14742_v28  ;;  %v9977_v22 = vand.u32 4294901760, %v16323_v49  ;;  %v9891_v28 = vld [vmem:[%s16630_s6 + $0x8] sm:$0xff] }
 0xbe2   : > { %14066 = vmatprep.subr.mxu1 %v15276_v38  ;;  %v9898_v30 = vsel %vm329_vm0, %v9891_v28, 0 }
 0xbe3   : > { %v9978_v26 = vsub.f32 %v16323_v49, %v9977_v22  ;;  %v16340_v33 = vand.u32 4294901760, %v9898_v30 }
 0xbe4   : > { %13998 = vmatmul.mubr.f32.vlgmr.msra.gmra.mrb[18].mxu1 %v15485_v23  ;;  %v9054_v23 = vand.u32 4294901760, %v9053_v47 }
 0xbe5   : > { %14068 = vmatprep.mubr.msk.f32.mxu1 %vm15275_vm1, %v15276_v38  ;;  %v9979_v27 = vand.u32 4294901760, %v9978_v26  ;;  %v9986_v37 = vsub.f32 %v9898_v30, %v16340_v33 }
 0xbe7   : > { %14134 = vmatprep.mubr.f32.mxu0 %v9979_v27 }
 0xc87   : > { %v16270_v24 = vpop.f32.mrb[16].mxu1 }
 0xc88   : > { %v13867_v25 = vpop.f32.mrb[17].mxu1  ;;  %v9913_v36 = vand.u32 4294901760, %v16270_v24 }
 0xc89   : > { %v9987_v25 = vand.u32 4294901760, %v9986_v37 }
 0xc8a   : > { %v10031_v40 = vsub.f32 %v16270_v24, %v9913_v36 }
 0xcb7   : > { %v8484_v46 = vpop.f32.mrb[18].mxu1 }
 0xcb8   : > { %v8982_v32 = vsel %vm1830_vm2, %v8484_v46, 0  ;;  %v13999_v35 = vpop.f32.mrb[19].mxu1 }
 0xcb9   : > { %v8985_v51 = vand.u32 4294901760, %v8982_v32  ;;  %v10007_v35 = vand.u32 4294901760, %v10006_v41 }
 0xcbb   : > { %v9062_v52 = vsub.f32 %v8982_v32, %v8985_v51  ;;  %14067 = vmatpush3.xpose.msra.mxu1 %v8985_v51  ;;  %v9988_v32 = vsub.f32 %v9986_v37, %v9987_v25 }
 0xcbc   : > { %14071 = vmatprep.subr.mxu1 %v15276_v38 }
 0xcbd   : > { %v9063_v53 = vand.u32 4294901760, %v9062_v52 }
 0xcbe   : > { %14069 = vmatmul.mubr.f32.vlgmr.msra.gmra.mrb[20].mxu1 %v9054_v23 }
 0xcbf   : > { %v9064_v54 = vsub.f32 %v9062_v52, %v9063_v53  ;;  %14073 = vmatprep.mubr.msk.f32.mxu1 %vm15275_vm1, %v15276_v38 }
 0xcc1   : > { %v9065_v48 = vand.u32 4294901760, %v9064_v54 }
 0xcc3   : > { %14072 = vmatpush3.xpose.msra.mxu1 %v9065_v48  ;;  %v9989_v48 = vand.u32 4294901760, %v9988_v32 }
 0xcc4   : > { %14076 = vmatprep.subr.mxu1 %v15276_v38 }
 0xcc6   : > { %14074 = vmatmul.mubr.f32.vlgmr.msra.gmra.mrb[20].mxu1 %v9050_v42 }
 0xcc7   : > { %14077 = vmatpush3.xpose.msra.mxu1 %v9062_v52  ;;  %14078 = vmatprep.mubr.msk.f32.mxu1 %vm15275_vm1, %v15276_v38 }
 0xcc8   : > { %14081 = vmatprep.subr.mxu1 %v15276_v38 }
 0xcce   : > { %14079 = vmatmul.mubr.f32.vlgmr.msra.gmra.mrb[20].mxu1 %v9051_v44  ;;  %v10032_v44 = vand.u32 4294901760, %v10031_v40 }
 0xccf   : > { %14082 = vmatpush3.xpose.msra.mxu1 %v8985_v51  ;;  %14083 = vmatprep.mubr.msk.f32.mxu1 %vm15275_vm1, %v15276_v38 }
 0xcd0   : > { %14086 = vmatprep.subr.mxu1 %v15276_v38 }
 0xcd6   : > { %14084 = vmatmul.mubr.f32.vlgmr.msra.gmra.mrb[20].mxu1 %v9052_v19 }
 0xcd7   : > { %14087 = vmatpush3.xpose.msra.mxu1 %v9063_v53  ;;  %14088 = vmatprep.mubr.msk.f32.mxu1 %vm15275_vm1, %v15276_v38  ;;  %v10033_v53 = vsub.f32 %v10031_v40, %v10032_v44 }
 0xcd8   : > { %14091 = vmatprep.subr.mxu1 %v15276_v38 }
 0xcde   : > { %14089 = vmatmul.mubr.f32.vlgmr.msra.gmra.mrb[20].mxu1 %v9050_v42 }
 0xcdf   : > { %14092 = vmatpush3.xpose.msra.mxu1 %v8985_v51  ;;  %14093 = vmatprep.mubr.msk.f32.mxu1 %vm15275_vm1, %v15276_v38 }
 0xce0   : > { %14096 = vmatprep.subr.mxu1 %v15276_v38 }
 0xce6   : > { %14094 = vmatmul.mubr.f32.vlgmr.msra.gmra.mrb[20].mxu1 %v9050_v42  ;;  %v9997_v42 = vand.u32 4294901760, %v9996_v4 }
 0xce7   : > { %14097 = vmatpush3.msra.mxu1 %v9445_v55  ;;  %14098 = vmatprep.mubr.msk.f32.mxu1 %vm15275_vm1, %v15276_v38 }
 0xce8   : > { %14101 = vmatprep.subr.mxu1 %v15276_v38  ;;  %v9998_v51 = vsub.f32 %v9996_v4, %v9997_v42 }
 0xcea   : > { %v9999_v24 = vand.u32 4294901760, %v9998_v51 }
 0xdb9   : > { %v9426_v56 = vpop.f32.mrb[20].mxu1 }
 0xdba   : > { %v14095_v57 = vpop.f32.mrb[21].mxu1  ;;  %v9430_v59 = vsel %vm2283_vm3, %v9426_v56, -inf }
 0xdbb   : > { %9431 = vmax.xlane.f32.xlu0 %v9430_v59 }
 0xe48   : > { %v9432_v61 = vpop.xlane.xlu0 %9431 }
 0xe49   : > { %v9433_v62 = vsub.f32 %v9426_v56, %v9432_v61 }
 0xe4b   : > { %v9434_v63 = vmul.f32 1.442695, %v9433_v62  ;;  %v10034_v62 = vand.u32 4294901760, %v10033_v53 }
 0xe4d   : > { %15206 = vpow2.f32 %v9434_v63 }
 0xe57   : > { %v15207_v0 = vpop.eup %15206 }
 0xe58   : > { %v9436_v1 = vsel %vm2283_vm3, %v15207_v0, 0.0 }
 0xe59   : > { %9437 = vadd.xlane.f32.xlu1 %v9436_v1 }
 0xee6   : > { %v9438_v45 = vpop.xlane.xlu1 %9437 }
 0xee7   : > { %15208 = vrcp.f32 %v9438_v45 }
 0xef1   : > { %v15209_v2 = vpop.eup %15208 }
 0xef2   : > { %v9440_v3 = vmul.f32 %v15209_v2, %v15207_v0 }
 0xef4   : > { %v9442_v5 = vsel %vm2283_vm3, %v9440_v3, 0 }
 0xef5   : > { %v9510_v6 = vand.u32 4294901760, %v9442_v5 }
 0xef7   : > { %v9511_v8 = vsub.f32 %v9442_v5, %v9510_v6 }
 0xef9   : > { %v9512_v58 = vand.u32 4294901760, %v9511_v8 }
 0xefb   : > { %v9513_v11 = vsub.f32 %v9511_v8, %v9512_v58 }
 0xefd   : > { %v9514_v12 = vand.u32 4294901760, %v9513_v11 }
 0xeff   : > { %14099 = vmatmul.mubr.f32.vlgmr.msra.gmra.mrb[22].mxu1 %v9514_v12 }
 0xf00   : > { %14102 = vmatpush3.msra.mxu1 %v9525_v13  ;;  %14103 = vmatprep.mubr.msk.f32.mxu1 %vm15275_vm1, %v15276_v38 }
 0xf01   : > { %14106 = vmatprep.subr.mxu1 %v15276_v38 }
 0xf07   : > { %14104 = vmatmul.mubr.f32.vlgmr.msra.gmra.mrb[22].mxu1 %v9510_v6 }
 0xf08   : > { %14107 = vmatpush3.msra.mxu1 %v9522_v39  ;;  %14108 = vmatprep.mubr.msk.f32.mxu1 %vm15275_vm1, %v15276_v38 }
 0xf09   : > { %14111 = vmatprep.subr.mxu1 %v15276_v38 }
 0xf0f   : > { %14109 = vmatmul.mubr.f32.vlgmr.msra.gmra.mrb[22].mxu1 %v9511_v8 }
 0xf10   : > { %14112 = vmatpush3.msra.mxu1 %v9445_v55  ;;  %14113 = vmatprep.mubr.msk.f32.mxu1 %vm15275_vm1, %v15276_v38 }
 0xf11   : > { %14116 = vmatprep.subr.mxu1 %v15276_v38 }
 0xf17   : > { %14114 = vmatmul.mubr.f32.vlgmr.msra.gmra.mrb[22].mxu1 %v9512_v58 }
 0xf18   : > { %14117 = vmatpush3.msra.mxu1 %v9523_v7  ;;  %14118 = vmatprep.mubr.msk.f32.mxu1 %vm15275_vm1, %v15276_v38  ;;  %v12508_v7 = vld [vmem:[%s16631_s7 + $0x18] sm:$0xff] }
 0xf19   : > { %14121 = vmatprep.subr.mxu1 %v15276_v38  ;;  %v10532_v58 = vand.u32 4294901760, %v12508_v7 }
 0xf1b   : > { %v16402_v13 = vsub.f32 %v12508_v7, %v10532_v58 }
 0xf1f   : > { %14119 = vmatmul.mubr.f32.vlgmr.msra.gmra.mrb[22].mxu1 %v9510_v6 }
 0xf20   : > { %14122 = vmatpush3.msra.mxu1 %v9445_v55  ;;  %14123 = vmatprep.mubr.msk.f32.mxu1 %vm15275_vm1, %v15276_v38  ;;  %v10008_v55 = vsub.f32 %v10006_v41, %v10007_v35 }
 0xf21   : > { %14858 = vmatprep.subr.bf16.mxu1 %v15274_v18 }
 0xf22   : > { %v10009_v61 = vand.u32 4294901760, %v10008_v55 }
 0xf27   : > { %14124 = vmatmul.mubr.f32.vlgmr.msra.gmra.mrb[22].mxu1 %v9510_v6  ;;  %v12507_v6 = vld [vmem:[%s16631_s7 + $0x10] sm:$0xff] }
 0xf28   : > { %14214 = vmatprep.mubr.msk.f32.mxu1 %vm15275_vm1, %v15276_v38  ;;  %v10529_v8 = vand.u32 4294901760, %v12507_v6 }
 0xf2a   : > { %v16400_v12 = vsub.f32 %v12507_v6, %v10529_v8 }
 0xf2c   : > { %v10608_v16 = vand.u32 4294901760, %v16400_v12  ;;  %v14865_v43 = vpack.c.bf16 %v16402_v13, %v16400_v12 }
 0xffa   : > { %v9886_v19 = vpop.f32.mrb[22].mxu1 }
 0xffb   : > { %v9916_v46 = vand.u32 4294901760, %v9886_v19  ;;  %v14125_v47 = vpop.f32.mrb[23].mxu1 }
 0xffd   : > { %v14814_v52 = vpack.c.bf16 %v9916_v46, %v9913_v36  ;;  %v10038_v23 = vsub.f32 %v9886_v19, %v9916_v46 }
 0xfff   : > { %v10039_v54 = vand.u32 4294901760, %v10038_v23  ;;  %14815 = vmatprep.subr.bf16.mxu0 %v14814_v52  ;;  %v14830_v56 = vpack.c.bf16 %v10038_v23, %v10031_v40 }
0x1000   : > { %14817 = vmatpush3.bf16.msra.mxu0 %v14814_v52 }
0x1001   : > { %v10040_v57 = vsub.f32 %v10038_v23, %v10039_v54  ;;  %14819 = vmatprep.subr.bf16.mxu0 %v16182_v21  ;;  %v14846_v59 = vpack.c.bf16 %v10039_v54, %v10032_v44 }
0x1003   : > { %14135 = vmatmul.mubr.f32.vlgmr.msra.gmra.mrb[16].mxu0 %v9989_v48  ;;  %v10041_v63 = vand.u32 4294901760, %v10040_v57 }
0x1004   : > { %14821 = vmatpush3.bf16.msra.mxu0 %v16182_v21  ;;  %14137 = vmatprep.mubr.f32.mxu0 %v9999_v24 }
0x1005   : > { %v14822_v0 = vpack.c.bf16 %v10041_v63, %v10034_v62  ;;  %v10521_v62 = vld [vmem:[%s16631_s7 + $0x8] sm:$0xff] }
0x1007   : > { %14138 = vmatmul.mubr.f32.gmra.mrb[18].mxu0 %v10009_v61  ;;  %14823 = vmatprep.subr.bf16.mxu0 %v14822_v0  ;;  %v10520_v61 = vld [vmem:[%s16631_s7] sm:$0xff] }
0x1008   : > { %14825 = vmatpush3.bf16.msra.mxu0 %v14822_v0  ;;  %14148 = vmatprep.mubr.f32.mxu0 %v16320_v20 }
0x1009   : > { %14827 = vmatprep.subr.bf16.mxu0 %v16177_v14 }
0x100b   : > { %14149 = vmatmul.mubr.f32.vlgmr.msra.gmra.mrb[16].mxu0 %v16340_v33 }
0x100c   : > { %14829 = vmatpush3.bf16.msra.mxu0 %v16177_v14  ;;  %14151 = vmatprep.mubr.f32.mxu0 %v16342_v34  ;;  %v12510_v14 = vld [vmem:[%s16631_s7 + $0x28] sm:$0xff] }
0x100d   : > { %14831 = vmatprep.subr.bf16.mxu0 %v14830_v56  ;;  %v11459_v21 = vand.u32 4294901760, %v12510_v14 }
0x100f   : > { %14152 = vmatmul.mubr.f32.gmra.mrb[18].mxu0 %v16347_v15  ;;  %v16388_v45 = vsub.f32 %v12510_v14, %v11459_v21  ;;  %v10994_v14 = vand.u32 4294901760, %v10521_v62 }
0x1010   : > { %14833 = vmatpush3.bf16.msra.mxu0 %v14830_v56  ;;  %14162 = vmatprep.mubr.f32.mxu0 %v16323_v49  ;;  %v16406_v49 = vpack.c.bf16 %v10532_v58, %v10529_v8 }
0x1011   : > { %14835 = vmatprep.subr.bf16.mxu0 %v16174_v10  ;;  %v11542_v39 = vand.u32 4294901760, %v16388_v45 }
0x1012   : > { %14860 = vmatpush3.bf16.msra.mxu1 %v16406_v49 }
0x1013   : > { %14163 = vmatmul.mubr.f32.vlgmr.msra.gmra.mrb[16].mxu0 %v9986_v37  ;;  %v11543_v5 = vsub.f32 %v16388_v45, %v11542_v39  ;;  %14861 = vmatprep.subr.bf16.mxu1 %v15274_v18 }
0x1014   : > { %14837 = vmatpush3.bf16.msra.mxu0 %v16174_v10  ;;  %14165 = vmatprep.mubr.f32.mxu0 %v9996_v4 }
0x1015   : > { %14839 = vmatprep.subr.bf16.mxu0 %v14814_v52  ;;  %v11544_v11 = vand.u32 4294901760, %v11543_v5 }
0x1017   : > { %14166 = vmatmul.mubr.f32.gmra.mrb[18].mxu0 %v10006_v41 }
0x1018   : > { %14841 = vmatpush3.bf16.msra.mxu0 %v14814_v52  ;;  %14176 = vmatprep.mubr.f32.mxu0 %v9977_v22  ;;  %v10609_v22 = vsub.f32 %v16400_v12, %v10608_v16 }
0x1019   : > { %14843 = vmatprep.subr.bf16.mxu0 %v16180_v17 }
0x101a   : > { %v10610_v28 = vand.u32 4294901760, %v10609_v22 }
0x101b   : > { %14177 = vmatmul.mubr.f32.vlgmr.msra.gmra.mrb[16].mxu0 %v9987_v25 }
0x101c   : > { %14845 = vmatpush3.bf16.msra.mxu0 %v16180_v17  ;;  %14179 = vmatprep.mubr.f32.mxu0 %v9997_v42 }
0x101d   : > { %14847 = vmatprep.subr.bf16.mxu0 %v14846_v59 }
0x101f   : > { %14180 = vmatmul.mubr.f32.gmra.mrb[18].mxu0 %v10007_v35 }
0x1020   : > { %14849 = vmatpush3.bf16.msra.mxu0 %v14846_v59  ;;  %14190 = vmatprep.mubr.f32.mxu0 %v16320_v20 }
0x1021   : > { %14851 = vmatprep.subr.bf16.mxu0 %v16174_v10 }
0x1023   : > { %14191 = vmatmul.mubr.f32.vlgmr.msra.gmra.mrb[16].mxu0 %v16340_v33 }
0x1024   : > { %14853 = vmatpush3.bf16.msra.mxu0 %v16174_v10  ;;  %14193 = vmatprep.mubr.f32.mxu0 %v16342_v34  ;;  %v12509_v10 = vld [vmem:[%s16631_s7 + $0x20] sm:$0xff] }
0x1025   : > { %14855 = vmatprep.subr.bf16.mxu0 %v14814_v52  ;;  %v11456_v17 = vand.u32 4294901760, %v12509_v10 }
0x1027   : > { %14194 = vmatmul.mubr.f32.gmra.mrb[18].mxu0 %v16347_v15  ;;  %v16386_v1 = vsub.f32 %v12509_v10, %v11456_v17  ;;  %v16411_v27 = vpack.c.bf16 %v11459_v21, %v11456_v17  ;;  %v10991_v10 = vand.u32 4294901760, %v10520_v61 }
0x1028   : > { %14857 = vmatpush3.bf16.msra.mxu0 %v14814_v52  ;;  %14204 = vmatprep.mubr.f32.mxu0 %v16320_v20  ;;  %v10615_v20 = vand.u32 4294901760, %v16402_v13 }
0x1029   : > { %14897 = vmatprep.subr.bf16.mxu0 %v15274_v18  ;;  %v11535_v2 = vand.u32 4294901760, %v16386_v1 }
0x102a   : > { %v10616_v26 = vsub.f32 %v16402_v13, %v10615_v20  ;;  %v16417_v31 = vpack.c.bf16 %v10615_v20, %v10608_v16  ;;  %v14877_v16 = vpack.c.bf16 %v10994_v14, %v10991_v10 }
0x102b   : > { %14205 = vmatmul.mubr.f32.vlgmr.msra.gmra.mrb[16].mxu0 %v16340_v33  ;;  %v11536_v3 = vsub.f32 %v16386_v1, %v11535_v2  ;;  %v14901_v33 = vpack.c.bf16 %v16388_v45, %v16386_v1  ;;  %v16427_v36 = vpack.c.bf16 %v11542_v39, %v11535_v2  ;;  %v11069_v39 = vsub.f32 %v10520_v61, %v10991_v10 }
0x102c   : > { %14207 = vmatprep.mubr.f32.mxu0 %v16342_v34  ;;  %v10617_v29 = vand.u32 4294901760, %v10616_v26  ;;  %v12511_v34 = vld [vmem:[%s16631_s7 + $0x30] sm:$0xff] }
0x102d   : > { %v11537_v9 = vand.u32 4294901760, %v11536_v3  ;;  %v11922_v37 = vand.u32 4294901760, %v12511_v34  ;;  %v11076_v3 = vsub.f32 %v10521_v62, %v10994_v14  ;;  %v11070_v8 = vand.u32 4294901760, %v11069_v39 }
0x102e   : > { %v14862_v30 = vpack.c.bf16 %v10617_v29, %v10610_v28 }
0x102f   : > { %14208 = vmatmul.mubr.f32.gmra.mrb[18].mxu0 %v16347_v15  ;;  %v14898_v50 = vpack.c.bf16 %v11544_v11, %v11537_v9  ;;  %v11925_v15 = vand.u32 4294901760, %v12512_v60  ;;  %v16429_v4 = vsub.f32 %v12511_v34, %v11922_v37  ;;  %v11077_v58 = vand.u32 4294901760, %v11076_v3 }
0x1030   : > { %14305 = vmatprep.mubr.msk.f32.mxu0 %vm15275_vm1, %v15276_v38  ;;  %v11071_v12 = vsub.f32 %v11069_v39, %v11070_v8 }
0x1031   : > { %14899 = vmatpush3.bf16.msra.mxu0 %v14898_v50  ;;  %v16431_v40 = vsub.f32 %v12512_v60, %v11925_v15  ;;  %v12001_v25 = vand.u32 4294901760, %v16429_v4  ;;  %v16480_v6 = vpack.c.bf16 %v11925_v15, %v11922_v37  ;;  %v11078_v13 = vsub.f32 %v11076_v3, %v11077_v58 }
0x1032   : > { %14903 = vmatprep.subr.bf16.mxu0 %v15274_v18  ;;  %v11072_v20 = vand.u32 4294901760, %v11071_v12 }
0x1033   : > { %v12008_v41 = vand.u32 4294901760, %v16431_v40  ;;  %v12002_v53 = vsub.f32 %v16429_v4, %v12001_v25  ;;  %v11079_v22 = vand.u32 4294901760, %v11078_v13  ;;  %v14919_v1 = vpack.c.bf16 %v16431_v40, %v16429_v4 }
0x1035   : > { %v16435_v42 = vpack.c.bf16 %v12008_v41, %v12001_v25  ;;  %v12009_v54 = vsub.f32 %v16431_v40, %v12008_v41  ;;  %v12003_v57 = vand.u32 4294901760, %v12002_v53  ;;  %v14880_v28 = vpack.c.bf16 %v11079_v22, %v11072_v20 }
0x1037   : > { %v12010_v59 = vand.u32 4294901760, %v12009_v54 }
0x1039   : > { %v14916_v17 = vpack.c.bf16 %v12010_v59, %v12003_v57 }
0x10fe   : > { %v14206_v44 = vpop.f32.mrb[16].mxu0 }
0x10ff   : > { %v10526_v19 = vsel %vm1830_vm2, %v14206_v44, 0  ;;  %v10498_v46 = vpop.f32.mrb[17].mxu0 }
0x1100   : > { %v16438_v47 = vand.u32 4294901760, %v10526_v19  ;;  %v10988_v21 = vsel %vm1830_vm2, %v10498_v46, 0 }
0x1101   : > { %v16476_v5 = vand.u32 4294901760, %v10988_v21 }
0x1102   : > { %v10596_v32 = vsub.f32 %v10526_v19, %v16438_v47  ;;  %v14209_v35 = vpop.f32.mrb[18].mxu0 }
0x1103   : > { %v10510_v51 = vpop.f32.mrb[19].mxu0  ;;  %v11919_v0 = vsel %vm1830_vm2, %v14209_v35, 0  ;;  %v11058_v9 = vsub.f32 %v10988_v21, %v16476_v5 }
0x1104   : > { %v10597_v52 = vand.u32 4294901760, %v10596_v32  ;;  %v11453_v23 = vsel %vm1830_vm2, %v10510_v51, 0  ;;  %v16468_v2 = vand.u32 4294901760, %v11919_v0 }
0x1105   : > { %v16444_v48 = vand.u32 4294901760, %v11453_v23  ;;  %v11059_v50 = vand.u32 4294901760, %v11058_v9 }
0x1106   : > { %v10598_v55 = vsub.f32 %v10596_v32, %v10597_v52  ;;  %v16483_v7 = vsub.f32 %v11919_v0, %v16468_v2 }
0x1107   : > { %v16447_v56 = vsub.f32 %v11453_v23, %v16444_v48  ;;  %14306 = vmatmul.mubr.f32.vlgmr.msra.gmra.mrb[20].mxu0 %v16444_v48  ;;  %v11060_v26 = vsub.f32 %v11058_v9, %v11059_v50 }
0x1108   : > { %v10599_v24 = vand.u32 4294901760, %v10598_v55  ;;  %14905 = vmatpush3.bf16.msra.mxu0 %v16411_v27  ;;  %14319 = vmatprep.mubr.msk.f32.mxu0 %vm15275_vm1, %v15276_v38  ;;  %v11990_v11 = vand.u32 4294901760, %v16483_v7 }
0x1109   : > { %v11524_v63 = vand.u32 4294901760, %v16447_v56  ;;  %14909 = vmatprep.subr.bf16.mxu0 %v15274_v18  ;;  %v11061_v29 = vand.u32 4294901760, %v11060_v26 }
0x110a   : > { %14215 = vmatmul.mubr.f32.vlgmr.msra.gmra.mrb[24].mxu1 %v10599_v24 }
0x110b   : > { %14863 = vmatpush3.bf16.msra.mxu1 %v14862_v30  ;;  %14320 = vmatmul.mubr.f32.vlgmr.msra.gmra.mrb[22].mxu0 %v11524_v63  ;;  %v14889_v30 = vpack.c.bf16 %v11077_v58, %v11070_v8 }
0x110c   : > { %14911 = vmatpush3.bf16.msra.mxu0 %v16411_v27  ;;  %14221 = vmatprep.mubr.msk.f32.mxu1 %vm15275_vm1, %v15276_v38 }
0x110d   : > { %14864 = vmatprep.subr.bf16.mxu1 %v15274_v18  ;;  %14333 = vmatprep.mubr.msk.f32.mxu0 %vm15275_vm1, %v15276_v38 }
0x110e   : > { %14222 = vmatmul.mubr.f32.vlgmr.msra.gmra.mrb[26].mxu1 %v16438_v47  ;;  %14915 = vmatprep.subr.bf16.mxu0 %v15274_v18 }
0x110f   : > { %14866 = vmatpush3.bf16.msra.mxu1 %v14865_v43  ;;  %14334 = vmatmul.mubr.f32.vlgmr.msra.gmra.mrb[24].mxu0 %v16444_v48  ;;  %v11525_v43 = vsub.f32 %v16447_v56, %v11524_v63 }
0x1110   : > { %14917 = vmatpush3.bf16.msra.mxu0 %v14916_v17  ;;  %14228 = vmatprep.mubr.msk.f32.mxu1 %vm15275_vm1, %v15276_v38 }
0x1111   : > { %14867 = vmatprep.subr.bf16.mxu1 %v15274_v18  ;;  %14347 = vmatprep.mubr.msk.f32.mxu0 %vm15275_vm1, %v15276_v38 }
0x1112   : > { %14229 = vmatmul.mubr.f32.vlgmr.msra.gmra.mrb[28].mxu1 %v10596_v32  ;;  %14921 = vmatprep.subr.bf16.mxu0 %v15274_v18 }
0x1113   : > { %14869 = vmatpush3.bf16.msra.mxu1 %v16406_v49  ;;  %14348 = vmatmul.mubr.f32.vlgmr.msra.gmra.mrb[26].mxu0 %v16468_v2 }
0x1114   : > { %14923 = vmatpush3.bf16.msra.mxu0 %v16480_v6  ;;  %14235 = vmatprep.mubr.msk.f32.mxu1 %vm15275_vm1, %v15276_v38 }
0x1115   : > { %14870 = vmatprep.subr.bf16.mxu1 %v15274_v18  ;;  %14361 = vmatprep.mubr.msk.f32.mxu0 %vm15275_vm1, %v15276_v38 }
0x1116   : > { %14236 = vmatmul.mubr.f32.vlgmr.msra.gmra.mrb[30].mxu1 %v10597_v52  ;;  %14927 = vmatprep.subr.bf16.mxu0 %v15274_v18 }
0x1117   : > { %14872 = vmatpush3.bf16.msra.mxu1 %v16417_v31  ;;  %14362 = vmatmul.mubr.f32.vlgmr.msra.gmra.mrb[28].mxu0 %v11990_v11  ;;  %v11526_v31 = vand.u32 4294901760, %v11525_v43 }
0x1118   : > { %14929 = vmatpush3.bf16.msra.mxu0 %v16480_v6  ;;  %14242 = vmatprep.mubr.msk.f32.mxu1 %vm15275_vm1, %v15276_v38 }
0x1119   : > { %14873 = vmatprep.subr.bf16.mxu1 %v15274_v18  ;;  %14375 = vmatprep.mubr.msk.f32.mxu0 %vm15275_vm1, %v15276_v38 }
0x111a   : > { %14243 = vmatmul.mubr.f32.vlgmr.msra.gmra.mrb[32].mxu1 %v16438_v47 }
0x111b   : > { %14875 = vmatpush3.bf16.msra.mxu1 %v16406_v49  ;;  %14376 = vmatmul.mubr.f32.vlgmr.msra.gmra.mrb[30].mxu0 %v16468_v2  ;;  %v14883_v49 = vpack.c.bf16 %v11076_v3, %v11069_v39 }
0x111c   : > { %14249 = vmatprep.mubr.msk.f32.mxu1 %vm15275_vm1, %v15276_v38  ;;  %14876 = vmatprep.subr.bf16.mxu1 %v15274_v18 }
0x111e   : > { %14250 = vmatmul.mubr.f32.vlgmr.msra.gmra.mrb[34].mxu1 %v16438_v47 }
0x111f   : > { %14878 = vmatpush3.bf16.msra.mxu1 %v14877_v16  ;;  %14256 = vmatprep.mubr.msk.f32.mxu1 %vm15275_vm1, %v15276_v38 }
0x1120   : > { %14879 = vmatprep.subr.bf16.mxu1 %v15274_v18 }
0x1122   : > { %14257 = vmatmul.mubr.f32.vlgmr.msra.gmra.mrb[36].mxu1 %v11061_v29 }
0x1123   : > { %14881 = vmatpush3.bf16.msra.mxu1 %v14880_v28  ;;  %14263 = vmatprep.mubr.msk.f32.mxu1 %vm15275_vm1, %v15276_v38 }
0x1124   : > { %14882 = vmatprep.subr.bf16.mxu1 %v15274_v18 }
0x1126   : > { %14264 = vmatmul.mubr.f32.vlgmr.msra.gmra.mrb[38].mxu1 %v16476_v5 }
0x1127   : > { %14884 = vmatpush3.bf16.msra.mxu1 %v14883_v49  ;;  %14270 = vmatprep.mubr.msk.f32.mxu1 %vm15275_vm1, %v15276_v38 }
0x1128   : > { %14885 = vmatprep.subr.bf16.mxu1 %v15274_v18 }
0x112a   : > { %14271 = vmatmul.mubr.f32.vlgmr.msra.gmra.mrb[40].mxu1 %v11058_v9 }
0x112b   : > { %14887 = vmatpush3.bf16.msra.mxu1 %v14877_v16  ;;  %14277 = vmatprep.mubr.msk.f32.mxu1 %vm15275_vm1, %v15276_v38 }
0x112c   : > { %14888 = vmatprep.subr.bf16.mxu1 %v15274_v18 }
0x112e   : > { %14278 = vmatmul.mubr.f32.vlgmr.msra.gmra.mrb[42].mxu1 %v11059_v50 }
0x112f   : > { %14890 = vmatpush3.bf16.msra.mxu1 %v14889_v30  ;;  %14284 = vmatprep.mubr.msk.f32.mxu1 %vm15275_vm1, %v15276_v38 }
0x1130   : > { %14891 = vmatprep.subr.bf16.mxu1 %v15274_v18 }
0x1132   : > { %14285 = vmatmul.mubr.f32.vlgmr.msra.gmra.mrb[44].mxu1 %v16476_v5 }
0x1133   : > { %14893 = vmatpush3.bf16.msra.mxu1 %v14877_v16  ;;  %14291 = vmatprep.mubr.msk.f32.mxu1 %vm15275_vm1, %v15276_v38 }
0x1134   : > { %14894 = vmatprep.subr.bf16.mxu1 %v15274_v18 }
0x1136   : > { %14292 = vmatmul.mubr.f32.vlgmr.msra.gmra.mrb[46].mxu1 %v16476_v5 }
0x1137   : > { %14896 = vmatpush3.bf16.msra.mxu1 %v16411_v27  ;;  %14298 = vmatprep.mubr.msk.f32.mxu1 %vm15275_vm1, %v15276_v38  ;;  %v11991_v27 = vsub.f32 %v16483_v7, %v11990_v11 }
0x1138   : > { %14900 = vmatprep.subr.bf16.mxu1 %v15274_v18 }
0x1139   : > { %v11992_v45 = vand.u32 4294901760, %v11991_v27 }
0x113a   : > { %14299 = vmatmul.mubr.f32.vlgmr.msra.gmra.mrb[48].mxu1 %v11526_v31 }
0x113b   : > { %14902 = vmatpush3.bf16.msra.mxu1 %v14901_v33  ;;  %14312 = vmatprep.mubr.msk.f32.mxu1 %vm15275_vm1, %v15276_v38 }
0x113c   : > { %14906 = vmatprep.subr.bf16.mxu1 %v15274_v18 }
0x113e   : > { %14313 = vmatmul.mubr.f32.vlgmr.msra.gmra.mrb[50].mxu1 %v16447_v56 }
0x113f   : > { %14908 = vmatpush3.bf16.msra.mxu1 %v16427_v36  ;;  %14326 = vmatprep.mubr.msk.f32.mxu1 %vm15275_vm1, %v15276_v38 }
0x1140   : > { %14912 = vmatprep.subr.bf16.mxu1 %v15274_v18 }
0x1142   : > { %14327 = vmatmul.mubr.f32.vlgmr.msra.gmra.mrb[52].mxu1 %v16444_v48 }
0x1143   : > { %14914 = vmatpush3.bf16.msra.mxu1 %v16480_v6  ;;  %14340 = vmatprep.mubr.msk.f32.mxu1 %vm15275_vm1, %v15276_v38 }
0x1144   : > { %14918 = vmatprep.subr.bf16.mxu1 %v15274_v18 }
0x1146   : > { %14341 = vmatmul.mubr.f32.vlgmr.msra.gmra.mrb[54].mxu1 %v11992_v45 }
0x1147   : > { %14920 = vmatpush3.bf16.msra.mxu1 %v14919_v1  ;;  %14354 = vmatprep.mubr.msk.f32.mxu1 %vm15275_vm1, %v15276_v38 }
0x1148   : > { %14924 = vmatprep.subr.bf16.mxu1 %v15274_v18 }
0x114a   : > { %14355 = vmatmul.mubr.f32.vlgmr.msra.gmra.mrb[56].mxu1 %v16483_v7 }
0x114b   : > { %14926 = vmatpush3.bf16.msra.mxu1 %v16435_v42  ;;  %14368 = vmatprep.mubr.msk.f32.mxu1 %vm15275_vm1, %v15276_v38 }
0x114e   : > { %14369 = vmatmul.mubr.f32.vlgmr.msra.gmra.mrb[58].mxu1 %v16468_v2 }
0x11da   : > { %v11609_v33 = vpop.f32.mrb[20].mxu0 }
0x11db   : > { %v14307_v34 = vpop.f32.mrb[21].mxu0 }
0x11dd   : > { %v10601_v60 = vpop.f32.mrb[24].mxu1 }
0x11de   : > { %v14216_v36 = vpop.f32.mrb[25].mxu1  ;;  %v11760_v37 = vpop.f32.mrb[22].mxu0 }
0x11df   : > { %v14321_v15 = vpop.f32.mrb[23].mxu0 }
0x11e1   : > { %v10682_v4 = vpop.f32.mrb[26].mxu1 }
0x11e2   : > { %v10683_v40 = vadd.f32 %v10682_v4, %v10601_v60  ;;  %v14223_v25 = vpop.f32.mrb[27].mxu1  ;;  %v11910_v41 = vpop.f32.mrb[24].mxu0  ;;  %v12513_v4 = vld [vmem:[%s16632_s8] ss:$0 sm:$0xff] }
0x11e3   : > { %v14335_v18 = vpop.f32.mrb[25].mxu0 }
0x11e5   : > { %v10758_v44 = vpop.f32.mrb[28].mxu1 }
0x11e6   : > { %v10759_v19 = vadd.f32 %v10758_v44, %v10683_v40  ;;  %v14230_v46 = vpop.f32.mrb[29].mxu1  ;;  %v12075_v42 = vpop.f32.mrb[26].mxu0 }
0x11e7   : > { %v14349_v47 = vpop.f32.mrb[27].mxu0 }
0x11e9   : > { %v10833_v32 = vpop.f32.mrb[30].mxu1 }
0x11ea   : > { %v10834_v38 = vadd.f32 %v10833_v32, %v10759_v19  ;;  %v14237_v35 = vpop.f32.mrb[31].mxu1  ;;  %v12226_v51 = vpop.f32.mrb[28].mxu0 }
0x11eb   : > { %v14363_v52 = vpop.f32.mrb[29].mxu0 }
0x11ed   : > { %v10910_v23 = vpop.f32.mrb[32].mxu1 }
0x11ee   : > { %v10911_v53 = vadd.f32 %v10910_v23, %v10834_v38  ;;  %v14244_v54 = vpop.f32.mrb[33].mxu1  ;;  %v12376_v48 = vpop.f32.mrb[30].mxu0 }
0x11ef   : > { %v14377_v55 = vpop.f32.mrb[31].mxu0 }
0x11f1   : > { %v10983_v56 = vpop.f32.mrb[34].mxu1 }
0x11f2   : > { %v10984_v24 = vadd.f32 %v10983_v56, %v10911_v53  ;;  %v14251_v57 = vpop.f32.mrb[35].mxu1 }
0x11f5   : > { %v11063_v59 = vpop.f32.mrb[36].mxu1 }
0x11f6   : > { %v11064_v61 = vadd.f32 %v11063_v59, %v10984_v24  ;;  %v14258_v62 = vpop.f32.mrb[37].mxu1 }
0x11f9   : > { %v11144_v63 = vpop.f32.mrb[38].mxu1 }
0x11fa   : > { %v11145_v0 = vadd.f32 %v11144_v63, %v11064_v61  ;;  %v14265_v10 = vpop.f32.mrb[39].mxu1 }
0x11fd   : > { %v11220_v14 = vpop.f32.mrb[40].mxu1 }
0x11fe   : > { %v11221_v17 = vadd.f32 %v11220_v14, %v11145_v0  ;;  %v14272_v21 = vpop.f32.mrb[41].mxu1 }
0x1201   : > { %v11295_v2 = vpop.f32.mrb[42].mxu1 }
0x1202   : > { %v11296_v39 = vadd.f32 %v11295_v2, %v11221_v17  ;;  %v14279_v3 = vpop.f32.mrb[43].mxu1 }
0x1205   : > { %v11372_v5 = vpop.f32.mrb[44].mxu1 }
0x1206   : > { %v11373_v6 = vadd.f32 %v11372_v5, %v11296_v39  ;;  %v14286_v7 = vpop.f32.mrb[45].mxu1 }
0x1209   : > { %v11445_v8 = vpop.f32.mrb[46].mxu1 }
0x120a   : > { %v11446_v58 = vadd.f32 %v11445_v8, %v11373_v6  ;;  %v14293_v9 = vpop.f32.mrb[47].mxu1 }
0x120d   : > { %v11528_v11 = vpop.f32.mrb[48].mxu1 }
0x120e   : > { %v11610_v12 = vadd.f32 %v11609_v33, %v11528_v11  ;;  %v14300_v13 = vpop.f32.mrb[49].mxu1 }
0x1211   : > { %v11685_v50 = vpop.f32.mrb[50].mxu1 }
0x1212   : > { %v11686_v16 = vadd.f32 %v11685_v50, %v11610_v12  ;;  %v14314_v20 = vpop.f32.mrb[51].mxu1 }
0x1214   : > { %v11761_v22 = vadd.f32 %v11760_v37, %v11686_v16 }
0x1215   : > { %v11837_v26 = vpop.f32.mrb[52].mxu1 }
0x1216   : > { %v11838_v28 = vadd.f32 %v11837_v26, %v11761_v22  ;;  %v14328_v29 = vpop.f32.mrb[53].mxu1 }
0x1218   : > { %v11911_v49 = vadd.f32 %v11910_v41, %v11838_v28 }
0x1219   : > { %v11994_v30 = vpop.f32.mrb[54].mxu1 }
0x121a   : > { %v11914_v43 = vadd.f32 %v11911_v49, %v11446_v58  ;;  %v12076_v31 = vadd.f32 %v12075_v42, %v11994_v30  ;;  %v14342_v27 = vpop.f32.mrb[55].mxu1 }
0x121d   : > { %v12151_v1 = vpop.f32.mrb[56].mxu1 }
0x121e   : > { %v12152_v45 = vadd.f32 %v12151_v1, %v12076_v31  ;;  %v14356_v34 = vpop.f32.mrb[57].mxu1 }
0x1220   : > { %v12227_v33 = vadd.f32 %v12226_v51, %v12152_v45 }
0x1221   : > { %v12303_v60 = vpop.f32.mrb[58].mxu1 }
0x1222   : > { %v12304_v36 = vadd.f32 %v12303_v60, %v12227_v33  ;;  %v14370_v15 = vpop.f32.mrb[59].mxu1 }
0x1224   : > { %v12377_v37 = vadd.f32 %v12376_v48, %v12304_v36 }
0x1226   : > { %v12380_v40 = vadd.f32 %v12377_v37, %v11914_v43 }
0x1228   : > { %v12388_v25 = vadd.f32 %v12513_v4, %v12380_v40 }
0x122a   : > { %12389 = vst.msk [vmem:[%s323_s23] sm:$0xff] %vm329_vm0, %v12388_v25 }
0x122b   : > { %15223 = shalt.err (!%p15220_p3)
}
0x122c   : > { %s15224_s14 = scalar_lea.hbm %s16581_s27, 128  ;;  %s15228_s23 = scalar_lea.hbm %s16633_s9, 256 }
0x122d   : > { %p15225_p4 = scmp.ne.s32.totalorder %s16581_s27, %s15224_s14  ;;  %p15229_p9 = scmp.lt.u32.totalorder %s16581_s27, %s16633_s9 }
0x122e   : > { %p15230_p10 = scmp.lt.u32.totalorder %s15228_s23, %s15224_s14  ;;  %p15232_p12 = scmp.lt.u32.totalorder %s15224_s14, %s16581_s27 }
0x122f   : > { %p15226_p7 = pnand %p15225_p4, %p15366_p5 }
0x1230   : > { %p15231_p11 = por %p15230_p10, %p15229_p9 }
0x1231   : > { %p15227_p8 = pneg %p15226_p7 }
0x1232   : > { %p15233_p13 = por %p15232_p12, %p15231_p11 }
0x1234   : > { %p15234_p0 = pnand %p15233_p13, %p15227_p8 }
0x1236   : > { %15237 = shalt.err (!%p15234_p0)
}
0x1237   : > { %15150 = dma.vmem_to_hbm [thread:$0]  (%p15366_p5), %s16583_s24, 128, %s16581_s27, %s12391_s28  }
0x1238 PF: > { %p15156_p1 = scmp.ge.s32.totalorder %s15272_s12, 2  ;;  %s12416_s29 = sand.u32 1, %s15260_s30  }
0x1239   : > { %s12417_s13 = scalar_lea.sflag [#allocation3], %s12416_s29 }
0x123a   : > { %p15153_p2 = pnand %p15156_p1, %p15370_p6 }
0x123c   : > { %15255 = dma.done.wait (!%p15153_p2), %s12417_s13, 128  }
0x123d   : > { %15257 = vsyncadd (!%p15153_p2), %s12417_s13, 4294967168  ;;  %p19_p3 = scmp.ge.s32.totalorder %s15353_s15, 4   ;;  %s16636_s30 = smov %s15264_s10 }
0x123e   : > { %s16637_s10 = smov %s15268_s11  ;;  %s16638_s11 = smov %s15364_s18 }
0x123f   : > { %s16639_s12 = smov %s15353_s15  ;;  %21 = sbr.rel (!%p19_p3) target bundleno = 3 (0x3), region = 103 }
0x1246   :  { %12422 = vsyncpa [#allocation3], 1 }
0x1247   :  { %12424 = vsyncpa [#allocation3 + $0x1], 1 }

</bundles_post_ra>
